<compile_context>
chip_gen: v7x
topology: tpu7x:2x2x1
jax: 0.10.0
libtpu: 0.0.40
codegen_flags: <defaults>
</compile_context>

<pallas_src>
import functools

import jax
import jax.numpy as jnp
from jax import lax
from jax.experimental import pallas as pl
from jax.experimental.pallas import tpu as pltpu


def _leaky(x, slope=0.1):
    return jnp.where(x > 0, x, slope * x)


def _round_up(v, m):
    return ((v + m - 1) // m) * m


# ------------------------------ fused kernel -------------------------------

def _rcab_kernel(xp_ref, w1_ref, b1_ref, w2_ref, b2_ref,
                 wd1_ref, bd1_ref, wd2t_ref, bd2_ref, o_ref,
                 p2_ref, *, H, W, BASE2):
    # xp_ref : (CP, PADLEN)  pre-padded input, pixel (h,w) at offset (h+1)*PW + (w+1)
    # w1/w2  : (9, CP, CP)   per-tap weights, tap = ky*3 + kx, [cout, cin]
    # b1/b2  : (CP, 1); wd1: (CP, 4); bd1: (1, 4); wd2t: (CP, 4); bd2: (CP, 1)
    # o_ref  : (CP, OUT)     output in the stride-PW "acc" layout (valid cols < W)
    # p2_ref : (CP, P2LEN)   VMEM scratch holding the re-padded conv1 output
    HW = H * W
    PW = W + 2
    OUT = H * PW
    ORG2 = BASE2 - (PW + 1)            # p2 offset of padded pixel (0, 0) for conv2

    # Valid-output-column mask in the acc layout (in-kernel iota, no extra input).
    col = lax.broadcasted_iota(jnp.int32, (1, OUT), 1) % PW
    mask = (col < W).astype(jnp.float32)

    def conv3x3(tap_src, w_ref):
        # 9 MXU dots; one partial accumulator per kernel row breaks the dep chain.
        row_accs = []
        for dy in range(3):
            acc = None
            for dx in range(3):
                wt = w_ref[dy * 3 + dx]                       # (Cout, Cin)
                src = tap_src(dy, dx)                         # (Cin, OUT)
                d = jnp.dot(wt, src, precision=lax.Precision.HIGHEST,
                            preferred_element_type=jnp.float32)
                acc = d if acc is None else acc + d
            row_accs.append(acc)
        return row_accs[0] + row_accs[1] + row_accs[2]

    # ---- conv1 + bias + LeakyReLU: taps read straight from the pre-padded input ----
    y1 = _leaky(conv3x3(
        lambda dy, dx: xp_ref[:, dy * PW + dx: dy * PW + dx + OUT], w1_ref)
        + b1_ref[...])                                        # (CP, OUT)

    # ---- re-pad conv1 output: one lane-aligned dense store at offset BASE2 ----------
    p2_ref[...] = jnp.zeros_like(p2_ref)
    p2_ref[:, BASE2:BASE2 + OUT] = y1 * mask

    # ---- conv2 + bias ----------------------------------------------------------------
    t = conv3x3(
        lambda dy, dx: p2_ref[:, ORG2 + dy * PW + dx: ORG2 + dy * PW + dx + OUT],
        w2_ref) + b2_ref[...]                                 # (CP, OUT)

    # ---- CALayer: masked global avg pool + 1x1 -> leaky -> 1x1 -> sigmoid ------------
    pooled = jnp.sum(t * mask, axis=1, keepdims=True) * (1.0 / HW)             # (CP, 1)
    z = _leaky(jnp.sum(wd1_ref[...] * pooled, axis=0, keepdims=True)
               + bd1_ref[...])                                                 # (1, 4)
    s = jax.nn.sigmoid(jnp.sum(wd2t_ref[...] * z, axis=1, keepdims=True)
                       + bd2_ref[...])                                         # (CP, 1)

    # ---- residual add in the padded layout; single dense store -----------------------
    x_acc = xp_ref[:, PW + 1: PW + 1 + OUT]                   # x in acc layout
    o_ref[...] = (x_acc + t * s).astype(o_ref.dtype)


# ------------------------------ wrappers ------------------------------------

def prepare_params(params):
    """One-time rearrangement / channel-padding of the RCAB parameters."""
    C = params["w1"].shape[2]
    CP = max(8, _round_up(C, 8))

    def conv_w(w):   # HWIO (3,3,Cin,Cout) -> (9, CPout, CPin), tap = ky*3 + kx
        w = jnp.transpose(w, (0, 1, 3, 2)).reshape(9, C, C)
        return jnp.pad(w, ((0, 0), (0, CP - C), (0, CP - C)))

    def vec(b):      # (1, C) -> (CP, 1)
        return jnp.pad(b.reshape(C, 1), ((0, CP - C), (0, 0)))

    return {
        "w1": conv_w(params["w1"]), "b1": vec(params["b1"]),
        "w2": conv_w(params["w2"]), "b2": vec(params["b2"]),
        "wd1": jnp.pad(params["wd1"], ((0, CP - C), (0, 0))),
        "bd1": params["bd1"].reshape(1, -1),
        "wd2t": jnp.pad(params["wd2"].T, ((0, CP - C), (0, 0))),
        "bd2": vec(params["bd2"]),
    }


def rcab_forward(x_nchw, kp):
    """RCAB forward.  x_nchw: (N, C, H, W) float32, same semantics as the PyTorch module."""
    N, C, H, W = x_nchw.shape
    CP = kp["b1"].shape[0]
    PW = W + 2
    OUT = H * PW
    PADLEN = _round_up((H + 2) * PW + 2, 128)       # flat padded input length (+ tap slack)
    BASE2 = _round_up(PW + 1, 128)                  # lane-aligned base of the re-padded image
    P2LEN = _round_up(BASE2 + PW + 1 + OUT, 128)

    # Wrapper-side pre-pad (fused XLA): 1-px zero border, channel pad to CP, flat layout.
    xp = jnp.pad(x_nchw, ((0, 0), (0, CP - C), (1, 1), (1, 1)))
    xp = xp.reshape(N, CP, (H + 2) * PW)
    xp = jnp.pad(xp, ((0, 0), (0, 0), (0, PADLEN - (H + 2) * PW)))

    kernel = functools.partial(_rcab_kernel, H=H, W=W, BASE2=BASE2)
    flops = N * (2 * 2 * 9 * CP * CP * OUT + 8 * CP * OUT)

    out = pl.pallas_call(
        kernel,
        out_shape=jax.ShapeDtypeStruct((N, CP, OUT), x_nchw.dtype),
        grid=(N,),
        in_specs=[
            pl.BlockSpec((None, CP, PADLEN), lambda n: (n, 0, 0)),
            pl.BlockSpec((9, CP, CP), lambda n: (0, 0, 0)),
            pl.BlockSpec((CP, 1), lambda n: (0, 0)),
            pl.BlockSpec((9, CP, CP), lambda n: (0, 0, 0)),
            pl.BlockSpec((CP, 1), lambda n: (0, 0)),
            pl.BlockSpec((CP, 4), lambda n: (0, 0)),
            pl.BlockSpec((1, 4), lambda n: (0, 0)),
            pl.BlockSpec((CP, 4), lambda n: (0, 0)),
            pl.BlockSpec((CP, 1), lambda n: (0, 0)),
        ],
        out_specs=pl.BlockSpec((None, CP, OUT), lambda n: (n, 0, 0)),
        scratch_shapes=[pltpu.VMEM((CP, P2LEN), jnp.float32)],
        compiler_params=pltpu.CompilerParams(
            dimension_semantics=("parallel",),
            vmem_limit_bytes=32 << 20),
        cost_estimate=pl.CostEstimate(
            flops=flops, transcendentals=N * (CP + 4),
            bytes_accessed=N * CP * (PADLEN + OUT) * 4),
    )(xp, kp["w1"], kp["b1"], kp["w2"], kp["b2"],
      kp["wd1"], kp["bd1"], kp["wd2t"], kp["bd2"])

    # Drop channel padding and per-row stride padding: acc index j = h*PW + w, valid w < W.
    return out.reshape(N, CP, H, PW)[:, :C, :, :W]


# --------------------------- pure-JAX reference -----------------------------

def rcab_reference(x_nchw, params):
    x = jnp.transpose(x_nchw, (0, 2, 3, 1))

    def conv(h, w, b):
        return lax.conv_general_dilated(
            h, w, (1, 1), "SAME",
            dimension_numbers=("NHWC", "HWIO", "NHWC")) + b.reshape(1, 1, 1, -1)

    t = _leaky(conv(x, params["w1"], params["b1"]))
    t = conv(t, params["w2"], params["b2"])
    y = jnp.mean(t, axis=(1, 2), keepdims=True)                       # (N,1,1,C)
    z = _leaky(jnp.einsum("nijc,cd->nijd", y, params["wd1"])
               + params["bd1"].reshape(1, 1, 1, -1))
    s = jax.nn.sigmoid(jnp.einsum("nijd,dc->nijc", z, params["wd2"])
                       + params["bd2"].reshape(1, 1, 1, -1))
    out = x + t * s
    return jnp.transpose(out, (0, 3, 1, 2))


# --------------------------------- main --------------------------------------

if __name__ == "__main__":
    N, C, H, W = 2, 4, 16, 16          # n_feat = 4
    key = jax.random.PRNGKey(0)
    keys = jax.random.split(key, 9)

    params = {
        # conv1: Conv2d(C, C, 3, padding=1) ; stored as HWIO (kh, kw, cin, cout)
        "w1": 0.1 * jax.random.normal(keys[0], (3, 3, C, C), jnp.float32),
        "b1": 0.1 * jax.random.normal(keys[1], (1, C), jnp.float32),
        # conv2: Conv2d(C, C, 3, padding=1)
        "w2": 0.1 * jax.random.normal(keys[2], (3, 3, C, C), jnp.float32),
        "b2": 0.1 * jax.random.normal(keys[3], (1, C), jnp.float32),
        # CALayer conv_du: Conv2d(C, 4, 1) -> leaky -> Conv2d(4, C, 1) -> sigmoid
        "wd1": 0.1 * jax.random.normal(keys[4], (C, 4), jnp.float32),
        "bd1": 0.1 * jax.random.normal(keys[5], (1, 4), jnp.float32),
        "wd2": 0.1 * jax.random.normal(keys[6], (4, C), jnp.float32),
        "bd2": 0.1 * jax.random.normal(keys[7], (1, C), jnp.float32),
    }

    x = jax.random.normal(keys[8], (N, C, H, W), jnp.float32)

    kp = prepare_params(params)
    out = jax.block_until_ready(jax.jit(rcab_forward)(x, kp))
    ref = jax.block_until_ready(rcab_reference(x, params))

    assert out.shape == (N, C, H, W) and out.dtype == jnp.float32
    assert jnp.allclose(out, ref, rtol=1e-3, atol=1e-3), \
        f"max abs diff {float(jnp.max(jnp.abs(out - ref)))}"

    print("KERNEL_OK")
</pallas_src>

<mosaic_0001>
module attributes {stable_mosaic.version = 11 : i64} {
  func.func @_rcab_kernel(%arg0: i32, %arg1: memref<1x8x384xf32, #tpu.memory_space<vmem>>, %arg2: memref<9x8x8xf32, #tpu.memory_space<vmem>>, %arg3: memref<8x1xf32, #tpu.memory_space<vmem>>, %arg4: memref<9x8x8xf32, #tpu.memory_space<vmem>>, %arg5: memref<8x1xf32, #tpu.memory_space<vmem>>, %arg6: memref<8x4xf32, #tpu.memory_space<vmem>>, %arg7: memref<1x4xf32, #tpu.memory_space<vmem>>, %arg8: memref<8x4xf32, #tpu.memory_space<vmem>>, %arg9: memref<8x1xf32, #tpu.memory_space<vmem>>, %arg10: memref<1x8x288xf32, #tpu.memory_space<vmem>>, %arg11: memref<8x512xf32, #tpu.memory_space<vmem>>) attributes {dimension_semantics = [#tpu.dimension_semantics<parallel>], iteration_bounds = array<i64: 2>, scalar_prefetch = 0 : i64, scratch_operands = 1 : i64, tpu.core_type = #tpu.core_type<tc>, window_params = [{transform_indices = @transform_0, window_bounds = array<i64: 1, 8, 384>}, {pipeline_mode = #tpu.pipeline_mode<synchronous>, transform_indices = @transform_1, window_bounds = array<i64: 9, 8, 8>}, {pipeline_mode = #tpu.pipeline_mode<synchronous>, transform_indices = @transform_2, window_bounds = array<i64: 8, 1>}, {pipeline_mode = #tpu.pipeline_mode<synchronous>, transform_indices = @transform_3, window_bounds = array<i64: 9, 8, 8>}, {pipeline_mode = #tpu.pipeline_mode<synchronous>, transform_indices = @transform_4, window_bounds = array<i64: 8, 1>}, {pipeline_mode = #tpu.pipeline_mode<synchronous>, transform_indices = @transform_5, window_bounds = array<i64: 8, 4>}, {pipeline_mode = #tpu.pipeline_mode<synchronous>, transform_indices = @transform_6, window_bounds = array<i64: 1, 4>}, {pipeline_mode = #tpu.pipeline_mode<synchronous>, transform_indices = @transform_7, window_bounds = array<i64: 8, 4>}, {pipeline_mode = #tpu.pipeline_mode<synchronous>, transform_indices = @transform_8, window_bounds = array<i64: 8, 1>}, {transform_indices = @transform_9, window_bounds = array<i64: 1, 8, 288>}]} {
    %0 = tpu.iota {dimensions = array<i32: 1>} : vector<1x288xi32>
    %c18_i32 = arith.constant 18 : i32
    %c0_i32 = arith.constant 0 : i32
    %1 = arith.cmpi eq, %c18_i32, %c0_i32 : i32
    %c1_i32 = arith.constant 1 : i32
    %2 = arith.select %1, %c1_i32, %c18_i32 : i32
    %3 = vector.broadcast %2 : i32 to vector<1x288xi32>
    %4 = arith.remsi %0, %3 : vector<1x288xi32>
    %c0_i32_0 = arith.constant 0 : i32
    %5 = vector.broadcast %c0_i32_0 : i32 to vector<1x288xi32>
    %6 = arith.cmpi ne, %4, %5 : vector<1x288xi32>
    %c0_i32_1 = arith.constant 0 : i32
    %7 = vector.broadcast %c0_i32_1 : i32 to vector<1x288xi32>
    %8 = arith.cmpi slt, %4, %7 : vector<1x288xi32>
    %c0_i32_2 = arith.constant 0 : i32
    %9 = arith.cmpi slt, %2, %c0_i32_2 : i32
    %10 = vector.broadcast %9 : i1 to vector<1x288xi1>
    %11 = vector.broadcast %10 : vector<1x288xi1> to vector<1x288xi1>
    %12 = arith.xori %8, %11 : vector<1x288xi1>
    %13 = arith.andi %12, %6 : vector<1x288xi1>
    %14 = vector.broadcast %2 : i32 to vector<1x288xi32>
    %15 = arith.addi %4, %14 : vector<1x288xi32>
    %16 = arith.select %13, %15, %4 : vector<1x288xi1>, vector<1x288xi32>
    %c16_i32 = arith.constant 16 : i32
    %17 = vector.broadcast %c16_i32 : i32 to vector<1x288xi32>
    %18 = arith.cmpi slt, %16, %17 : vector<1x288xi32>
    %19 = arith.extui %18 : vector<1x288xi1> to vector<1x288xi32>
    %20 = arith.sitofp %19 : vector<1x288xi32> to vector<1x288xf32>
    %c0 = arith.constant 0 : index
    %c0_3 = arith.constant 0 : index
    %c0_4 = arith.constant 0 : index
    %21 = vector.load %arg2[%c0, %c0_3, %c0_4] : memref<9x8x8xf32, #tpu.memory_space<vmem>>, vector<1x8x8xf32>
    %22 = vector.shape_cast %21 : vector<1x8x8xf32> to vector<8x8xf32>
    %c0_5 = arith.constant 0 : index
    %c0_6 = arith.constant 0 : index
    %c0_7 = arith.constant 0 : index
    %23 = vector.load %arg1[%c0_5, %c0_6, %c0_7] : memref<1x8x384xf32, #tpu.memory_space<vmem>>, vector<1x8x288xf32>
    %24 = vector.shape_cast %23 : vector<1x8x288xf32> to vector<8x288xf32>
    %cst = arith.constant dense<0.000000e+00> : vector<8x288xf32>
    %25 = tpu.matmul %22, %24, %cst {dimension_numbers = #tpu.dot_dimension_numbers<[1], [0], [0], [1], [0, 0, 1, 1], [], []>, precision = #tpu.contract_precision<fp32>} : vector<8x8xf32>, vector<8x288xf32>, vector<8x288xf32> -> vector<8x288xf32>
    %c1 = arith.constant 1 : index
    %c0_8 = arith.constant 0 : index
    %c0_9 = arith.constant 0 : index
    %26 = vector.load %arg2[%c1, %c0_8, %c0_9] : memref<9x8x8xf32, #tpu.memory_space<vmem>>, vector<1x8x8xf32>
    %27 = vector.shape_cast %26 : vector<1x8x8xf32> to vector<8x8xf32>
    %c0_10 = arith.constant 0 : index
    %c0_11 = arith.constant 0 : index
    %c1_12 = arith.constant 1 : index
    %28 = vector.load %arg1[%c0_10, %c0_11, %c1_12] : memref<1x8x384xf32, #tpu.memory_space<vmem>>, vector<1x8x288xf32>
    %29 = vector.shape_cast %28 : vector<1x8x288xf32> to vector<8x288xf32>
    %cst_13 = arith.constant dense<0.000000e+00> : vector<8x288xf32>
    %30 = tpu.matmul %27, %29, %cst_13 {dimension_numbers = #tpu.dot_dimension_numbers<[1], [0], [0], [1], [0, 0, 1, 1], [], []>, precision = #tpu.contract_precision<fp32>} : vector<8x8xf32>, vector<8x288xf32>, vector<8x288xf32> -> vector<8x288xf32>
    %31 = arith.addf %25, %30 : vector<8x288xf32>
    %c2 = arith.constant 2 : index
    %c0_14 = arith.constant 0 : index
    %c0_15 = arith.constant 0 : index
    %32 = vector.load %arg2[%c2, %c0_14, %c0_15] : memref<9x8x8xf32, #tpu.memory_space<vmem>>, vector<1x8x8xf32>
    %33 = vector.shape_cast %32 : vector<1x8x8xf32> to vector<8x8xf32>
    %c0_16 = arith.constant 0 : index
    %c0_17 = arith.constant 0 : index
    %c2_18 = arith.constant 2 : index
    %34 = vector.load %arg1[%c0_16, %c0_17, %c2_18] : memref<1x8x384xf32, #tpu.memory_space<vmem>>, vector<1x8x288xf32>
    %35 = vector.shape_cast %34 : vector<1x8x288xf32> to vector<8x288xf32>
    %cst_19 = arith.constant dense<0.000000e+00> : vector<8x288xf32>
    %36 = tpu.matmul %33, %35, %cst_19 {dimension_numbers = #tpu.dot_dimension_numbers<[1], [0], [0], [1], [0, 0, 1, 1], [], []>, precision = #tpu.contract_precision<fp32>} : vector<8x8xf32>, vector<8x288xf32>, vector<8x288xf32> -> vector<8x288xf32>
    %37 = arith.addf %31, %36 : vector<8x288xf32>
    %c3 = arith.constant 3 : index
    %c0_20 = arith.constant 0 : index
    %c0_21 = arith.constant 0 : index
    %38 = vector.load %arg2[%c3, %c0_20, %c0_21] : memref<9x8x8xf32, #tpu.memory_space<vmem>>, vector<1x8x8xf32>
    %39 = vector.shape_cast %38 : vector<1x8x8xf32> to vector<8x8xf32>
    %c0_22 = arith.constant 0 : index
    %c0_23 = arith.constant 0 : index
    %c18 = arith.constant 18 : index
    %40 = vector.load %arg1[%c0_22, %c0_23, %c18] : memref<1x8x384xf32, #tpu.memory_space<vmem>>, vector<1x8x288xf32>
    %41 = vector.shape_cast %40 : vector<1x8x288xf32> to vector<8x288xf32>
    %cst_24 = arith.constant dense<0.000000e+00> : vector<8x288xf32>
    %42 = tpu.matmul %39, %41, %cst_24 {dimension_numbers = #tpu.dot_dimension_numbers<[1], [0], [0], [1], [0, 0, 1, 1], [], []>, precision = #tpu.contract_precision<fp32>} : vector<8x8xf32>, vector<8x288xf32>, vector<8x288xf32> -> vector<8x288xf32>
    %c4 = arith.constant 4 : index
    %c0_25 = arith.constant 0 : index
    %c0_26 = arith.constant 0 : index
    %43 = vector.load %arg2[%c4, %c0_25, %c0_26] : memref<9x8x8xf32, #tpu.memory_space<vmem>>, vector<1x8x8xf32>
    %44 = vector.shape_cast %43 : vector<1x8x8xf32> to vector<8x8xf32>
    %c0_27 = arith.constant 0 : index
    %c0_28 = arith.constant 0 : index
    %c19 = arith.constant 19 : index
    %45 = vector.load %arg1[%c0_27, %c0_28, %c19] : memref<1x8x384xf32, #tpu.memory_space<vmem>>, vector<1x8x288xf32>
    %46 = vector.shape_cast %45 : vector<1x8x288xf32> to vector<8x288xf32>
    %cst_29 = arith.constant dense<0.000000e+00> : vector<8x288xf32>
    %47 = tpu.matmul %44, %46, %cst_29 {dimension_numbers = #tpu.dot_dimension_numbers<[1], [0], [0], [1], [0, 0, 1, 1], [], []>, precision = #tpu.contract_precision<fp32>} : vector<8x8xf32>, vector<8x288xf32>, vector<8x288xf32> -> vector<8x288xf32>
    %48 = arith.addf %42, %47 : vector<8x288xf32>
    %c5 = arith.constant 5 : index
    %c0_30 = arith.constant 0 : index
    %c0_31 = arith.constant 0 : index
    %49 = vector.load %arg2[%c5, %c0_30, %c0_31] : memref<9x8x8xf32, #tpu.memory_space<vmem>>, vector<1x8x8xf32>
    %50 = vector.shape_cast %49 : vector<1x8x8xf32> to vector<8x8xf32>
    %c0_32 = arith.constant 0 : index
    %c0_33 = arith.constant 0 : index
    %c20 = arith.constant 20 : index
    %51 = vector.load %arg1[%c0_32, %c0_33, %c20] : memref<1x8x384xf32, #tpu.memory_space<vmem>>, vector<1x8x288xf32>
    %52 = vector.shape_cast %51 : vector<1x8x288xf32> to vector<8x288xf32>
    %cst_34 = arith.constant dense<0.000000e+00> : vector<8x288xf32>
    %53 = tpu.matmul %50, %52, %cst_34 {dimension_numbers = #tpu.dot_dimension_numbers<[1], [0], [0], [1], [0, 0, 1, 1], [], []>, precision = #tpu.contract_precision<fp32>} : vector<8x8xf32>, vector<8x288xf32>, vector<8x288xf32> -> vector<8x288xf32>
    %54 = arith.addf %48, %53 : vector<8x288xf32>
    %c6 = arith.constant 6 : index
    %c0_35 = arith.constant 0 : index
    %c0_36 = arith.constant 0 : index
    %55 = vector.load %arg2[%c6, %c0_35, %c0_36] : memref<9x8x8xf32, #tpu.memory_space<vmem>>, vector<1x8x8xf32>
    %56 = vector.shape_cast %55 : vector<1x8x8xf32> to vector<8x8xf32>
    %c0_37 = arith.constant 0 : index
    %c0_38 = arith.constant 0 : index
    %c36 = arith.constant 36 : index
    %57 = vector.load %arg1[%c0_37, %c0_38, %c36] : memref<1x8x384xf32, #tpu.memory_space<vmem>>, vector<1x8x288xf32>
    %58 = vector.shape_cast %57 : vector<1x8x288xf32> to vector<8x288xf32>
    %cst_39 = arith.constant dense<0.000000e+00> : vector<8x288xf32>
    %59 = tpu.matmul %56, %58, %cst_39 {dimension_numbers = #tpu.dot_dimension_numbers<[1], [0], [0], [1], [0, 0, 1, 1], [], []>, precision = #tpu.contract_precision<fp32>} : vector<8x8xf32>, vector<8x288xf32>, vector<8x288xf32> -> vector<8x288xf32>
    %c7 = arith.constant 7 : index
    %c0_40 = arith.constant 0 : index
    %c0_41 = arith.constant 0 : index
    %60 = vector.load %arg2[%c7, %c0_40, %c0_41] : memref<9x8x8xf32, #tpu.memory_space<vmem>>, vector<1x8x8xf32>
    %61 = vector.shape_cast %60 : vector<1x8x8xf32> to vector<8x8xf32>
    %c0_42 = arith.constant 0 : index
    %c0_43 = arith.constant 0 : index
    %c37 = arith.constant 37 : index
    %62 = vector.load %arg1[%c0_42, %c0_43, %c37] : memref<1x8x384xf32, #tpu.memory_space<vmem>>, vector<1x8x288xf32>
    %63 = vector.shape_cast %62 : vector<1x8x288xf32> to vector<8x288xf32>
    %cst_44 = arith.constant dense<0.000000e+00> : vector<8x288xf32>
    %64 = tpu.matmul %61, %63, %cst_44 {dimension_numbers = #tpu.dot_dimension_numbers<[1], [0], [0], [1], [0, 0, 1, 1], [], []>, precision = #tpu.contract_precision<fp32>} : vector<8x8xf32>, vector<8x288xf32>, vector<8x288xf32> -> vector<8x288xf32>
    %65 = arith.addf %59, %64 : vector<8x288xf32>
    %c8 = arith.constant 8 : index
    %c0_45 = arith.constant 0 : index
    %c0_46 = arith.constant 0 : index
    %66 = vector.load %arg2[%c8, %c0_45, %c0_46] : memref<9x8x8xf32, #tpu.memory_space<vmem>>, vector<1x8x8xf32>
    %67 = vector.shape_cast %66 : vector<1x8x8xf32> to vector<8x8xf32>
    %c0_47 = arith.constant 0 : index
    %c0_48 = arith.constant 0 : index
    %c38 = arith.constant 38 : index
    %68 = vector.load %arg1[%c0_47, %c0_48, %c38] : memref<1x8x384xf32, #tpu.memory_space<vmem>>, vector<1x8x288xf32>
    %69 = vector.shape_cast %68 : vector<1x8x288xf32> to vector<8x288xf32>
    %cst_49 = arith.constant dense<0.000000e+00> : vector<8x288xf32>
    %70 = tpu.matmul %67, %69, %cst_49 {dimension_numbers = #tpu.dot_dimension_numbers<[1], [0], [0], [1], [0, 0, 1, 1], [], []>, precision = #tpu.contract_precision<fp32>} : vector<8x8xf32>, vector<8x288xf32>, vector<8x288xf32> -> vector<8x288xf32>
    %71 = arith.addf %65, %70 : vector<8x288xf32>
    %72 = arith.addf %37, %54 : vector<8x288xf32>
    %73 = arith.addf %72, %71 : vector<8x288xf32>
    %c0_50 = arith.constant 0 : index
    %c0_51 = arith.constant 0 : index
    %74 = vector.load %arg3[%c0_50, %c0_51] : memref<8x1xf32, #tpu.memory_space<vmem>>, vector<8x1xf32>
    %75 = vector.broadcast %74 : vector<8x1xf32> to vector<8x288xf32>
    %76 = arith.addf %73, %75 : vector<8x288xf32>
    %cst_52 = arith.constant 0.000000e+00 : f32
    %77 = vector.broadcast %cst_52 : f32 to vector<8x288xf32>
    %78 = arith.cmpf ogt, %76, %77 : vector<8x288xf32>
    %cst_53 = arith.constant 1.000000e-01 : f32
    %79 = vector.broadcast %cst_53 : f32 to vector<8x288xf32>
    %80 = arith.mulf %79, %76 : vector<8x288xf32>
    %81 = arith.select %78, %76, %80 : vector<8x288xi1>, vector<8x288xf32>
    %cst_54 = arith.constant 0.000000e+00 : f32
    %82 = vector.broadcast %cst_54 : f32 to vector<8x512xf32>
    %c0_55 = arith.constant 0 : index
    %c0_56 = arith.constant 0 : index
    %83 = vector.load %arg11[%c0_55, %c0_56] : memref<8x512xf32, #tpu.memory_space<vmem>>, vector<8x512xf32>
    tpu.vector_store %arg11[%c0_55, %c0_56], %82 {strides = array<i32>} : memref<8x512xf32, #tpu.memory_space<vmem>>, vector<8x512xf32>,
    %84 = vector.broadcast %20 : vector<1x288xf32> to vector<8x288xf32>
    %85 = arith.mulf %81, %84 : vector<8x288xf32>
    %c0_57 = arith.constant 0 : index
    %c128 = arith.constant 128 : index
    %86 = vector.load %arg11[%c0_57, %c128] : memref<8x512xf32, #tpu.memory_space<vmem>>, vector<8x288xf32>
    tpu.vector_store %arg11[%c0_57, %c128], %85 {strides = array<i32>} : memref<8x512xf32, #tpu.memory_space<vmem>>, vector<8x288xf32>,
    %c0_58 = arith.constant 0 : index
    %c0_59 = arith.constant 0 : index
    %c0_60 = arith.constant 0 : index
    %87 = vector.load %arg4[%c0_58, %c0_59, %c0_60] : memref<9x8x8xf32, #tpu.memory_space<vmem>>, vector<1x8x8xf32>
    %88 = vector.shape_cast %87 : vector<1x8x8xf32> to vector<8x8xf32>
    %c0_61 = arith.constant 0 : index
    %c109 = arith.constant 109 : index
    %89 = vector.load %arg11[%c0_61, %c109] : memref<8x512xf32, #tpu.memory_space<vmem>>, vector<8x288xf32>
    %cst_62 = arith.constant dense<0.000000e+00> : vector<8x288xf32>
    %90 = tpu.matmul %88, %89, %cst_62 {dimension_numbers = #tpu.dot_dimension_numbers<[1], [0], [0], [1], [0, 0, 1, 1], [], []>, precision = #tpu.contract_precision<fp32>} : vector<8x8xf32>, vector<8x288xf32>, vector<8x288xf32> -> vector<8x288xf32>
    %c1_63 = arith.constant 1 : index
    %c0_64 = arith.constant 0 : index
    %c0_65 = arith.constant 0 : index
    %91 = vector.load %arg4[%c1_63, %c0_64, %c0_65] : memref<9x8x8xf32, #tpu.memory_space<vmem>>, vector<1x8x8xf32>
    %92 = vector.shape_cast %91 : vector<1x8x8xf32> to vector<8x8xf32>
    %c0_66 = arith.constant 0 : index
    %c110 = arith.constant 110 : index
    %93 = vector.load %arg11[%c0_66, %c110] : memref<8x512xf32, #tpu.memory_space<vmem>>, vector<8x288xf32>
    %cst_67 = arith.constant dense<0.000000e+00> : vector<8x288xf32>
    %94 = tpu.matmul %92, %93, %cst_67 {dimension_numbers = #tpu.dot_dimension_numbers<[1], [0], [0], [1], [0, 0, 1, 1], [], []>, precision = #tpu.contract_precision<fp32>} : vector<8x8xf32>, vector<8x288xf32>, vector<8x288xf32> -> vector<8x288xf32>
    %95 = arith.addf %90, %94 : vector<8x288xf32>
    %c2_68 = arith.constant 2 : index
    %c0_69 = arith.constant 0 : index
    %c0_70 = arith.constant 0 : index
    %96 = vector.load %arg4[%c2_68, %c0_69, %c0_70] : memref<9x8x8xf32, #tpu.memory_space<vmem>>, vector<1x8x8xf32>
    %97 = vector.shape_cast %96 : vector<1x8x8xf32> to vector<8x8xf32>
    %c0_71 = arith.constant 0 : index
    %c111 = arith.constant 111 : index
    %98 = vector.load %arg11[%c0_71, %c111] : memref<8x512xf32, #tpu.memory_space<vmem>>, vector<8x288xf32>
    %cst_72 = arith.constant dense<0.000000e+00> : vector<8x288xf32>
    %99 = tpu.matmul %97, %98, %cst_72 {dimension_numbers = #tpu.dot_dimension_numbers<[1], [0], [0], [1], [0, 0, 1, 1], [], []>, precision = #tpu.contract_precision<fp32>} : vector<8x8xf32>, vector<8x288xf32>, vector<8x288xf32> -> vector<8x288xf32>
    %100 = arith.addf %95, %99 : vector<8x288xf32>
    %c3_73 = arith.constant 3 : index
    %c0_74 = arith.constant 0 : index
    %c0_75 = arith.constant 0 : index
    %101 = vector.load %arg4[%c3_73, %c0_74, %c0_75] : memref<9x8x8xf32, #tpu.memory_space<vmem>>, vector<1x8x8xf32>
    %102 = vector.shape_cast %101 : vector<1x8x8xf32> to vector<8x8xf32>
    %c0_76 = arith.constant 0 : index
    %c127 = arith.constant 127 : index
    %103 = vector.load %arg11[%c0_76, %c127] : memref<8x512xf32, #tpu.memory_space<vmem>>, vector<8x288xf32>
    %cst_77 = arith.constant dense<0.000000e+00> : vector<8x288xf32>
    %104 = tpu.matmul %102, %103, %cst_77 {dimension_numbers = #tpu.dot_dimension_numbers<[1], [0], [0], [1], [0, 0, 1, 1], [], []>, precision = #tpu.contract_precision<fp32>} : vector<8x8xf32>, vector<8x288xf32>, vector<8x288xf32> -> vector<8x288xf32>
    %c4_78 = arith.constant 4 : index
    %c0_79 = arith.constant 0 : index
    %c0_80 = arith.constant 0 : index
    %105 = vector.load %arg4[%c4_78, %c0_79, %c0_80] : memref<9x8x8xf32, #tpu.memory_space<vmem>>, vector<1x8x8xf32>
    %106 = vector.shape_cast %105 : vector<1x8x8xf32> to vector<8x8xf32>
    %c0_81 = arith.constant 0 : index
    %c128_82 = arith.constant 128 : index
    %107 = vector.load %arg11[%c0_81, %c128_82] : memref<8x512xf32, #tpu.memory_space<vmem>>, vector<8x288xf32>
    %cst_83 = arith.constant dense<0.000000e+00> : vector<8x288xf32>
    %108 = tpu.matmul %106, %107, %cst_83 {dimension_numbers = #tpu.dot_dimension_numbers<[1], [0], [0], [1], [0, 0, 1, 1], [], []>, precision = #tpu.contract_precision<fp32>} : vector<8x8xf32>, vector<8x288xf32>, vector<8x288xf32> -> vector<8x288xf32>
    %109 = arith.addf %104, %108 : vector<8x288xf32>
    %c5_84 = arith.constant 5 : index
    %c0_85 = arith.constant 0 : index
    %c0_86 = arith.constant 0 : index
    %110 = vector.load %arg4[%c5_84, %c0_85, %c0_86] : memref<9x8x8xf32, #tpu.memory_space<vmem>>, vector<1x8x8xf32>
    %111 = vector.shape_cast %110 : vector<1x8x8xf32> to vector<8x8xf32>
    %c0_87 = arith.constant 0 : index
    %c129 = arith.constant 129 : index
    %112 = vector.load %arg11[%c0_87, %c129] : memref<8x512xf32, #tpu.memory_space<vmem>>, vector<8x288xf32>
    %cst_88 = arith.constant dense<0.000000e+00> : vector<8x288xf32>
    %113 = tpu.matmul %111, %112, %cst_88 {dimension_numbers = #tpu.dot_dimension_numbers<[1], [0], [0], [1], [0, 0, 1, 1], [], []>, precision = #tpu.contract_precision<fp32>} : vector<8x8xf32>, vector<8x288xf32>, vector<8x288xf32> -> vector<8x288xf32>
    %114 = arith.addf %109, %113 : vector<8x288xf32>
    %c6_89 = arith.constant 6 : index
    %c0_90 = arith.constant 0 : index
    %c0_91 = arith.constant 0 : index
    %115 = vector.load %arg4[%c6_89, %c0_90, %c0_91] : memref<9x8x8xf32, #tpu.memory_space<vmem>>, vector<1x8x8xf32>
    %116 = vector.shape_cast %115 : vector<1x8x8xf32> to vector<8x8xf32>
    %c0_92 = arith.constant 0 : index
    %c145 = arith.constant 145 : index
    %117 = vector.load %arg11[%c0_92, %c145] : memref<8x512xf32, #tpu.memory_space<vmem>>, vector<8x288xf32>
    %cst_93 = arith.constant dense<0.000000e+00> : vector<8x288xf32>
    %118 = tpu.matmul %116, %117, %cst_93 {dimension_numbers = #tpu.dot_dimension_numbers<[1], [0], [0], [1], [0, 0, 1, 1], [], []>, precision = #tpu.contract_precision<fp32>} : vector<8x8xf32>, vector<8x288xf32>, vector<8x288xf32> -> vector<8x288xf32>
    %c7_94 = arith.constant 7 : index
    %c0_95 = arith.constant 0 : index
    %c0_96 = arith.constant 0 : index
    %119 = vector.load %arg4[%c7_94, %c0_95, %c0_96] : memref<9x8x8xf32, #tpu.memory_space<vmem>>, vector<1x8x8xf32>
    %120 = vector.shape_cast %119 : vector<1x8x8xf32> to vector<8x8xf32>
    %c0_97 = arith.constant 0 : index
    %c146 = arith.constant 146 : index
    %121 = vector.load %arg11[%c0_97, %c146] : memref<8x512xf32, #tpu.memory_space<vmem>>, vector<8x288xf32>
    %cst_98 = arith.constant dense<0.000000e+00> : vector<8x288xf32>
    %122 = tpu.matmul %120, %121, %cst_98 {dimension_numbers = #tpu.dot_dimension_numbers<[1], [0], [0], [1], [0, 0, 1, 1], [], []>, precision = #tpu.contract_precision<fp32>} : vector<8x8xf32>, vector<8x288xf32>, vector<8x288xf32> -> vector<8x288xf32>
    %123 = arith.addf %118, %122 : vector<8x288xf32>
    %c8_99 = arith.constant 8 : index
    %c0_100 = arith.constant 0 : index
    %c0_101 = arith.constant 0 : index
    %124 = vector.load %arg4[%c8_99, %c0_100, %c0_101] : memref<9x8x8xf32, #tpu.memory_space<vmem>>, vector<1x8x8xf32>
    %125 = vector.shape_cast %124 : vector<1x8x8xf32> to vector<8x8xf32>
    %c0_102 = arith.constant 0 : index
    %c147 = arith.constant 147 : index
    %126 = vector.load %arg11[%c0_102, %c147] : memref<8x512xf32, #tpu.memory_space<vmem>>, vector<8x288xf32>
    %cst_103 = arith.constant dense<0.000000e+00> : vector<8x288xf32>
    %127 = tpu.matmul %125, %126, %cst_103 {dimension_numbers = #tpu.dot_dimension_numbers<[1], [0], [0], [1], [0, 0, 1, 1], [], []>, precision = #tpu.contract_precision<fp32>} : vector<8x8xf32>, vector<8x288xf32>, vector<8x288xf32> -> vector<8x288xf32>
    %128 = arith.addf %123, %127 : vector<8x288xf32>
    %129 = arith.addf %100, %114 : vector<8x288xf32>
    %130 = arith.addf %129, %128 : vector<8x288xf32>
    %c0_104 = arith.constant 0 : index
    %c0_105 = arith.constant 0 : index
    %131 = vector.load %arg5[%c0_104, %c0_105] : memref<8x1xf32, #tpu.memory_space<vmem>>, vector<8x1xf32>
    %132 = vector.broadcast %131 : vector<8x1xf32> to vector<8x288xf32>
    %133 = arith.addf %130, %132 : vector<8x288xf32>
    %134 = vector.broadcast %20 : vector<1x288xf32> to vector<8x288xf32>
    %135 = arith.mulf %133, %134 : vector<8x288xf32>
    %cst_106 = arith.constant dense<0.000000e+00> : vector<8xf32>
    %136 = vector.multi_reduction <add>, %135, %cst_106 [1] : vector<8x288xf32> to vector<8xf32>
    %137 = vector.shape_cast %136 : vector<8xf32> to vector<8x1xf32>
    %cst_107 = arith.constant 3.906250e-03 : f32
    %138 = vector.broadcast %cst_107 : f32 to vector<8x1xf32>
    %139 = arith.mulf %137, %138 : vector<8x1xf32>
    %c0_108 = arith.constant 0 : index
    %c0_109 = arith.constant 0 : index
    %140 = vector.load %arg6[%c0_108, %c0_109] : memref<8x4xf32, #tpu.memory_space<vmem>>, vector<8x4xf32>
    %141 = vector.broadcast %139 : vector<8x1xf32> to vector<8x4xf32>
    %142 = arith.mulf %140, %141 : vector<8x4xf32>
    %cst_110 = arith.constant dense<0.000000e+00> : vector<4xf32>
    %143 = vector.multi_reduction <add>, %142, %cst_110 [0] : vector<8x4xf32> to vector<4xf32>
    %144 = vector.shape_cast %143 : vector<4xf32> to vector<1x4xf32>
    %c0_111 = arith.constant 0 : index
    %c0_112 = arith.constant 0 : index
    %145 = vector.load %arg7[%c0_111, %c0_112] : memref<1x4xf32, #tpu.memory_space<vmem>>, vector<1x4xf32>
    %146 = arith.addf %144, %145 : vector<1x4xf32>
    %cst_113 = arith.constant 0.000000e+00 : f32
    %147 = vector.broadcast %cst_113 : f32 to vector<1x4xf32>
    %148 = arith.cmpf ogt, %146, %147 : vector<1x4xf32>
    %cst_114 = arith.constant 1.000000e-01 : f32
    %149 = vector.broadcast %cst_114 : f32 to vector<1x4xf32>
    %150 = arith.mulf %149, %146 : vector<1x4xf32>
    %151 = arith.select %148, %146, %150 : vector<1x4xi1>, vector<1x4xf32>
    %c0_115 = arith.constant 0 : index
    %c0_116 = arith.constant 0 : index
    %152 = vector.load %arg8[%c0_115, %c0_116] : memref<8x4xf32, #tpu.memory_space<vmem>>, vector<8x4xf32>
    %153 = vector.broadcast %151 : vector<1x4xf32> to vector<8x4xf32>
    %154 = arith.mulf %152, %153 : vector<8x4xf32>
    %cst_117 = arith.constant dense<0.000000e+00> : vector<8xf32>
    %155 = vector.multi_reduction <add>, %154, %cst_117 [1] : vector<8x4xf32> to vector<8xf32>
    %156 = vector.shape_cast %155 : vector<8xf32> to vector<8x1xf32>
    %c0_118 = arith.constant 0 : index
    %c0_119 = arith.constant 0 : index
    %157 = vector.load %arg9[%c0_118, %c0_119] : memref<8x1xf32, #tpu.memory_space<vmem>>, vector<8x1xf32>
    %158 = arith.addf %156, %157 : vector<8x1xf32>
    %159 = arith.negf %158 : vector<8x1xf32>
    %160 = math.exp %159 : vector<8x1xf32>
    %cst_120 = arith.constant 1.000000e+00 : f32
    %161 = vector.broadcast %cst_120 : f32 to vector<8x1xf32>
    %162 = arith.addf %161, %160 : vector<8x1xf32>
    %163 = arith.divf %161, %162 : vector<8x1xf32>
    %c0_121 = arith.constant 0 : index
    %c0_122 = arith.constant 0 : index
    %c19_123 = arith.constant 19 : index
    %164 = vector.load %arg1[%c0_121, %c0_122, %c19_123] : memref<1x8x384xf32, #tpu.memory_space<vmem>>, vector<1x8x288xf32>
    %165 = vector.shape_cast %164 : vector<1x8x288xf32> to vector<8x288xf32>
    %166 = vector.broadcast %163 : vector<8x1xf32> to vector<8x288xf32>
    %167 = arith.mulf %133, %166 : vector<8x288xf32>
    %168 = arith.addf %165, %167 : vector<8x288xf32>
    %c0_124 = arith.constant 0 : index
    %c0_125 = arith.constant 0 : index
    %c0_126 = arith.constant 0 : index
    %169 = vector.load %arg10[%c0_124, %c0_125, %c0_126] : memref<1x8x288xf32, #tpu.memory_space<vmem>>, vector<1x8x288xf32>
    %170 = vector.shape_cast %169 : vector<1x8x288xf32> to vector<8x288xf32>
    %171 = vector.shape_cast %168 : vector<8x288xf32> to vector<1x8x288xf32>
    tpu.vector_store %arg10[%c0_124, %c0_125, %c0_126], %171 {strides = array<i32>} : memref<1x8x288xf32, #tpu.memory_space<vmem>>, vector<1x8x288xf32>,
    return
  }
  func.func @transform_0(%arg0: i32) -> (i32, i32, i32) {
    %c0_i32 = arith.constant 0 : i32
    %c0_i32_0 = arith.constant 0 : i32
    %c0_i32_1 = arith.constant 0 : i32
    return %arg0, %c0_i32, %c0_i32_0 : i32, i32, i32
  }
  func.func @transform_1(%arg0: i32) -> (i32, i32, i32) {
    %c0_i32 = arith.constant 0 : i32
    %c0_i32_0 = arith.constant 0 : i32
    %c0_i32_1 = arith.constant 0 : i32
    %c0_i32_2 = arith.constant 0 : i32
    return %c0_i32, %c0_i32_0, %c0_i32_1 : i32, i32, i32
  }
  func.func @transform_2(%arg0: i32) -> (i32, i32) {
    %c0_i32 = arith.constant 0 : i32
    %c0_i32_0 = arith.constant 0 : i32
    %c0_i32_1 = arith.constant 0 : i32
    return %c0_i32, %c0_i32_0 : i32, i32
  }
  func.func @transform_3(%arg0: i32) -> (i32, i32, i32) {
    %c0_i32 = arith.constant 0 : i32
    %c0_i32_0 = arith.constant 0 : i32
    %c0_i32_1 = arith.constant 0 : i32
    %c0_i32_2 = arith.constant 0 : i32
    return %c0_i32, %c0_i32_0, %c0_i32_1 : i32, i32, i32
  }
  func.func @transform_4(%arg0: i32) -> (i32, i32) {
    %c0_i32 = arith.constant 0 : i32
    %c0_i32_0 = arith.constant 0 : i32
    %c0_i32_1 = arith.constant 0 : i32
    return %c0_i32, %c0_i32_0 : i32, i32
  }
  func.func @transform_5(%arg0: i32) -> (i32, i32) {
    %c0_i32 = arith.constant 0 : i32
    %c0_i32_0 = arith.constant 0 : i32
    %c0_i32_1 = arith.constant 0 : i32
    return %c0_i32, %c0_i32_0 : i32, i32
  }
  func.func @transform_6(%arg0: i32) -> (i32, i32) {
    %c0_i32 = arith.constant 0 : i32
    %c0_i32_0 = arith.constant 0 : i32
    %c0_i32_1 = arith.constant 0 : i32
    return %c0_i32, %c0_i32_0 : i32, i32
  }
  func.func @transform_7(%arg0: i32) -> (i32, i32) {
    %c0_i32 = arith.constant 0 : i32
    %c0_i32_0 = arith.constant 0 : i32
    %c0_i32_1 = arith.constant 0 : i32
    return %c0_i32, %c0_i32_0 : i32, i32
  }
  func.func @transform_8(%arg0: i32) -> (i32, i32) {
    %c0_i32 = arith.constant 0 : i32
    %c0_i32_0 = arith.constant 0 : i32
    %c0_i32_1 = arith.constant 0 : i32
    return %c0_i32, %c0_i32_0 : i32, i32
  }
  func.func @transform_9(%arg0: i32) -> (i32, i32, i32) {
    %c0_i32 = arith.constant 0 : i32
    %c0_i32_0 = arith.constant 0 : i32
    %c0_i32_1 = arith.constant 0 : i32
    return %arg0, %c0_i32, %c0_i32_0 : i32, i32, i32
  }
}

</mosaic_0001>

<bundles_post_ra>
// kernel: rcab_forward.1
= control target key start
LH: loop header
LB: loop body
LE: loop exit
PB: predicated region body
PF: predicated region fallthrough
CT: control target
= control target key end

     0   :  { %s18415_s30 = smov 0   ;;  %s20252_s0 = inlined_call_operand.vmem [shape: f32[2,8,384], index: 0, kind: input, shape index: {}]   ;;  %s20253_s1 = inlined_call_operand.vmem [shape: f32[9,8,8], index: 1, kind: input, shape index: {}]   ;;  %s20254_s2 = inlined_call_operand.vmem [shape: f32[8,1], index: 2, kind: input, shape index: {}]   ;;  %s20255_s3 = inlined_call_operand.vmem [shape: f32[9,8,8], index: 3, kind: input, shape index: {}]   ;;  %s20256_s4 = inlined_call_operand.vmem [shape: f32[8,1], index: 4, kind: input, shape index: {}]   ;;  %s20257_s5 = inlined_call_operand.vmem [shape: f32[8,4], index: 5, kind: input, shape index: {}]   ;;  %s20258_s6 = inlined_call_operand.vmem [shape: f32[1,4], index: 6, kind: input, shape index: {}]   ;;  %s20259_s7 = inlined_call_operand.vmem [shape: f32[8,4], index: 7, kind: input, shape index: {}]   ;;  %s20260_s8 = inlined_call_operand.vmem [shape: f32[8,1], index: 8, kind: input, shape index: {}]   ;;  %s20261_s9 = inlined_call_operand.vmem [shape: f32[2,8,288], index: 9, kind: output, shape index: {}]  }
   0x1 LB: > { %s17305_s10 = sadd.s32 4294967295, %s18347_s30   ;;  %p17309_p0 = scmp.ge.s32.totalorder %s18347_s30, 1  ;;  %s18347_s30 = sphi %s18415_s30, %s19_s30  }
   0x2   : > { %p287_p1 = scmp.lt.s32.totalorder %s18347_s30, 3 }
   0x4   : > { %p288_p2 = pnand %p17309_p0, %p287_p1 }
   0x5   : > { %p323_p3 = scmp.lt.s32.totalorder (!%p288_p2), %s17305_s10, 1  ;;  %v18349_v0 = vmov (!%p288_p2), 0.0   ;;  %vm18350_vm0 = vmmov (!%p288_p2), 0   ;;  %s18351_s15 = smov (!%p288_p2), 127   ;;  %v17315_v4 = vld [vmem:[%s20253_s1 + $0x8] sm:$0xff] (!%p288_p2)  ;;  %vm415_vm1 = vcmask (!%p288_p2), 64512  }
   0x6   : > { %291 = sbr.rel (%p288_p2) target bundleno = 2262 (0x8d6), region = 56  ;;  %17550 = vmatprep.subr.mxu1 (!%p288_p2), %v18349_v0  ;;  %8773 = vst [vmem:[#allocation2] sm:$0xff] (!%p288_p2), %v18349_v0  ;;  %8776 = vst [vmem:[#allocation2 + $0x18] sm:$0xff] (!%p288_p2), %v18349_v0  ;;  %485 = vmatprep.mubr.f32.mxu0 (!%p288_p2), %v18349_v0  ;;  %s18352_s16 = smov (!%p288_p2), 126   ;;  %v417_v5 = vsel (!%p288_p2), %vm415_vm1, %v17315_v4, 0  ;;  %vm409_vm2 = vcmask (!%p288_p2), 1039360  }
   0x7   : > { %17552 = vmatprep.mubr.msk.f32.mxu1 (!%p288_p2), %vm18350_vm0, %v18349_v0  ;;  %s18353_s17 = smov (!%p288_p2), 109   ;;  %s18354_s18 = smov (!%p288_p2), 110   ;;  %v18476_v6 = vand.u32 (!%p288_p2), 4294901760, %v417_v5  ;;  %v394_v29 = vld [vmem:[%s20253_s1] sm:$0xff] (!%p288_p2)  ;;  %v17316_v44 = vld [vmem:[%s20253_s1 + $0x10] sm:$0xff] (!%p288_p2)  ;;  %vm4111_vm3 = vcmask (!%p288_p2), 900096  }
   0x8   : > { %s18355_s19 = smov (!%p288_p2), 108   ;;  %v1331_v32 = vsel (!%p288_p2), %vm415_vm1, %v394_v29, 0  ;;  %s18356_s24 = smov (!%p288_p2), 91   ;;  %v2259_v47 = vsel (!%p288_p2), %vm415_vm1, %v17316_v44, 0  ;;  %vm2252_vm4 = vcmask (!%p288_p2), 1031168   ;;  %vm5039_vm5 = vcmask (!%p288_p2), 883712  }
   0x9   : > { %v487_v7 = vsub.f32 (!%p288_p2), %v417_v5, %v18476_v6  ;;  %v18514_v34 = vand.u32 (!%p288_p2), 4294901760, %v1331_v32  ;;  %v18588_v51 = vand.u32 (!%p288_p2), 4294901760, %v2259_v47  ;;  %s18357_s29 = smov (!%p288_p2), 92   ;;  %vm3185_vm6 = vcmask (!%p288_p2), 891904   ;;  %s18358_s20 = smov (!%p288_p2), 90  }
   0xa   : > { %vm5972_vm7 = vcmask (!%p288_p2), 744448   ;;  %vm6898_vm8 = vcmask (!%p288_p2), 752640   ;;  %vm7826_vm9 = vcmask (!%p288_p2), 736256   ;;  %vm8782_vm15 = vcmask (!%p288_p2), 261120   ;;  %s18361_s12 = smov (!%p288_p2), 19   ;;  %s18362_s13 = smov (!%p288_p2), 17  }
   0xb   : > { %v18479_v8 = vand.u32 (!%p288_p2), 4294901760, %v487_v7  ;;  %v18528_v36 = vsub.f32 (!%p288_p2), %v1331_v32, %v18514_v34  ;;  %v18614_v57 = vsub.f32 (!%p288_p2), %v2259_v47, %v18588_v51 }
   0xd   : > { %s20263_s10 = smov (!%p323_p3, %s17305_s10), 1  ;;  %v489_v13 = vsub.f32 %v487_v7, %v18479_v8  ;;  %v18536_v38 = vand.u32 4294901760, %v18528_v36  ;;  %v18631_v63 = vand.u32 4294901760, %v18614_v57 }
   0xe   : > { %s18302_s11 = smul.u32 24, %s20263_s10 }
   0xf   : > { %v490_v19 = vand.u32 4294901760, %v489_v13  ;;  %v1403_v40 = vsub.f32 %v18528_v36, %v18536_v38 }
  0x10   : > { %s18437_s14 = scalar_lea.vmem %s20252_s0, %s18302_s11 }
  0x11   : > { %v18440_v1 = vld [vmem:[%s18437_s14 + $0x8] sm:$0xff]  ;;  %v18443_v2 = vld [vmem:[%s18437_s14] sm:$0xff]  ;;  %v18450_v3 = vld [vmem:[%s18437_s14 + $0x10] sm:$0xff]  ;;  %v18560_v43 = vand.u32 4294901760, %v1403_v40 }
  0x12   : > { %405 = vrot.lane.b32.xlu0 %v18440_v1, %s18351_s15  ;;  %403 = vrot.lane.b32.xlu1 %v18443_v2, %s18351_s15  ;;  %v18510_v33 = vand.u32 4294901760, %v18450_v3  ;;  %v18551_v41 = vand.u32 4294901760, %v18440_v1  ;;  %v18582_v49 = vand.u32 4294901760, %v18443_v2 }
  0x14   : > { %v18523_v35 = vsub.f32 %v18450_v3, %v18510_v33  ;;  %v18570_v45 = vsub.f32 %v18440_v1, %v18551_v41  ;;  %v18601_v54 = vsub.f32 %v18443_v2, %v18582_v49 }
  0x16   : > { %407 = vrot.lane.b32.xlu0 %v18450_v3, %s18351_s15  ;;  %2248 = vrot.lane.b32.xlu1 %v18440_v1, %s18352_s16  ;;  %v1877_v37 = vand.u32 4294901760, %v18523_v35  ;;  %v1413_v50 = vand.u32 4294901760, %v18570_v45  ;;  %v1419_v59 = vand.u32 4294901760, %v18601_v54 }
  0x18   : > { %v1878_v39 = vsub.f32 %v18523_v35, %v1877_v37  ;;  %v1414_v55 = vsub.f32 %v18570_v45, %v1413_v50  ;;  %v1420_v5 = vsub.f32 %v18601_v54, %v1419_v59 }
  0x1a   : > { %2250 = vrot.lane.b32.xlu0 %v18450_v3, %s18352_s16  ;;  %2246 = vrot.lane.b32.xlu1 %v18443_v2, %s18352_s16  ;;  %v1879_v42 = vand.u32 4294901760, %v1878_v39  ;;  %v1415_v60 = vand.u32 4294901760, %v1414_v55  ;;  %s18363_s16 = smov 1  }
  0x1e   : > { %3183 = vrot.lane.b32.xlu1 %v18450_v3, %s18353_s17  ;;  %3181 = vrot.lane.b32.xlu0 %v18440_v1, %s18353_s17 }
  0x22   : > { %3179 = vrot.lane.b32.xlu0 %v18443_v2, %s18353_s17  ;;  %4107 = vrot.lane.b32.xlu1 %v18440_v1, %s18354_s18 }
  0x26   : > { %4109 = vrot.lane.b32.xlu0 %v18450_v3, %s18354_s18  ;;  %4105 = vrot.lane.b32.xlu1 %v18443_v2, %s18354_s18 }
  0x2a   : > { %5037 = vrot.lane.b32.xlu1 %v18450_v3, %s18355_s19  ;;  %5035 = vrot.lane.b32.xlu0 %v18440_v1, %s18355_s19 }
  0x2e   : > { %5033 = vrot.lane.b32.xlu0 %v18443_v2, %s18355_s19  ;;  %5968 = vrot.lane.b32.xlu1 %v18440_v1, %s18356_s24  ;;  %s18364_s19 = smov 111  }
  0x32   : > { %5970 = vrot.lane.b32.xlu0 %v18450_v3, %s18356_s24  ;;  %5966 = vrot.lane.b32.xlu1 %v18443_v2, %s18356_s24 }
  0x36   : > { %6896 = vrot.lane.b32.xlu1 %v18450_v3, %s18357_s29  ;;  %6894 = vrot.lane.b32.xlu0 %v18440_v1, %s18357_s29 }
  0x3a   : > { %6892 = vrot.lane.b32.xlu0 %v18443_v2, %s18357_s29  ;;  %7822 = vrot.lane.b32.xlu1 %v18440_v1, %s18358_s20  ;;  %s18360_s29 = smov 18  }
  0x3e   : > { %7824 = vrot.lane.b32.xlu0 %v18450_v3, %s18358_s20  ;;  %7820 = vrot.lane.b32.xlu1 %v18443_v2, %s18358_s20 }
  0x84   : > { %v406_v9 = vpop.permute.xlu0 %405  ;;  %v404_v10 = vpop.permute.xlu1 %403 }
  0x85   : > { %v410_v11 = vsel %vm409_vm2, %v404_v10, %v406_v9 }
  0x86   : > { %v18482_v12 = vand.u32 4294901760, %v410_v11 }
  0x88   : > { %v18486_v14 = vsub.f32 %v410_v11, %v18482_v12  ;;  %v408_v15 = vpop.permute.xlu0 %407  ;;  %v18579_v48 = vpop.permute.xlu1 %2248  ;;  %v1421_v11 = vand.u32 4294901760, %v1420_v5 }
  0x89   : > { %v411_v16 = vsel %vm409_vm2, %v406_v9, %v408_v15  ;;  %v885_v17 = vand.u32 4294901760, %v408_v15 }
  0x8a   : > { %v18489_v18 = vand.u32 4294901760, %v411_v16  ;;  %v505_v20 = vand.u32 4294901760, %v18486_v14 }
  0x8b   : > { %v962_v21 = vsub.f32 %v408_v15, %v885_v17  ;;  %17551 = vmatpush3.msra.mxu1 %v885_v17 }
  0x8c   : > { %v498_v22 = vsub.f32 %v411_v16, %v18489_v18  ;;  %420 = vmatprep.subr.mxu0 %v18489_v18  ;;  %17553 = vmatmul.mubr.f32.vlgmr.msra.gmra.mrb[0].mxu1 %v490_v19  ;;  %v506_v25 = vsub.f32 %v18486_v14, %v505_v20  ;;  %v18576_v46 = vpop.permute.xlu0 %2250  ;;  %v18609_v56 = vpop.permute.xlu1 %2246 }
  0x8d   : > { %v963_v23 = vand.u32 4294901760, %v962_v21  ;;  %422 = vmatpush1.msra.mxu0 %v18482_v12  ;;  %17555 = vmatprep.subr.mxu1 %v18349_v0  ;;  %v18593_v52 = vand.u32 4294901760, %v18576_v46  ;;  %v2253_v32 = vsel %vm2252_vm4, %v18609_v56, %v18579_v48 }
  0x8e   : > { %491 = vmatmul.mubr.f32.vlgmr.msra.gmra.mrb[0].mxu0 %v490_v19  ;;  %17557 = vmatprep.mubr.msk.f32.mxu1 %vm18350_vm0, %v18349_v0  ;;  %v499_v24 = vand.u32 4294901760, %v498_v22  ;;  %v507_v31 = vand.u32 4294901760, %v506_v25 }
  0x8f   : > { %v964_v26 = vsub.f32 %v962_v21, %v963_v23  ;;  %571 = vmatprep.mubr.f32.mxu0 %v18349_v0  ;;  %v18621_v58 = vsub.f32 %v18576_v46, %v18593_v52 }
  0x90   : > { %v500_v27 = vsub.f32 %v498_v22, %v499_v24  ;;  %v18595_v53 = vpop.permute.xlu0 %3181  ;;  %v18625_v61 = vpop.permute.xlu1 %3183 }
  0x91   : > { %v965_v28 = vand.u32 4294901760, %v964_v26  ;;  %v2805_v4 = vand.u32 4294901760, %v18621_v58  ;;  %v18686_v19 = vand.u32 4294901760, %v18625_v61 }
  0x92   : > { %v501_v30 = vand.u32 4294901760, %v500_v27 }
  0x93   : > { %17556 = vmatpush3.msra.mxu1 %v965_v28  ;;  %v2806_v10 = vsub.f32 %v18621_v58, %v2805_v4 }
  0x94   : > { %502 = vmatprep.subr.mxu0 %v501_v30  ;;  %17558 = vmatmul.mubr.f32.vlgmr.msra.gmra.mrb[2].mxu1 %v18476_v6  ;;  %v18627_v62 = vpop.permute.xlu0 %3179  ;;  %v17317_v30 = vld [vmem:[%s20253_s1 + $0x18] sm:$0xff] }
  0x95   : > { %17560 = vmatprep.subr.mxu1 %v18349_v0  ;;  %508 = vmatpush1.msra.mxu0 %v507_v31  ;;  %v2807_v13 = vand.u32 4294901760, %v2806_v10  ;;  %v3186_v1 = vsel %vm3185_vm6, %v18627_v62, %v18595_v53  ;;  %v17321_v62 = vld [vmem:[%s20253_s1 + $0x38] sm:$0xff] }
  0x96   : > { %17561 = vmatpush3.msra.mxu1 %v962_v21  ;;  %573 = vmatmul.mubr.f32.vlgmr.msra.gmra.mrb[0].mxu0 %v18476_v6  ;;  %v18703_v21 = vsub.f32 %v18625_v61, %v18686_v19 }
  0x97   : > { %581 = vmatprep.subr.mxu0 %v498_v22  ;;  %17562 = vmatprep.mubr.msk.f32.mxu1 %vm18350_vm0, %v18349_v0 }
  0x98   : > { %584 = vmatpush1.msra.mxu0 %v18486_v14  ;;  %17565 = vmatprep.subr.mxu1 %v18349_v0  ;;  %v17318_v14 = vld [vmem:[%s20253_s1 + $0x20] sm:$0xff] }
  0x99   : > { %657 = vmatprep.subr.mxu0 %v18489_v18  ;;  %17563 = vmatmul.mubr.f32.vlgmr.msra.gmra.mrb[4].mxu1 %v487_v7 }
  0x9a   : > { %17566 = vmatpush3.msra.mxu1 %v885_v17  ;;  %17567 = vmatprep.mubr.msk.f32.mxu1 %vm18350_vm0, %v18349_v0 }
  0x9b   : > { %17570 = vmatprep.subr.mxu1 %v18349_v0  ;;  %647 = vmatprep.mubr.f32.mxu0 %v18349_v0 }
  0x9d   : > { %17568 = vmatmul.mubr.f32.vlgmr.msra.gmra.mrb[6].mxu1 %v18479_v8 }
  0x9e   : > { %17571 = vmatpush3.msra.mxu1 %v963_v23  ;;  %650 = vmatmul.mubr.f32.vlgmr.msra.gmra.mrb[0].mxu0 %v487_v7  ;;  %v18644_v7 = vpop.permute.xlu0 %4109  ;;  %v3738_v23 = vand.u32 4294901760, %v18703_v21 }
  0x9f   : > { %659 = vmatpush1.msra.mxu0 %v18482_v12  ;;  %17572 = vmatprep.mubr.msk.f32.mxu1 %vm18350_vm0, %v18349_v0 }
  0xa0   : > { %17575 = vmatprep.subr.mxu1 %v18349_v0  ;;  %735 = vmatprep.subr.mxu0 %v499_v24  ;;  %v2254_v24 = vsel %vm2252_vm4, %v18579_v48, %v18576_v46  ;;  %v3739_v26 = vsub.f32 %v18703_v21, %v3738_v23 }
  0xa1   : > { %17573 = vmatmul.mubr.f32.vlgmr.msra.gmra.mrb[8].mxu1 %v18476_v6  ;;  %722 = vmatprep.mubr.f32.mxu0 %v18349_v0  ;;  %v18731_v27 = vand.u32 4294901760, %v2254_v24 }
  0xa2   : > { %17576 = vmatpush3.msra.mxu1 %v885_v17  ;;  %17577 = vmatprep.mubr.msk.f32.mxu1 %vm18350_vm0, %v18349_v0  ;;  %v3192_v17 = vsel %vm415_vm1, %v17318_v14, 0  ;;  %v3740_v29 = vand.u32 4294901760, %v3739_v26 }
  0xa3   : > { %17580 = vmatprep.subr.mxu1 %v18349_v0  ;;  %v18746_v31 = vsub.f32 %v2254_v24, %v18731_v27 }
  0xa5   : > { %17578 = vmatmul.mubr.f32.vlgmr.msra.gmra.mrb[10].mxu1 %v18476_v6 }
  0xa6   : > { %726 = vmatmul.mubr.f32.vlgmr.msra.gmra.mrb[0].mxu0 %v18479_v8  ;;  %17581 = vmatpush3.msra.mxu1 %v18510_v33  ;;  %v2331_v8 = vsub.f32 %v18614_v57, %v18631_v63 }
  0xa7   : > { %739 = vmatpush1.msra.mxu0 %v505_v20  ;;  %802 = vmatprep.mubr.f32.mxu0 %v18349_v0 }
  0xa8   : > { %811 = vmatprep.subr.mxu0 %v18489_v18  ;;  %17582 = vmatprep.mubr.msk.f32.mxu1 %vm18350_vm0, %v18349_v0  ;;  %v18681_v18 = vand.u32 4294901760, %v3192_v17 }
  0xa9   : > { %17583 = vmatmul.mubr.f32.vlgmr.msra.gmra.mrb[12].mxu1 %v18560_v43  ;;  %17585 = vmatprep.subr.mxu1 %v18349_v0 }
  0xaa   : > { %17586 = vmatpush3.msra.mxu1 %v1879_v42  ;;  %17587 = vmatprep.mubr.msk.f32.mxu1 %vm18350_vm0, %v18349_v0  ;;  %v18696_v20 = vsub.f32 %v3192_v17, %v18681_v18 }
  0xab   : > { %17590 = vmatprep.subr.mxu1 %v18349_v0 }
  0xac   : > { %v18708_v22 = vand.u32 4294901760, %v18696_v20 }
  0xad   : > { %17588 = vmatmul.mubr.f32.vlgmr.msra.gmra.mrb[14].mxu1 %v18514_v34 }
  0xae   : > { %804 = vmatmul.mubr.f32.vlgmr.msra.gmra.mrb[0].mxu0 %v18476_v6  ;;  %17591 = vmatpush3.msra.mxu1 %v18523_v35  ;;  %v3264_v25 = vsub.f32 %v18696_v20, %v18708_v22  ;;  %v18759_v35 = vand.u32 4294901760, %v2253_v32 }
  0xaf   : > { %813 = vmatpush1.msra.mxu0 %v18482_v12  ;;  %876 = vmatprep.mubr.f32.mxu0 %v18349_v0  ;;  %v18660_v12 = vand.u32 4294901760, %v2331_v8 }
  0xb0   : > { %1334 = vmatprep.subr.mxu0 %v18551_v41  ;;  %17592 = vmatprep.mubr.msk.f32.mxu1 %vm18350_vm0, %v18349_v0  ;;  %v18735_v28 = vand.u32 4294901760, %v3264_v25  ;;  %v18773_v39 = vsub.f32 %v2253_v32, %v18759_v35 }
  0xb1   : > { %17593 = vmatmul.mubr.f32.vlgmr.msra.gmra.mrb[16].mxu1 %v18528_v36  ;;  %17595 = vmatprep.subr.mxu1 %v18349_v0 }
  0xb2   : > { %17596 = vmatpush3.msra.mxu1 %v18510_v33  ;;  %17597 = vmatprep.mubr.msk.f32.mxu1 %vm18350_vm0, %v18349_v0 }
  0xb3   : > { %17600 = vmatprep.subr.mxu1 %v18349_v0 }
  0xb5   : > { %17598 = vmatmul.mubr.f32.vlgmr.msra.gmra.mrb[18].mxu1 %v18536_v38 }
  0xb6   : > { %878 = vmatmul.mubr.f32.vlgmr.msra.gmra.mrb[0].mxu0 %v18476_v6  ;;  %17601 = vmatpush3.msra.mxu1 %v1877_v37  ;;  %v4108_v6 = vpop.permute.xlu1 %4107 }
  0xb7   : > { %1336 = vmatpush1.msra.mxu0 %v18582_v49  ;;  %1399 = vmatprep.mubr.f32.mxu0 %v18349_v0  ;;  %v18652_v9 = vsel %vm4111_vm3, %v4108_v6, %v18644_v7 }
  0xb8   : > { %1416 = vmatprep.subr.mxu0 %v1415_v60  ;;  %17602 = vmatprep.mubr.msk.f32.mxu1 %vm18350_vm0, %v18349_v0 }
  0xb9   : > { %17603 = vmatmul.mubr.f32.vlgmr.msra.gmra.mrb[20].mxu1 %v18514_v34  ;;  %17605 = vmatprep.subr.mxu1 %v18349_v0 }
  0xba   : > { %17606 = vmatpush3.msra.mxu1 %v18510_v33  ;;  %17607 = vmatprep.mubr.msk.f32.mxu1 %vm18350_vm0, %v18349_v0  ;;  %v4106_v15 = vpop.permute.xlu1 %4105  ;;  %v4118_v33 = vsel %vm415_vm1, %v17317_v30, 0 }
  0xbb   : > { %17610 = vmatprep.subr.mxu1 %v18349_v0  ;;  %v18672_v16 = vsel %vm4111_vm3, %v4106_v15, %v4108_v6  ;;  %v18765_v37 = vand.u32 4294901760, %v4118_v33 }
  0xbd   : > { %17608 = vmatmul.mubr.f32.vlgmr.msra.gmra.mrb[22].mxu1 %v18514_v34 }
  0xbe   : > { %1405 = vmatmul.mubr.f32.vlgmr.msra.gmra.mrb[0].mxu0 %v18560_v43  ;;  %17611 = vmatpush3.msra.mxu1 %v18593_v52  ;;  %v2347_v43 = vand.u32 4294901760, %v18773_v39  ;;  %v5038_v48 = vpop.permute.xlu1 %5037 }
  0xbf   : > { %1422 = vmatpush1.msra.mxu0 %v1421_v11  ;;  %1485 = vmatprep.mubr.f32.mxu0 %v18349_v0 }
  0xc0   : > { %1495 = vmatprep.subr.mxu0 %v18570_v45  ;;  %17612 = vmatprep.mubr.msk.f32.mxu1 %vm18350_vm0, %v18349_v0  ;;  %v2348_v47 = vsub.f32 %v18773_v39, %v2347_v43 }
  0xc1   : > { %17613 = vmatmul.mubr.f32.vlgmr.msra.gmra.mrb[24].mxu1 %v18660_v12  ;;  %17615 = vmatprep.subr.mxu1 %v18349_v0 }
  0xc2   : > { %17616 = vmatpush3.msra.mxu1 %v2807_v13  ;;  %17617 = vmatprep.mubr.msk.f32.mxu1 %vm18350_vm0, %v18349_v0 }
  0xc3   : > { %17620 = vmatprep.subr.mxu1 %v18349_v0 }
  0xc5   : > { %17618 = vmatmul.mubr.f32.vlgmr.msra.gmra.mrb[26].mxu1 %v18588_v51 }
  0xc6   : > { %1487 = vmatmul.mubr.f32.vlgmr.msra.gmra.mrb[0].mxu0 %v18514_v34  ;;  %17621 = vmatpush3.msra.mxu1 %v18621_v58  ;;  %v17319_v58 = vld [vmem:[%s20253_s1 + $0x28] sm:$0xff] }
  0xc7   : > { %1498 = vmatpush1.msra.mxu0 %v18601_v54  ;;  %1561 = vmatprep.mubr.f32.mxu0 %v18349_v0  ;;  %v2349_v54 = vand.u32 4294901760, %v2348_v47  ;;  %v17320_v47 = vld [vmem:[%s20253_s1 + $0x30] sm:$0xff] }
  0xc8   : > { %1571 = vmatprep.subr.mxu0 %v18551_v41  ;;  %17622 = vmatprep.mubr.msk.f32.mxu1 %vm18350_vm0, %v18349_v0 }
  0xc9   : > { %17623 = vmatmul.mubr.f32.vlgmr.msra.gmra.mrb[28].mxu1 %v18614_v57  ;;  %17625 = vmatprep.subr.mxu1 %v18349_v0 }
  0xca   : > { %17626 = vmatpush3.msra.mxu1 %v18593_v52  ;;  %17627 = vmatprep.mubr.msk.f32.mxu1 %vm18350_vm0, %v18349_v0 }
  0xcb   : > { %17630 = vmatprep.subr.mxu1 %v18349_v0 }
  0xcd   : > { %17628 = vmatmul.mubr.f32.vlgmr.msra.gmra.mrb[30].mxu1 %v18631_v63 }
  0xce   : > { %1564 = vmatmul.mubr.f32.vlgmr.msra.gmra.mrb[0].mxu0 %v18528_v36  ;;  %17631 = vmatpush3.msra.mxu1 %v2805_v4  ;;  %v2341_v36 = vand.u32 4294901760, %v18746_v31  ;;  %v5046_v4 = vsel %vm415_vm1, %v17319_v58, 0 }
  0xcf   : > { %1573 = vmatpush1.msra.mxu0 %v18582_v49  ;;  %1636 = vmatprep.mubr.f32.mxu0 %v18349_v0  ;;  %v18844_v5 = vand.u32 4294901760, %v5046_v4 }
  0xd0   : > { %1649 = vmatprep.subr.mxu0 %v1413_v50  ;;  %17632 = vmatprep.mubr.msk.f32.mxu1 %vm18350_vm0, %v18349_v0  ;;  %v2342_v40 = vsub.f32 %v18746_v31, %v2341_v36 }
  0xd1   : > { %17635 = vmatprep.subr.mxu1 %v18349_v0  ;;  %17633 = vmatmul.mubr.f32.vlgmr.msra.gmra.mrb[32].mxu1 %v18588_v51  ;;  %v18858_v6 = vsub.f32 %v5046_v4, %v18844_v5 }
  0xd2   : > { %17636 = vmatpush3.msra.mxu1 %v18593_v52  ;;  %17637 = vmatprep.mubr.msk.f32.mxu1 %vm18350_vm0, %v18349_v0  ;;  %v2343_v44 = vand.u32 4294901760, %v2342_v40 }
  0xd3   : > { %17640 = vmatprep.subr.mxu1 %v18349_v0  ;;  %v18869_v10 = vand.u32 4294901760, %v18858_v6 }
  0xd5   : > { %17638 = vmatmul.mubr.f32.vlgmr.msra.gmra.mrb[34].mxu1 %v18588_v51 }
  0xd6   : > { %1640 = vmatmul.mubr.f32.vlgmr.msra.gmra.mrb[0].mxu0 %v18536_v38  ;;  %17641 = vmatpush3.msra.mxu1 %v18686_v19  ;;  %v18770_v38 = vand.u32 4294901760, %v18644_v7 }
  0xd7   : > { %1653 = vmatpush1.msra.mxu0 %v1419_v59  ;;  %1716 = vmatprep.mubr.f32.mxu0 %v18349_v0 }
  0xd8   : > { %1725 = vmatprep.subr.mxu0 %v18551_v41  ;;  %17642 = vmatprep.mubr.msk.f32.mxu1 %vm18350_vm0, %v18349_v0  ;;  %v18786_v41 = vsub.f32 %v4118_v33, %v18765_v37  ;;  %v18793_v42 = vsub.f32 %v18644_v7, %v18770_v38  ;;  %v18848_v7 = vand.u32 4294901760, %v5038_v48 }
  0xd9   : > { %17643 = vmatmul.mubr.f32.vlgmr.msra.gmra.mrb[36].mxu1 %v18735_v28  ;;  %17645 = vmatprep.subr.mxu1 %v18349_v0 }
  0xda   : > { %17646 = vmatpush3.msra.mxu1 %v3740_v29  ;;  %17647 = vmatprep.mubr.msk.f32.mxu1 %vm18350_vm0, %v18349_v0  ;;  %v18799_v45 = vand.u32 4294901760, %v18786_v41  ;;  %v4664_v46 = vand.u32 4294901760, %v18793_v42  ;;  %v18864_v8 = vsub.f32 %v5038_v48, %v18848_v7 }
  0xdb   : > { %17650 = vmatprep.subr.mxu1 %v18349_v0 }
  0xdc   : > { %v4665_v52 = vsub.f32 %v18793_v42, %v4664_v46  ;;  %v5592_v11 = vand.u32 4294901760, %v18864_v8 }
  0xdd   : > { %17648 = vmatmul.mubr.f32.vlgmr.msra.gmra.mrb[38].mxu1 %v18681_v18 }
  0xde   : > { %1718 = vmatmul.mubr.f32.vlgmr.msra.gmra.mrb[0].mxu0 %v18514_v34  ;;  %17651 = vmatpush3.msra.mxu1 %v18703_v21  ;;  %v4666_v56 = vand.u32 4294901760, %v4665_v52  ;;  %v5593_v13 = vsub.f32 %v18864_v8, %v5592_v11 }
  0xdf   : > { %1727 = vmatpush1.msra.mxu0 %v18582_v49  ;;  %1790 = vmatprep.mubr.f32.mxu0 %v18349_v0  ;;  %v5036_v49 = vpop.permute.xlu0 %5035 }
  0xe0   : > { %2262 = vmatprep.subr.mxu0 %v18731_v27  ;;  %17652 = vmatprep.mubr.msk.f32.mxu1 %vm18350_vm0, %v18349_v0  ;;  %v18815_v50 = vsel %vm5039_vm5, %v5036_v49, %v5038_v48  ;;  %v5594_v15 = vand.u32 4294901760, %v5593_v13  ;;  %v6905_v48 = vsel %vm415_vm1, %v17320_v47, 0 }
  0xe1   : > { %17653 = vmatmul.mubr.f32.vlgmr.msra.gmra.mrb[40].mxu1 %v18696_v20  ;;  %17655 = vmatprep.subr.mxu1 %v18349_v0 }
  0xe2   : > { %17656 = vmatpush3.msra.mxu1 %v18686_v19  ;;  %17657 = vmatprep.mubr.msk.f32.mxu1 %vm18350_vm0, %v18349_v0 }
  0xe3   : > { %17660 = vmatprep.subr.mxu1 %v18349_v0  ;;  %v5034_v59 = vpop.permute.xlu0 %5033 }
  0xe4   : > { %v18835_v60 = vsel %vm5039_vm5, %v5034_v59, %v5036_v49 }
  0xe5   : > { %17658 = vmatmul.mubr.f32.vlgmr.msra.gmra.mrb[42].mxu1 %v18708_v22 }
  0xe6   : > { %1792 = vmatmul.mubr.f32.vlgmr.msra.gmra.mrb[0].mxu0 %v18514_v34  ;;  %17661 = vmatpush3.msra.mxu1 %v3738_v23  ;;  %v4190_v34 = vsub.f32 %v18786_v41, %v18799_v45 }
  0xe7   : > { %2264 = vmatpush1.msra.mxu0 %v18759_v35  ;;  %2327 = vmatprep.mubr.f32.mxu0 %v18349_v0  ;;  %v5971_v25 = vpop.permute.xlu0 %5970 }
  0xe8   : > { %2344 = vmatprep.subr.mxu0 %v2343_v44  ;;  %17662 = vmatprep.mubr.msk.f32.mxu1 %vm18350_vm0, %v18349_v0  ;;  %v18823_v55 = vand.u32 4294901760, %v4190_v34  ;;  %v19031_v44 = vand.u32 4294901760, %v18672_v16  ;;  %v19050_v34 = vand.u32 4294901760, %v6905_v48 }
  0xe9   : > { %17665 = vmatprep.subr.mxu1 %v18349_v0  ;;  %17663 = vmatmul.mubr.f32.vlgmr.msra.gmra.mrb[44].mxu1 %v18681_v18 }
  0xea   : > { %17666 = vmatpush3.msra.mxu1 %v18686_v19  ;;  %17667 = vmatprep.mubr.msk.f32.mxu1 %vm18350_vm0, %v18349_v0  ;;  %v5979_v19 = vsel %vm415_vm1, %v17321_v62, 0 }
  0xeb   : > { %17670 = vmatprep.subr.mxu1 %v18349_v0  ;;  %v18946_v23 = vand.u32 4294901760, %v5979_v19 }
  0xed   : > { %17668 = vmatmul.mubr.f32.vlgmr.msra.gmra.mrb[46].mxu1 %v18681_v18  ;;  %v18950_v26 = vsub.f32 %v5979_v19, %v18946_v23 }
  0xee   : > { %2333 = vmatmul.mubr.f32.vlgmr.msra.gmra.mrb[0].mxu0 %v18660_v12  ;;  %17671 = vmatpush3.msra.mxu1 %v18770_v38  ;;  %v3187_v12 = vsel %vm3185_vm6, %v18595_v53, %v18625_v61 }
  0xef   : > { %2350 = vmatpush1.msra.mxu0 %v2349_v54  ;;  %2413 = vmatprep.mubr.f32.mxu0 %v18349_v0  ;;  %v18892_v61 = vand.u32 4294901760, %v3187_v12  ;;  %v18959_v30 = vand.u32 4294901760, %v18950_v26  ;;  %v19053_v54 = vsub.f32 %v6905_v48, %v19050_v34 }
  0xf0   : > { %2423 = vmatprep.subr.mxu0 %v18746_v31  ;;  %17672 = vmatprep.mubr.msk.f32.mxu1 %vm18350_vm0, %v18349_v0 }
  0xf1   : > { %17673 = vmatmul.mubr.f32.vlgmr.msra.gmra.mrb[48].mxu1 %v18823_v55  ;;  %17675 = vmatprep.subr.mxu1 %v18349_v0  ;;  %v18905_v3 = vsub.f32 %v3187_v12, %v18892_v61  ;;  %v6051_v32 = vsub.f32 %v18950_v26, %v18959_v30  ;;  %v19060_v59 = vand.u32 4294901760, %v19053_v54 }
  0xf2   : > { %17676 = vmatpush3.msra.mxu1 %v4666_v56  ;;  %17677 = vmatprep.mubr.msk.f32.mxu1 %vm18350_vm0, %v18349_v0 }
  0xf3   : > { %17680 = vmatprep.subr.mxu1 %v18349_v0  ;;  %v3274_v17 = vand.u32 4294901760, %v18905_v3 }
  0xf5   : > { %17678 = vmatmul.mubr.f32.vlgmr.msra.gmra.mrb[50].mxu1 %v18765_v37  ;;  %v3275_v2 = vsub.f32 %v18905_v3, %v3274_v17 }
  0xf6   : > { %2415 = vmatmul.mubr.f32.vlgmr.msra.gmra.mrb[0].mxu0 %v18588_v51  ;;  %17681 = vmatpush3.msra.mxu1 %v18793_v42 }
  0xf7   : > { %2426 = vmatpush1.msra.mxu0 %v18773_v39  ;;  %2489 = vmatprep.mubr.f32.mxu0 %v18349_v0  ;;  %v3276_v24 = vand.u32 4294901760, %v3275_v2  ;;  %v18975_v39 = vand.u32 4294901760, %v6051_v32 }
  0xf8   : > { %2499 = vmatprep.subr.mxu0 %v18731_v27  ;;  %17682 = vmatprep.mubr.msk.f32.mxu1 %vm18350_vm0, %v18349_v0 }
  0xf9   : > { %17683 = vmatmul.mubr.f32.vlgmr.msra.gmra.mrb[52].mxu1 %v18786_v41  ;;  %17685 = vmatprep.subr.mxu1 %v18349_v0 }
  0xfa   : > { %17686 = vmatpush3.msra.mxu1 %v18770_v38  ;;  %17687 = vmatprep.mubr.msk.f32.mxu1 %vm18350_vm0, %v18349_v0 }
  0xfb   : > { %17690 = vmatprep.subr.mxu1 %v18349_v0 }
  0xfd   : > { %17688 = vmatmul.mubr.f32.vlgmr.msra.gmra.mrb[54].mxu1 %v18799_v45 }
  0xfe   : > { %2492 = vmatmul.mubr.f32.vlgmr.msra.gmra.mrb[0].mxu0 %v18614_v57  ;;  %17691 = vmatpush3.msra.mxu1 %v4664_v46  ;;  %v5118_v57 = vsub.f32 %v18858_v6, %v18869_v10 }
  0xff   : > { %2501 = vmatpush1.msra.mxu0 %v18759_v35  ;;  %2564 = vmatprep.mubr.f32.mxu0 %v18349_v0 }
 0x100   : > { %2577 = vmatprep.subr.mxu0 %v2341_v36  ;;  %17692 = vmatprep.mubr.msk.f32.mxu1 %vm18350_vm0, %v18349_v0  ;;  %v18896_v14 = vand.u32 4294901760, %v5118_v57 }
 0x101   : > { %17695 = vmatprep.subr.mxu1 %v18349_v0  ;;  %17693 = vmatmul.mubr.f32.vlgmr.msra.gmra.mrb[56].mxu1 %v18765_v37 }
 0x102   : > { %17696 = vmatpush3.msra.mxu1 %v18770_v38  ;;  %17697 = vmatprep.mubr.msk.f32.mxu1 %vm18350_vm0, %v18349_v0 }
 0x103   : > { %17700 = vmatprep.subr.mxu1 %v18349_v0 }
 0x105   : > { %17698 = vmatmul.mubr.f32.vlgmr.msra.gmra.mrb[58].mxu1 %v18765_v37 }
 0x106   : > { %2568 = vmatmul.mubr.f32.vlgmr.msra.gmra.mrb[0].mxu0 %v18631_v63  ;;  %17701 = vmatpush3.msra.mxu1 %v18848_v7  ;;  %v18916_v63 = vand.u32 4294901760, %v3186_v1 }
 0x107   : > { %2581 = vmatpush1.msra.mxu0 %v2347_v43  ;;  %2644 = vmatprep.mubr.f32.mxu0 %v18349_v0 }
 0x108   : > { %2653 = vmatprep.subr.mxu0 %v18731_v27  ;;  %17702 = vmatprep.mubr.msk.f32.mxu1 %vm18350_vm0, %v18349_v0  ;;  %v18926_v53 = vsub.f32 %v3186_v1, %v18916_v63  ;;  %v6447_v27 = vand.u32 4294901760, %v5971_v25  ;;  %v19119_v1 = vand.u32 4294901760, %v18835_v60 }
 0x109   : > { %17703 = vmatmul.mubr.f32.vlgmr.msra.gmra.mrb[60].mxu1 %v18896_v14  ;;  %17705 = vmatprep.subr.mxu1 %v18349_v0 }
 0x10a   : > { %17706 = vmatpush3.msra.mxu1 %v5594_v15  ;;  %17707 = vmatprep.mubr.msk.f32.mxu1 %vm18350_vm0, %v18349_v0  ;;  %v3280_v21 = vand.u32 4294901760, %v18926_v53  ;;  %v6524_v31 = vsub.f32 %v5971_v25, %v6447_v27 }
 0x10b   : > { %17710 = vmatprep.subr.mxu1 %v18349_v0 }
 0x10c   : > { %v3281_v29 = vsub.f32 %v18926_v53, %v3280_v21 }
 0x10d   : > { %17708 = vmatmul.mubr.f32.vlgmr.msra.gmra.mrb[62].mxu1 %v18844_v5 }
 0x10e   : > { %2646 = vmatmul.mubr.f32.vlgmr.msra.gmra.mrb[0].mxu0 %v18588_v51  ;;  %17711 = vmatpush3.msra.mxu1 %v18864_v8  ;;  %v3282_v36 = vand.u32 4294901760, %v3281_v29  ;;  %v6977_v8 = vsub.f32 %v19053_v54, %v19060_v59 }
 0x10f   : > { %2655 = vmatpush1.msra.mxu0 %v18759_v35  ;;  %2718 = vmatprep.mubr.f32.mxu0 %v18349_v0  ;;  %v6525_v35 = vand.u32 4294901760, %v6524_v31 }
 0x110   : > { %3195 = vmatprep.subr.mxu0 %v18892_v61  ;;  %17712 = vmatprep.mubr.msk.f32.mxu1 %vm18350_vm0, %v18349_v0  ;;  %v19068_v57 = vand.u32 4294901760, %v6977_v8 }
 0x111   : > { %17713 = vmatmul.mubr.f32.vlgmr.msra.gmra.mrb[64].mxu1 %v18858_v6  ;;  %17715 = vmatprep.subr.mxu1 %v18349_v0  ;;  %v6526_v38 = vsub.f32 %v6524_v31, %v6525_v35 }
 0x112   : > { %17716 = vmatpush3.msra.mxu1 %v18848_v7  ;;  %17717 = vmatprep.mubr.msk.f32.mxu1 %vm18350_vm0, %v18349_v0 }
 0x113   : > { %17720 = vmatprep.subr.mxu1 %v18349_v0  ;;  %v6527_v40 = vand.u32 4294901760, %v6526_v38 }
 0x115   : > { %17718 = vmatmul.mubr.f32.vlgmr.msra.gmra.mrb[66].mxu1 %v18869_v10 }
 0x116   : > { %2720 = vmatmul.mubr.f32.vlgmr.msra.gmra.mrb[0].mxu0 %v18588_v51  ;;  %17721 = vmatpush3.msra.mxu1 %v5592_v11  ;;  %v5969_v51 = vpop.permute.xlu1 %5968 }
 0x117   : > { %3197 = vmatpush1.msra.mxu0 %v18916_v63  ;;  %3260 = vmatprep.mubr.f32.mxu0 %v18349_v0  ;;  %v18968_v33 = vsel %vm5972_vm7, %v5969_v51, %v5971_v25 }
 0x118   : > { %3277 = vmatprep.subr.mxu0 %v3276_v24  ;;  %17722 = vmatprep.mubr.msk.f32.mxu1 %vm18350_vm0, %v18349_v0 }
 0x119   : > { %17725 = vmatprep.subr.mxu1 %v18349_v0  ;;  %17723 = vmatmul.mubr.f32.vlgmr.msra.gmra.mrb[68].mxu1 %v18844_v5 }
 0x11a   : > { %17726 = vmatpush3.msra.mxu1 %v18848_v7  ;;  %17727 = vmatprep.mubr.msk.f32.mxu1 %vm18350_vm0, %v18349_v0  ;;  %v5967_v42 = vpop.permute.xlu1 %5966  ;;  %v6895_v7 = vpop.permute.xlu0 %6894 }
 0x11b   : > { %17730 = vmatprep.subr.mxu1 %v18349_v0  ;;  %v18983_v43 = vsel %vm5972_vm7, %v5967_v42, %v5969_v51 }
 0x11c   : > { %v19196_v38 = vand.u32 4294901760, %v18983_v43 }
 0x11d   : > { %17728 = vmatmul.mubr.f32.vlgmr.msra.gmra.mrb[70].mxu1 %v18844_v5 }
 0x11e   : > { %3266 = vmatmul.mubr.f32.vlgmr.msra.gmra.mrb[0].mxu0 %v18735_v28  ;;  %17731 = vmatpush3.msra.mxu1 %v6447_v27  ;;  %v6897_v52 = vpop.permute.xlu1 %6896  ;;  %v6893_v15 = vpop.permute.xlu0 %6892  ;;  %v6066_v42 = vsub.f32 %v18983_v43, %v19196_v38  ;;  %v8755_v43 = vld [vmem:[%s20254_s2] sm:$0xff] }
 0x11f   : > { %3283 = vmatpush1.msra.mxu0 %v3282_v36  ;;  %3346 = vmatprep.mubr.f32.mxu0 %v18349_v0  ;;  %v7373_v56 = vand.u32 4294901760, %v6897_v52 }
 0x120   : > { %3356 = vmatprep.subr.mxu0 %v18905_v3  ;;  %17732 = vmatprep.mubr.msk.f32.mxu1 %vm18350_vm0, %v18349_v0  ;;  %v19077_v3 = vsel %vm6898_vm8, %v6893_v15, %v6895_v7 }
 0x121   : > { %17733 = vmatmul.mubr.f32.vlgmr.msra.gmra.mrb[72].mxu1 %v18975_v39  ;;  %17735 = vmatprep.subr.mxu1 %v18349_v0  ;;  %v7450_v4 = vsub.f32 %v6897_v52, %v7373_v56 }
 0x122   : > { %17736 = vmatpush3.msra.mxu1 %v6527_v40  ;;  %17737 = vmatprep.mubr.msk.f32.mxu1 %vm18350_vm0, %v18349_v0 }
 0x123   : > { %17740 = vmatprep.subr.mxu1 %v18349_v0  ;;  %v7451_v11 = vand.u32 4294901760, %v7450_v4 }
 0x125   : > { %17738 = vmatmul.mubr.f32.vlgmr.msra.gmra.mrb[74].mxu1 %v18946_v23  ;;  %v7452_v13 = vsub.f32 %v7450_v4, %v7451_v11 }
 0x126   : > { %3348 = vmatmul.mubr.f32.vlgmr.msra.gmra.mrb[0].mxu0 %v18681_v18  ;;  %17741 = vmatpush3.msra.mxu1 %v6524_v31 }
 0x127   : > { %3359 = vmatpush1.msra.mxu0 %v18926_v53  ;;  %3422 = vmatprep.mubr.f32.mxu0 %v18349_v0 }
 0x128   : > { %3432 = vmatprep.subr.mxu0 %v18892_v61  ;;  %17742 = vmatprep.mubr.msk.f32.mxu1 %vm18350_vm0, %v18349_v0 }
 0x129   : > { %17743 = vmatmul.mubr.f32.vlgmr.msra.gmra.mrb[76].mxu1 %v18950_v26  ;;  %17745 = vmatprep.subr.mxu1 %v18349_v0 }
 0x12a   : > { %17746 = vmatpush3.msra.mxu1 %v6447_v27  ;;  %17747 = vmatprep.mubr.msk.f32.mxu1 %vm18350_vm0, %v18349_v0 }
 0x12b   : > { %17750 = vmatprep.subr.mxu1 %v18349_v0 }
 0x12d   : > { %17748 = vmatmul.mubr.f32.vlgmr.msra.gmra.mrb[78].mxu1 %v18959_v30 }
 0x12e   : > { %3425 = vmatmul.mubr.f32.vlgmr.msra.gmra.mrb[0].mxu0 %v18696_v20  ;;  %17751 = vmatpush3.msra.mxu1 %v6525_v35  ;;  %v19016_v20 = vand.u32 4294901760, %v18652_v9 }
 0x12f   : > { %3434 = vmatpush1.msra.mxu0 %v18916_v63  ;;  %3497 = vmatprep.mubr.f32.mxu0 %v18349_v0 }
 0x130   : > { %3510 = vmatprep.subr.mxu0 %v3274_v17  ;;  %17752 = vmatprep.mubr.msk.f32.mxu1 %vm18350_vm0, %v18349_v0  ;;  %v19028_v28 = vsub.f32 %v18652_v9, %v19016_v20  ;;  %v19125_v17 = vsub.f32 %v18835_v60, %v19119_v1 }
 0x131   : > { %17755 = vmatprep.subr.mxu1 %v18349_v0  ;;  %17753 = vmatmul.mubr.f32.vlgmr.msra.gmra.mrb[80].mxu1 %v18946_v23 }
 0x132   : > { %17756 = vmatpush3.msra.mxu1 %v6447_v27  ;;  %17757 = vmatprep.mubr.msk.f32.mxu1 %vm18350_vm0, %v18349_v0  ;;  %v4200_v46 = vand.u32 4294901760, %v19028_v28  ;;  %v5134_v2 = vand.u32 4294901760, %v19125_v17 }
 0x133   : > { %17760 = vmatprep.subr.mxu1 %v18349_v0 }
 0x134   : > { %v4201_v9 = vsub.f32 %v19028_v28, %v4200_v46  ;;  %v5135_v25 = vsub.f32 %v19125_v17, %v5134_v2 }
 0x135   : > { %17758 = vmatmul.mubr.f32.vlgmr.msra.gmra.mrb[82].mxu1 %v18946_v23 }
 0x136   : > { %3501 = vmatmul.mubr.f32.vlgmr.msra.gmra.mrb[0].mxu0 %v18708_v22  ;;  %17762 = vmatprep.mubr.msk.f32.mxu1 %vm18350_vm0, %v18349_v0  ;;  %v19038_v22 = vsub.f32 %v18672_v16, %v19031_v44  ;;  %v4202_v16 = vand.u32 4294901760, %v4201_v9  ;;  %v5136_v51 = vand.u32 4294901760, %v5135_v25 }
 0x137   : > { %3514 = vmatpush1.msra.mxu0 %v3280_v21  ;;  %3577 = vmatprep.mubr.f32.mxu0 %v18349_v0  ;;  %v19136_v21 = vpop.permute.xlu0 %7824 }
 0x138   : > { %3586 = vmatprep.subr.mxu0 %v18892_v61  ;;  %v4206_v49 = vand.u32 4294901760, %v19038_v22  ;;  %17761 = vmatpush3.msra.mxu1 %v7373_v56  ;;  %v7453_v61 = vand.u32 4294901760, %v7452_v13  ;;  %v8301_v24 = vand.u32 4294901760, %v19136_v21 }
 0x139   : > { %17765 = vmatprep.subr.mxu1 %v18349_v0  ;;  %17763 = vmatmul.mubr.f32.vlgmr.msra.gmra.mrb[84].mxu1 %v19068_v57 }
 0x13a   : > { %v4207_v58 = vsub.f32 %v19038_v22, %v4206_v49  ;;  %17767 = vmatprep.mubr.msk.f32.mxu1 %vm18350_vm0, %v18349_v0  ;;  %17766 = vmatpush3.msra.mxu1 %v7453_v61  ;;  %v8378_v29 = vsub.f32 %v19136_v21, %v8301_v24 }
 0x13b   : > { %17770 = vmatprep.subr.mxu1 %v18349_v0 }
 0x13c   : > { %v4208_v12 = vand.u32 4294901760, %v4207_v58 }
 0x13d   : > { %17768 = vmatmul.mubr.f32.vlgmr.msra.gmra.mrb[86].mxu1 %v19050_v34 }
 0x13e   : > { %3579 = vmatmul.mubr.f32.vlgmr.msra.gmra.mrb[0].mxu0 %v18681_v18  ;;  %17771 = vmatpush3.msra.mxu1 %v7450_v4 }
 0x13f   : > { %3588 = vmatpush1.msra.mxu0 %v18916_v63  ;;  %3651 = vmatprep.mubr.f32.mxu0 %v18349_v0 }
 0x140   : > { %4121 = vmatprep.subr.mxu0 %v19016_v20  ;;  %17772 = vmatprep.mubr.msk.f32.mxu1 %vm18350_vm0, %v18349_v0 }
 0x141   : > { %17773 = vmatmul.mubr.f32.vlgmr.msra.gmra.mrb[88].mxu1 %v19053_v54 }
 0x146   : > { %3653 = vmatmul.mubr.f32.vlgmr.msra.gmra.mrb[0].mxu0 %v18681_v18  ;;  %v19065_v18 = vsel %vm6898_vm8, %v6895_v7, %v6897_v52 }
 0x147   : > { %4123 = vmatpush1.msra.mxu0 %v19031_v44  ;;  %4186 = vmatprep.mubr.f32.mxu0 %v18349_v0 }
 0x148   : > { %4203 = vmatprep.subr.mxu0 %v4202_v16 }
 0x14e   : > { %4192 = vmatmul.mubr.f32.vlgmr.msra.gmra.mrb[0].mxu0 %v18823_v55  ;;  %v19083_v55 = vld [vmem:[#allocation2] sm:$0xff] }
 0x14f   : > { %4209 = vmatpush1.msra.mxu0 %v4208_v12  ;;  %4272 = vmatprep.mubr.f32.mxu0 %v18349_v0  ;;  %v19111_v0 = vand.u32 4294901760, %v18815_v50 }
 0x150   : > { %4282 = vmatprep.subr.mxu0 %v19028_v28  ;;  %17775 = vmatprep.subr.mxu1 %v19083_v55 }
 0x151   : > { %17776 = vmatpush3.msra.mxu1 %v7373_v56  ;;  %17777 = vmatprep.mubr.msk.f32.mxu1 %vm18350_vm0, %v19083_v55 }
 0x152   : > { %17778 = vmatmul.mubr.f32.vlgmr.msra.gmra.mrb[90].mxu1 %v19060_v59  ;;  %17780 = vmatprep.subr.mxu1 %v19083_v55 }
 0x153   : > { %17781 = vmatpush3.msra.mxu1 %v7451_v11  ;;  %17782 = vmatprep.mubr.msk.f32.mxu1 %vm18350_vm0, %v19083_v55 }
 0x154   : > { %17785 = vmatprep.subr.mxu1 %v19083_v55 }
 0x156   : > { %4274 = vmatmul.mubr.f32.vlgmr.msra.gmra.mrb[0].mxu0 %v18765_v37  ;;  %17783 = vmatmul.mubr.f32.vlgmr.msra.gmra.mrb[92].mxu1 %v19050_v34 }
 0x157   : > { %4285 = vmatpush1.msra.mxu0 %v19038_v22  ;;  %4348 = vmatprep.mubr.f32.mxu0 %v19083_v55  ;;  %v18359_v22 = vmov 0  }
 0x158   : > { %4358 = vmatprep.subr.mxu0 %v19016_v20  ;;  %17786 = vmatpush3.msra.mxu1 %v7373_v56 }
 0x159   : > { %17787 = vmatprep.mubr.msk.f32.mxu1 %vm18350_vm0, %v19083_v55  ;;  %17790 = vmatprep.subr.mxu1 %v19083_v55 }
 0x15a   : > { %17788 = vmatmul.mubr.f32.vlgmr.msra.gmra.mrb[94].mxu1 %v19050_v34  ;;  %18333 = vset.pattern.permute.xlu0 %v18359_v22 }
 0x15b   : > { %17792 = vmatprep.mubr.msk.f32.mxu1 %vm18350_vm0, %v19083_v55  ;;  %17791 = vmatpush3.msra.mxu1 %v8301_v24 }
 0x15c   : > { %17795 = vmatprep.subr.mxu1 %v19083_v55  ;;  %8758 = vperm.xlu0 %18333, %v8755_v43  }
 0x15e   : > { %4351 = vmatmul.mubr.f32.vlgmr.msra.gmra.mrb[0].mxu0 %v18786_v41  ;;  %v5127_v41 = vsub.f32 %v18815_v50, %v19111_v0  ;;  %v17322_v50 = vld [vmem:[%s20253_s1 + $0x40] sm:$0xff] }
 0x15f   : > { %4360 = vmatpush1.msra.mxu0 %v19031_v44  ;;  %4423 = vmatprep.mubr.f32.mxu0 %v19083_v55  ;;  %v7833_v53 = vsel %vm415_vm1, %v17322_v50, 0 }
 0x160   : > { %4436 = vmatprep.subr.mxu0 %v4200_v46  ;;  %v5128_v63 = vand.u32 4294901760, %v5127_v41  ;;  %v19134_v62 = vand.u32 4294901760, %v7833_v53  ;;  %8795 = vrot.lane.b32.xlu0 %v19083_v55, %s18360_s29 }
 0x162   : > { %v19139_v60 = vsub.f32 %v7833_v53, %v19134_v62 }
 0x164   : > { %v19147_v27 = vand.u32 4294901760, %v19139_v60 }
 0x166   : > { %4427 = vmatmul.mubr.f32.vlgmr.msra.gmra.mrb[0].mxu0 %v18799_v45  ;;  %v5129_v45 = vsub.f32 %v5127_v41, %v5128_v63  ;;  %v7905_v31 = vsub.f32 %v19139_v60, %v19147_v27 }
 0x167   : > { %4440 = vmatpush1.msra.mxu0 %v4206_v49  ;;  %4503 = vmatprep.mubr.f32.mxu0 %v19083_v55 }
 0x168   : > { %4512 = vmatprep.subr.mxu0 %v19016_v20  ;;  %v5130_v19 = vand.u32 4294901760, %v5129_v45  ;;  %v19153_v32 = vand.u32 4294901760, %v7905_v31  ;;  %v6067_v20 = vand.u32 4294901760, %v6066_v42 }
 0x16a   : > { %17793 = vmatmul.mubr.f32.vlgmr.msra.gmra.mrb[96].mxu1 %v19153_v32 }
 0x16b   : > { %17797 = vmatprep.mubr.msk.f32.mxu1 %vm18350_vm0, %v19083_v55 }
 0x16e   : > { %4505 = vmatmul.mubr.f32.vlgmr.msra.gmra.mrb[0].mxu0 %v18765_v37 }
 0x16f   : > { %4514 = vmatpush1.msra.mxu0 %v19031_v44  ;;  %4577 = vmatprep.mubr.f32.mxu0 %v19083_v55 }
 0x170   : > { %5049 = vmatprep.subr.mxu0 %v19111_v0 }
 0x176   : > { %4579 = vmatmul.mubr.f32.vlgmr.msra.gmra.mrb[0].mxu0 %v18765_v37  ;;  %v8379_v37 = vand.u32 4294901760, %v8378_v29 }
 0x177   : > { %5051 = vmatpush1.msra.mxu0 %v19119_v1  ;;  %5114 = vmatprep.mubr.f32.mxu0 %v19083_v55 }
 0x178   : > { %5131 = vmatprep.subr.mxu0 %v5130_v19  ;;  %v8380_v35 = vsub.f32 %v8378_v29, %v8379_v37 }
 0x17a   : > { %v8381_v36 = vand.u32 4294901760, %v8380_v35 }
 0x17c   : > { %17796 = vmatpush3.msra.mxu1 %v8381_v36 }
 0x17d   : > { %17798 = vmatmul.mubr.f32.vlgmr.msra.gmra.mrb[98].mxu1 %v19134_v62  ;;  %17800 = vmatprep.subr.mxu1 %v19083_v55 }
 0x17e   : > { %5120 = vmatmul.mubr.f32.vlgmr.msra.gmra.mrb[0].mxu0 %v18896_v14  ;;  %17801 = vmatpush3.msra.mxu1 %v8378_v29  ;;  %v19188_v14 = vand.u32 4294901760, %v18968_v33  ;;  %v19229_v29 = vand.u32 4294901760, %v19077_v3 }
 0x17f   : > { %5137 = vmatpush1.msra.mxu0 %v5136_v51  ;;  %5200 = vmatprep.mubr.f32.mxu0 %v19083_v55 }
 0x180   : > { %5210 = vmatprep.subr.mxu0 %v5127_v41  ;;  %17802 = vmatprep.mubr.msk.f32.mxu1 %vm18350_vm0, %v19083_v55  ;;  %v19219_v41 = vand.u32 4294901760, %v19065_v18 }
 0x181   : > { %17805 = vmatprep.subr.mxu1 %v19083_v55  ;;  %17803 = vmatmul.mubr.f32.vlgmr.msra.gmra.mrb[100].mxu1 %v19139_v60 }
 0x182   : > { %17806 = vmatpush3.msra.mxu1 %v8301_v24  ;;  %17807 = vmatprep.mubr.msk.f32.mxu1 %vm18350_vm0, %v19083_v55  ;;  %v19226_v53 = vsub.f32 %v19065_v18, %v19219_v41  ;;  %v19236_v18 = vsub.f32 %v19077_v3, %v19229_v29 }
 0x183   : > { %17810 = vmatprep.subr.mxu1 %v19083_v55 }
 0x185   : > { %17808 = vmatmul.mubr.f32.vlgmr.msra.gmra.mrb[102].mxu1 %v19147_v27 }
 0x186   : > { %5202 = vmatmul.mubr.f32.vlgmr.msra.gmra.mrb[0].mxu0 %v18844_v5  ;;  %17811 = vmatpush3.msra.mxu1 %v8379_v37  ;;  %v6987_v37 = vand.u32 4294901760, %v19226_v53 }
 0x187   : > { %5213 = vmatpush1.msra.mxu0 %v19125_v17  ;;  %5276 = vmatprep.mubr.f32.mxu0 %v19083_v55 }
 0x188   : > { %5286 = vmatprep.subr.mxu0 %v19111_v0  ;;  %17812 = vmatprep.mubr.msk.f32.mxu1 %vm18350_vm0, %v19083_v55 }
 0x189   : > { %17815 = vmatprep.subr.mxu1 %v19083_v55  ;;  %17813 = vmatmul.mubr.f32.vlgmr.msra.gmra.mrb[104].mxu1 %v19134_v62 }
 0x18a   : > { %17816 = vmatpush3.msra.mxu1 %v8301_v24  ;;  %17817 = vmatprep.mubr.msk.f32.mxu1 %vm18350_vm0, %v19083_v55 }
 0x18b   : > { %17820 = vmatprep.subr.mxu1 %v19083_v55 }
 0x18d   : > { %17818 = vmatmul.mubr.f32.vlgmr.msra.gmra.mrb[106].mxu1 %v19134_v62 }
 0x18e   : > { %5279 = vmatmul.mubr.f32.vlgmr.msra.gmra.mrb[0].mxu0 %v18858_v6  ;;  %17822 = vmatprep.mubr.msk.f32.mxu1 %vm18350_vm0, %v19083_v55  ;;  %v6060_v6 = vsub.f32 %v18968_v33, %v19188_v14  ;;  %v6068_v33 = vsub.f32 %v6066_v42, %v6067_v20 }
 0x18f   : > { %5288 = vmatpush1.msra.mxu0 %v19119_v1  ;;  %5351 = vmatprep.mubr.f32.mxu0 %v19083_v55 }
 0x190   : > { %5364 = vmatprep.subr.mxu0 %v5128_v63  ;;  %v6061_v40 = vand.u32 4294901760, %v6060_v6  ;;  %v6069_v44 = vand.u32 4294901760, %v6068_v33  ;;  %v6993_v33 = vand.u32 4294901760, %v19236_v18 }
 0x196   : > { %5355 = vmatmul.mubr.f32.vlgmr.msra.gmra.mrb[0].mxu0 %v18869_v10  ;;  %v6062_v10 = vsub.f32 %v6060_v6, %v6061_v40 }
 0x197   : > { %5368 = vmatpush1.msra.mxu0 %v5134_v2  ;;  %5431 = vmatprep.mubr.f32.mxu0 %v19083_v55 }
 0x198   : > { %5440 = vmatprep.subr.mxu0 %v19111_v0  ;;  %v6063_v28 = vand.u32 4294901760, %v6062_v10 }
 0x19e   : > { %5433 = vmatmul.mubr.f32.vlgmr.msra.gmra.mrb[0].mxu0 %v18844_v5 }
 0x19f   : > { %5442 = vmatpush1.msra.mxu0 %v19119_v1  ;;  %5505 = vmatprep.mubr.f32.mxu0 %v19083_v55 }
 0x1a0   : > { %5982 = vmatprep.subr.mxu0 %v19188_v14 }
 0x1a6   : > { %5507 = vmatmul.mubr.f32.vlgmr.msra.gmra.mrb[0].mxu0 %v18844_v5  ;;  %v956_v5 = vpop.f32.mrb[0].mxu1 }
 0x1a7   : > { %5984 = vmatpush1.msra.mxu0 %v19196_v38  ;;  %6047 = vmatprep.mubr.f32.mxu0 %v19083_v55  ;;  %v17554_v46 = vpop.f32.mrb[1].mxu1 }
 0x1a8   : > { %6064 = vmatprep.subr.mxu0 %v6063_v28 }
 0x1ae   : > { %6053 = vmatmul.mubr.f32.vlgmr.msra.gmra.mrb[0].mxu0 %v18975_v39  ;;  %v1032_v39 = vpop.f32.mrb[2].mxu1 }
 0x1af   : > { %6070 = vmatpush1.msra.mxu0 %v6069_v44  ;;  %6133 = vmatprep.mubr.f32.mxu0 %v19083_v55  ;;  %v1033_v9 = vadd.f32 %v1032_v39, %v956_v5  ;;  %v17559_v47 = vpop.f32.mrb[3].mxu1  ;;  %v6994_v39 = vsub.f32 %v19236_v18, %v6993_v33 }
 0x1b0   : > { %6143 = vmatprep.subr.mxu0 %v6060_v6  ;;  %v1106_v48 = vpop.f32.mrb[4].mxu1 }
 0x1b1   : > { %v1107_v49 = vadd.f32 %v1106_v48, %v1033_v9  ;;  %v17564_v16 = vpop.f32.mrb[5].mxu1 }
 0x1b2   : > { %v1180_v52 = vpop.f32.mrb[6].mxu1 }
 0x1b3   : > { %v1181_v56 = vadd.f32 %v1180_v52, %v1107_v49  ;;  %v17569_v58 = vpop.f32.mrb[7].mxu1 }
 0x1b4   : > { %v1254_v4 = vpop.f32.mrb[8].mxu1 }
 0x1b5   : > { %v1255_v7 = vadd.f32 %v1254_v4, %v1181_v56  ;;  %v17574_v8 = vpop.f32.mrb[9].mxu1  ;;  %v6995_v56 = vand.u32 4294901760, %v6994_v39 }
 0x1b6   : > { %6135 = vmatmul.mubr.f32.vlgmr.msra.gmra.mrb[0].mxu0 %v18946_v23  ;;  %v1326_v11 = vpop.f32.mrb[10].mxu1 }
 0x1b7   : > { %6146 = vmatpush1.msra.mxu0 %v6066_v42  ;;  %6209 = vmatprep.mubr.f32.mxu0 %v19083_v55  ;;  %v1327_v12 = vadd.f32 %v1326_v11, %v1255_v7  ;;  %v17579_v13 = vpop.f32.mrb[11].mxu1 }
 0x1b8   : > { %6219 = vmatprep.subr.mxu0 %v19188_v14  ;;  %v1870_v61 = vpop.f32.mrb[12].mxu1 }
 0x1b9   : > { %v1871_v15 = vadd.f32 %v1870_v61, %v1327_v12  ;;  %v17584_v0 = vpop.f32.mrb[13].mxu1 }
 0x1ba   : > { %v1946_v1 = vpop.f32.mrb[14].mxu1 }
 0x1bb   : > { %v1947_v63 = vadd.f32 %v1946_v1, %v1871_v15 }
 0x1be   : > { %6212 = vmatmul.mubr.f32.vlgmr.msra.gmra.mrb[0].mxu0 %v18950_v26  ;;  %v17589_v26 = vpop.f32.mrb[15].mxu1 }
 0x1bf   : > { %6221 = vmatpush1.msra.mxu0 %v19196_v38  ;;  %6284 = vmatprep.mubr.f32.mxu0 %v19083_v55  ;;  %v2020_v17 = vpop.f32.mrb[16].mxu1 }
 0x1c0   : > { %6297 = vmatprep.subr.mxu0 %v6061_v40  ;;  %v2021_v45 = vadd.f32 %v2020_v17, %v1947_v63  ;;  %v17594_v50 = vpop.f32.mrb[17].mxu1  ;;  %v6988_v40 = vsub.f32 %v19226_v53, %v6987_v37 }
 0x1c1   : > { %v2094_v2 = vpop.f32.mrb[18].mxu1 }
 0x1c2   : > { %v2095_v19 = vadd.f32 %v2094_v2, %v2021_v45  ;;  %v17599_v24 = vpop.f32.mrb[19].mxu1  ;;  %v6989_v43 = vand.u32 4294901760, %v6988_v40 }
 0x1c3   : > { %v2168_v25 = vpop.f32.mrb[20].mxu1 }
 0x1c4   : > { %v17604_v31 = vpop.f32.mrb[21].mxu1 }
 0x1c5   : > { %v2240_v51 = vpop.f32.mrb[22].mxu1 }
 0x1c6   : > { %6288 = vmatmul.mubr.f32.vlgmr.msra.gmra.mrb[0].mxu0 %v18959_v30  ;;  %v2169_v30 = vadd.f32 %v2168_v25, %v2095_v19  ;;  %v17609_v36 = vpop.f32.mrb[23].mxu1 }
 0x1c7   : > { %6301 = vmatpush1.msra.mxu0 %v6067_v20  ;;  %6364 = vmatprep.mubr.f32.mxu0 %v19083_v55 }
 0x1c8   : > { %6373 = vmatprep.subr.mxu0 %v19188_v14  ;;  %v2241_v35 = vadd.f32 %v2240_v51, %v2169_v30  ;;  %v2798_v14 = vpop.f32.mrb[24].mxu1 }
 0x1c9   : > { %v17614_v6 = vpop.f32.mrb[25].mxu1 }
 0x1ca   : > { %v2874_v42 = vpop.f32.mrb[26].mxu1 }
 0x1cb   : > { %v2875_v10 = vadd.f32 %v2874_v42, %v2798_v14  ;;  %v17619_v20 = vpop.f32.mrb[27].mxu1  ;;  %v7823_v42 = vpop.permute.xlu1 %7822 }
 0x1cc   : > { %v2948_v28 = vpop.f32.mrb[28].mxu1 }
 0x1cd   : > { %v17624_v44 = vpop.f32.mrb[29].mxu1 }
 0x1ce   : > { %6366 = vmatmul.mubr.f32.vlgmr.msra.gmra.mrb[0].mxu0 %v18946_v23  ;;  %v3022_v3 = vpop.f32.mrb[30].mxu1 }
 0x1cf   : > { %6375 = vmatpush1.msra.mxu0 %v19196_v38  ;;  %6438 = vmatprep.mubr.f32.mxu0 %v19083_v55  ;;  %v2949_v38 = vadd.f32 %v2948_v28, %v2875_v10  ;;  %v17629_v46 = vpop.f32.mrb[31].mxu1 }
 0x1d0   : > { %6908 = vmatprep.subr.mxu0 %v19219_v41  ;;  %v3096_v22 = vpop.f32.mrb[32].mxu1 }
 0x1d1   : > { %v3023_v5 = vadd.f32 %v3022_v3, %v2949_v38  ;;  %v17634_v47 = vpop.f32.mrb[33].mxu1  ;;  %v7828_v38 = vsel %vm7826_vm9, %v7823_v42, %v19136_v21 }
 0x1d2   : > { %v3168_v48 = vpop.f32.mrb[34].mxu1 }
 0x1d3   : > { %v3097_v9 = vadd.f32 %v3096_v22, %v3023_v5  ;;  %v17639_v16 = vpop.f32.mrb[35].mxu1  ;;  %v19266_v5 = vand.u32 4294901760, %v7828_v38  ;;  %v7821_v22 = vpop.permute.xlu1 %7820 }
 0x1d4   : > { %v3731_v52 = vpop.f32.mrb[36].mxu1 }
 0x1d5   : > { %v3169_v49 = vadd.f32 %v3168_v48, %v3097_v9  ;;  %v7827_v48 = vsel %vm7826_vm9, %v7821_v22, %v7823_v42 }
 0x1d6   : > { %6440 = vmatmul.mubr.f32.vlgmr.msra.gmra.mrb[0].mxu0 %v18946_v23  ;;  %v17644_v23 = vpop.f32.mrb[37].mxu1 }
 0x1d7   : > { %6910 = vmatpush1.msra.mxu0 %v19229_v29  ;;  %6973 = vmatprep.mubr.f32.mxu0 %v19083_v55  ;;  %v19250_v58 = vadd.f32 %v3169_v49, %v2241_v35  ;;  %v3807_v4 = vpop.f32.mrb[38].mxu1  ;;  %v19275_v23 = vand.u32 4294901760, %v7827_v48 }
 0x1d8   : > { %6990 = vmatprep.subr.mxu0 %v6989_v43  ;;  %v3808_v7 = vadd.f32 %v3807_v4, %v3731_v52  ;;  %v17649_v8 = vpop.f32.mrb[39].mxu1 }
 0x1d9   : > { %v3881_v11 = vpop.f32.mrb[40].mxu1 }
 0x1da   : > { %v3882_v12 = vadd.f32 %v3881_v11, %v3808_v7  ;;  %v17654_v13 = vpop.f32.mrb[41].mxu1 }
 0x1db   : > { %v3955_v61 = vpop.f32.mrb[42].mxu1 }
 0x1dc   : > { %v3956_v15 = vadd.f32 %v3955_v61, %v3882_v12  ;;  %v17659_v0 = vpop.f32.mrb[43].mxu1 }
 0x1dd   : > { %v4029_v1 = vpop.f32.mrb[44].mxu1 }
 0x1de   : > { %6979 = vmatmul.mubr.f32.vlgmr.msra.gmra.mrb[0].mxu0 %v19068_v57  ;;  %v4030_v63 = vadd.f32 %v4029_v1, %v3956_v15  ;;  %v17664_v26 = vpop.f32.mrb[45].mxu1 }
 0x1df   : > { %6996 = vmatpush1.msra.mxu0 %v6995_v56  ;;  %7059 = vmatprep.mubr.f32.mxu0 %v19083_v55  ;;  %v4101_v17 = vpop.f32.mrb[46].mxu1 }
 0x1e0   : > { %7069 = vmatprep.subr.mxu0 %v19226_v53  ;;  %v4102_v45 = vadd.f32 %v4101_v17, %v4030_v63  ;;  %v17669_v50 = vpop.f32.mrb[47].mxu1 }
 0x1e1   : > { %v4657_v57 = vpop.f32.mrb[48].mxu1 }
 0x1e2   : > { %v4658_v2 = vadd.f32 %v4657_v57, %v4102_v45  ;;  %v17674_v19 = vpop.f32.mrb[49].mxu1 }
 0x1e3   : > { %v4733_v24 = vpop.f32.mrb[50].mxu1 }
 0x1e4   : > { %v4734_v25 = vadd.f32 %v4733_v24, %v4658_v2  ;;  %v17679_v30 = vpop.f32.mrb[51].mxu1 }
 0x1e5   : > { %v4807_v31 = vpop.f32.mrb[52].mxu1 }
 0x1e6   : > { %7061 = vmatmul.mubr.f32.vlgmr.msra.gmra.mrb[0].mxu0 %v19050_v34  ;;  %v4808_v51 = vadd.f32 %v4807_v31, %v4734_v25  ;;  %v17684_v35 = vpop.f32.mrb[53].mxu1 }
 0x1e7   : > { %7072 = vmatpush1.msra.mxu0 %v19236_v18  ;;  %7135 = vmatprep.mubr.f32.mxu0 %v19083_v55  ;;  %v4881_v36 = vpop.f32.mrb[54].mxu1 }
 0x1e8   : > { %7145 = vmatprep.subr.mxu0 %v19219_v41  ;;  %v4882_v14 = vadd.f32 %v4881_v36, %v4808_v51  ;;  %v17689_v6 = vpop.f32.mrb[55].mxu1 }
 0x1e9   : > { %v4955_v40 = vpop.f32.mrb[56].mxu1 }
 0x1ea   : > { %v4956_v10 = vadd.f32 %v4955_v40, %v4882_v14  ;;  %v17694_v20 = vpop.f32.mrb[57].mxu1 }
 0x1eb   : > { %v5027_v28 = vpop.f32.mrb[58].mxu1 }
 0x1ec   : > { %v5028_v44 = vadd.f32 %v5027_v28, %v4956_v10  ;;  %v17699_v43 = vpop.f32.mrb[59].mxu1 }
 0x1ed   : > { %v5585_v3 = vpop.f32.mrb[60].mxu1 }
 0x1ee   : > { %7138 = vmatmul.mubr.f32.vlgmr.msra.gmra.mrb[0].mxu0 %v19053_v54  ;;  %v17704_v54 = vpop.f32.mrb[61].mxu1 }
 0x1ef   : > { %7147 = vmatpush1.msra.mxu0 %v19229_v29  ;;  %7210 = vmatprep.mubr.f32.mxu0 %v19083_v55  ;;  %v5661_v46 = vpop.f32.mrb[62].mxu1 }
 0x1f0   : > { %7223 = vmatprep.subr.mxu0 %v6987_v37  ;;  %v5662_v39 = vadd.f32 %v5661_v46, %v5585_v3  ;;  %v17709_v9 = vpop.f32.mrb[63].mxu1  ;;  %v7914_v37 = vsub.f32 %v7828_v38, %v19266_v5 }
 0x1f1   : > { %v5735_v47 = vpop.f32.mrb[64].mxu1 }
 0x1f2   : > { %v5736_v53 = vadd.f32 %v5735_v47, %v5662_v39  ;;  %v17714_v21 = vpop.f32.mrb[65].mxu1  ;;  %v7915_v18 = vand.u32 4294901760, %v7914_v37 }
 0x1f3   : > { %v5809_v49 = vpop.f32.mrb[66].mxu1 }
 0x1f4   : > { %v5810_v16 = vadd.f32 %v5809_v49, %v5736_v53  ;;  %v17719_v52 = vpop.f32.mrb[67].mxu1  ;;  %v7916_v61 = vsub.f32 %v7914_v37, %v7915_v18 }
 0x1f5   : > { %v5883_v56 = vpop.f32.mrb[68].mxu1 }
 0x1f6   : > { %7214 = vmatmul.mubr.f32.vlgmr.msra.gmra.mrb[0].mxu0 %v19060_v59  ;;  %v5884_v59 = vadd.f32 %v5883_v56, %v5810_v16  ;;  %v17724_v4 = vpop.f32.mrb[69].mxu1 }
 0x1f7   : > { %7227 = vmatpush1.msra.mxu0 %v6993_v33  ;;  %7290 = vmatprep.mubr.f32.mxu0 %v19083_v55  ;;  %v5955_v33 = vpop.f32.mrb[70].mxu1 }
 0x1f8   : > { %7299 = vmatprep.subr.mxu0 %v19219_v41  ;;  %v5956_v7 = vadd.f32 %v5955_v33, %v5884_v59  ;;  %v17729_v8 = vpop.f32.mrb[71].mxu1  ;;  %v7920_v41 = vsub.f32 %v7827_v48, %v19275_v23 }
 0x1f9   : > { %v6518_v11 = vpop.f32.mrb[72].mxu1 }
 0x1fa   : > { %v5961_v12 = vadd.f32 %v5956_v7, %v5028_v44  ;;  %v17734_v13 = vpop.f32.mrb[73].mxu1  ;;  %v7921_v17 = vand.u32 4294901760, %v7920_v41 }
 0x1fb   : > { %v6594_v15 = vpop.f32.mrb[74].mxu1 }
 0x1fc   : > { %v19283_v0 = vadd.f32 %v5961_v12, %v19250_v58  ;;  %v6595_v1 = vadd.f32 %v6594_v15, %v6518_v11  ;;  %v17739_v63 = vpop.f32.mrb[75].mxu1  ;;  %v7922_v25 = vsub.f32 %v7920_v41, %v7921_v17 }
 0x1fd   : > { %v6668_v26 = vpop.f32.mrb[76].mxu1 }
 0x1fe   : > { %7292 = vmatmul.mubr.f32.vlgmr.msra.gmra.mrb[0].mxu0 %v19050_v34  ;;  %v6669_v45 = vadd.f32 %v6668_v26, %v6595_v1  ;;  %v17744_v50 = vpop.f32.mrb[77].mxu1  ;;  %v7923_v36 = vand.u32 4294901760, %v7922_v25  ;;  %v8759_v26 = vpop.permute.xlu0 %8758 }
 0x1ff   : > { %7301 = vmatpush1.msra.mxu0 %v19229_v29  ;;  %7364 = vmatprep.mubr.f32.mxu0 %v19083_v55  ;;  %v7917_v29 = vand.u32 4294901760, %v7916_v61 }
 0x200   : > { %7836 = vmatprep.subr.mxu0 %v19266_v5  ;;  %v6742_v57 = vpop.f32.mrb[78].mxu1 }
 0x201   : > { %v6743_v2 = vadd.f32 %v6742_v57, %v6669_v45  ;;  %v17749_v19 = vpop.f32.mrb[79].mxu1 }
 0x204   : > { %v6816_v24 = vpop.f32.mrb[80].mxu1 }
 0x205   : > { %v6817_v58 = vadd.f32 %v6816_v24, %v6743_v2  ;;  %v17754_v30 = vpop.f32.mrb[81].mxu1 }
 0x206   : > { %7366 = vmatmul.mubr.f32.vlgmr.msra.gmra.mrb[0].mxu0 %v19050_v34 }
 0x207   : > { %7838 = vmatpush1.msra.mxu0 %v19275_v23  ;;  %7901 = vmatprep.mubr.f32.mxu0 %v19083_v55 }
 0x208   : > { %7918 = vmatprep.subr.mxu0 %v7917_v29  ;;  %v6888_v31 = vpop.f32.mrb[82].mxu1 }
 0x209   : > { %v6889_v51 = vadd.f32 %v6888_v31, %v6817_v58  ;;  %v17759_v35 = vpop.f32.mrb[83].mxu1 }
 0x20c   : > { %v7444_v34 = vpop.f32.mrb[84].mxu1 }
 0x20d   : > { %v17764_v14 = vpop.f32.mrb[85].mxu1 }
 0x20e   : > { %7907 = vmatmul.mubr.f32.vlgmr.msra.gmra.mrb[0].mxu0 %v19153_v32  ;;  %v7445_v32 = vadd.f32 %v7444_v34, %v6889_v51 }
 0x20f   : > { %7924 = vmatpush1.msra.mxu0 %v7923_v36  ;;  %7987 = vmatprep.mubr.f32.mxu0 %v19083_v55 }
 0x210   : > { %7997 = vmatprep.subr.mxu0 %v7914_v37  ;;  %v7520_v6 = vpop.f32.mrb[86].mxu1 }
 0x211   : > { %v7521_v40 = vadd.f32 %v7520_v6, %v7445_v32  ;;  %v17769_v42 = vpop.f32.mrb[87].mxu1 }
 0x214   : > { %v7594_v10 = vpop.f32.mrb[88].mxu1 }
 0x215   : > { %v17774_v20 = vpop.f32.mrb[89].mxu1 }
 0x216   : > { %7989 = vmatmul.mubr.f32.vlgmr.msra.gmra.mrb[0].mxu0 %v19134_v62 }
 0x217   : > { %8000 = vmatpush1.msra.mxu0 %v7920_v41  ;;  %8063 = vmatprep.mubr.f32.mxu0 %v19083_v55 }
 0x218   : > { %8073 = vmatprep.subr.mxu0 %v19266_v5 }
 0x21e   : > { %8066 = vmatmul.mubr.f32.vlgmr.msra.gmra.mrb[0].mxu0 %v19139_v60  ;;  %v7595_v60 = vadd.f32 %v7594_v10, %v7521_v40 }
 0x21f   : > { %8075 = vmatpush1.msra.mxu0 %v19275_v23  ;;  %8138 = vmatprep.mubr.f32.mxu0 %v19083_v55 }
 0x220   : > { %8151 = vmatprep.subr.mxu0 %v7915_v18 }
 0x225   : > { %v7668_v28 = vpop.f32.mrb[90].mxu1 }
 0x226   : > { %8142 = vmatmul.mubr.f32.vlgmr.msra.gmra.mrb[0].mxu0 %v19147_v27  ;;  %v7669_v38 = vadd.f32 %v7668_v28, %v7595_v60  ;;  %v17779_v44 = vpop.f32.mrb[91].mxu1 }
 0x227   : > { %8155 = vmatpush1.msra.mxu0 %v7921_v17  ;;  %8218 = vmatprep.mubr.f32.mxu0 %v19083_v55 }
 0x228   : > { %8227 = vmatprep.subr.mxu0 %v19266_v5  ;;  %v333_v5 = vlaneseq }
 0x229   : > { %v7742_v43 = vpop.f32.mrb[92].mxu1 }
 0x22a   : > { %v7743_v3 = vadd.f32 %v7742_v43, %v7669_v38  ;;  %v17784_v27 = vpop.f32.mrb[93].mxu1  ;;  %v334_v39 = vand.u32 127, %v333_v5 }
 0x22c   : > { %v336_v9 = vadd.s32 256, %v334_v39  ;;  %v335_v19 = vadd.s32 128, %v334_v39 }
 0x22d   : > { %v7814_v54 = vpop.f32.mrb[94].mxu1 }
 0x22e   : > { %8220 = vmatmul.mubr.f32.vlgmr.msra.gmra.mrb[0].mxu0 %v19134_v62  ;;  %v7815_v46 = vadd.f32 %v7814_v54, %v7743_v3  ;;  %v17789_v22 = vpop.f32.mrb[95].mxu1  ;;  %v19305_v47 = vmul.u32.u64.low 3817748708, %v336_v9  ;;  %v19306_v53 = vmul.u32.u64.high 3817748708, %v336_v9, %v19305_v47 }
 0x22f   : > { %8229 = vmatpush1.msra.mxu0 %v19275_v23  ;;  %8292 = vmatprep.mubr.f32.mxu0 %v19083_v55  ;;  %v19320_v25 = vmul.u32.u64.low 3817748708, %v335_v19  ;;  %v19321_v58 = vmul.u32.u64.high 3817748708, %v335_v19, %v19320_v25 }
 0x230   : > { %v365_v52 = vshrl.u32 %v19306_v53, 4 }
 0x231   : > { %v354_v31 = vshrl.u32 %v19321_v58, 4 }
 0x233   : > { %v355_v35 = vmul.u32 18, %v354_v31 }
 0x235   : > { %v356_v34 = vsub.s32 %v335_v19, %v355_v35 }
 0x236   : > { %8294 = vmatmul.mubr.f32.vlgmr.msra.gmra.mrb[0].mxu0 %v19134_v62  ;;  %v366_v62 = vmul.u32 18, %v365_v52 }
 0x237   : > { %8879 = vmatprep.mubr.f32.mxu0 %v19083_v55  ;;  %vm371_vm7 = vcmp.ne.s32.totalorder %v356_v34, 0  ;;  %vm374_vm8 = vcmp.lt.s32.totalorder %v356_v34, 0  ;;  %v380_v14 = vadd.s32 18, %v356_v34 }
 0x238   : > { %v367_v7 = vsub.s32 %v336_v9, %v366_v62  ;;  %v17323_v9 = vld [vmem:[%s20255_s3 + $0x8] sm:$0xff] }
 0x239   : > { %v8811_v47 = vsel %vm415_vm1, %v17323_v9, 0 }
 0x23a   : > { %vm372_vm10 = vcmp.ne.s32.totalorder %v367_v7, 0  ;;  %vm375_vm11 = vcmp.lt.s32.totalorder %v367_v7, 0  ;;  %v381_v12 = vadd.s32 18, %v367_v7  ;;  %v19389_v53 = vand.u32 4294901760, %v8811_v47 }
 0x23b   : > { %vm378_vm12 = vmand %vm375_vm11, %vm372_vm10 }
 0x23c   : > { %v384_v63 = vsel %vm378_vm12, %v381_v12, %v367_v7  ;;  %vm377_vm10 = vmand %vm374_vm8, %vm371_vm7  ;;  %vm12513_vm7 = vcmask 7168   ;;  %vm9732_vm8 = vcmask 154624  }
 0x23d   : > { %v8372_v21 = vpop.f32.mrb[96].mxu1  ;;  %vm387_vm13 = vcmp.lt.s32.totalorder %v384_v63, 16  ;;  %v383_v40 = vsel %vm377_vm10, %v380_v14, %v356_v34 }
 0x23e   : > { %v17794_v37 = vpop.f32.mrb[97].mxu1  ;;  %v19311_v50 = vsel %vm387_vm13, 1.0, %v19083_v55  ;;  %vm386_vm12 = vcmp.lt.s32.totalorder %v383_v40, 16 }
 0x23f   : > { %v19329_v44 = vsel %vm386_vm12, 1.0, %v19083_v55  ;;  %v8796_v37 = vpop.permute.xlu0 %8795 }
 0x250   : > { %v8448_v48 = vpop.f32.mrb[98].mxu1 }
 0x251   : > { %v8449_v49 = vadd.f32 %v8448_v48, %v8372_v21  ;;  %v17799_v16 = vpop.f32.mrb[99].mxu1  ;;  %v19392_v21 = vsub.f32 %v8811_v47, %v19389_v53 }
 0x253   : > { %v19395_v48 = vand.u32 4294901760, %v19392_v21 }
 0x254   : > { %v8522_v56 = vpop.f32.mrb[100].mxu1 }
 0x255   : > { %v8523_v23 = vadd.f32 %v8522_v56, %v8449_v49  ;;  %v17804_v59 = vpop.f32.mrb[101].mxu1 }
 0x258   : > { %v8596_v4 = vpop.f32.mrb[102].mxu1 }
 0x259   : > { %v8597_v18 = vadd.f32 %v8596_v4, %v8523_v23  ;;  %v17809_v33 = vpop.f32.mrb[103].mxu1  ;;  %v8883_v23 = vsub.f32 %v19392_v21, %v19395_v48 }
 0x25b   : > { %v8884_v7 = vand.u32 4294901760, %v8883_v23 }
 0x25c   : > { %v8670_v8 = vpop.f32.mrb[104].mxu1 }
 0x25d   : > { %v8671_v11 = vadd.f32 %v8670_v8, %v8597_v18  ;;  %v17814_v41 = vpop.f32.mrb[105].mxu1 }
 0x260   : > { %v8742_v13 = vpop.f32.mrb[106].mxu1 }
 0x261   : > { %v8743_v61 = vadd.f32 %v8742_v13, %v8671_v11  ;;  %v17819_v15 = vpop.f32.mrb[107].mxu1 }
 0x263   : > { %v8748_v1 = vadd.f32 %v8743_v61, %v7815_v46 }
 0x265   : > { %v8754_v17 = vadd.f32 %v19283_v0, %v8748_v1  ;;  %v19317_v24 = vmul.u32.u64.low 3817748708, %v334_v39  ;;  %v19318_v0 = vmul.u32.u64.high 3817748708, %v334_v39, %v19317_v24 }
 0x267   : > { %v8763_v45 = vadd.f32 %v8759_v26, %v8754_v17  ;;  %v343_v30 = vshrl.u32 %v19318_v0, 4 }
 0x269   : > { %vm8766_vm14 = vcmp.gt.f32.partialorder %v8763_v45, 0.0  ;;  %v8769_v29 = vmul.f32 0.1, %v8763_v45  ;;  %v344_v51 = vmul.u32 18, %v343_v30 }
 0x26b   : > { %v8772_v57 = vsel %vm8766_vm14, %v8763_v45, %v8769_v29  ;;  %v345_v36 = vsub.s32 %v334_v39, %v344_v51  ;;  %v17155_v39 = vld [vmem:[%s20256_s4] sm:$0xff] }
 0x26c   : > { %v8779_v2 = vmul.f32 %v19311_v50, %v8772_v57  ;;  %v8784_v51 = vld [vmem:[%s20255_s3] sm:$0xff] }
 0x26d   : > { %vm370_vm4 = vcmp.ne.s32.totalorder %v345_v36, 0  ;;  %vm373_vm5 = vcmp.lt.s32.totalorder %v345_v36, 0  ;;  %v379_v32 = vadd.s32 18, %v345_v36  ;;  %v9740_v14 = vsel %vm415_vm1, %v8784_v51, 0 }
 0x26e   : > { %8783 = vst.msk [vmem:[#allocation2 + $0x18] sm:$0xff] %vm8782_vm15, %v8779_v2  ;;  %vm376_vm9 = vmand %vm373_vm5, %vm370_vm4  ;;  %vm8803_vm4 = vcmask 146432   ;;  %vm10663_vm5 = vcmask 138240  }
 0x26f   : > { %v382_v6 = vsel %vm376_vm9, %v379_v32, %v345_v36  ;;  %vm15299_vm9 = vcmask 908288  }
 0x270   : > { %vm385_vm11 = vcmp.lt.s32.totalorder %v382_v6, 16 }
 0x271   : > { %v19326_v28 = vsel %vm385_vm11, 1.0, %v19083_v55 }
 0x275   : > { %v19351_v22 = vld [vmem:[#allocation2 + $0x18] sm:$0xff] }
 0x309   : > { %v8295_v42 = vpop.f32.mrb[0].mxu0 }
 0x30a   : > { %v8761_v10 = vadd.f32 %v8759_v26, %v8295_v42  ;;  %v8297_v60 = vpop.f32.mrb[1].mxu0 }
 0x30b   : > { %v8762_v20 = vadd.f32 %v8759_v26, %v8297_v60 }
 0x30c   : > { %vm8764_vm13 = vcmp.gt.f32.partialorder %v8761_v10, 0.0  ;;  %v8767_v38 = vmul.f32 0.1, %v8761_v10 }
 0x30d   : > { %vm8765_vm14 = vcmp.gt.f32.partialorder %v8762_v20, 0.0  ;;  %v8768_v43 = vmul.f32 0.1, %v8762_v20 }
 0x30e   : > { %v8770_v3 = vsel %vm8764_vm13, %v8761_v10, %v8767_v38  ;;  %v19468_v10 = vand.u32 4294901760, %v9740_v14 }
 0x30f   : > { %v19332_v27 = vmul.f32 %v19326_v28, %v8770_v3  ;;  %v8771_v54 = vsel %vm8765_vm14, %v8762_v20, %v8768_v43 }
 0x310   : > { %v19335_v46 = vmul.f32 %v19329_v44, %v8771_v54 }
 0x311   : > { %8797 = vrot.lane.b32.xlu1 %v19332_v27, %s18360_s29 }
 0x312   : > { %9728 = vrot.lane.b32.xlu0 %v19335_v46, %s18361_s12 }
 0x315   : > { %8799 = vrot.lane.b32.xlu1 %v19335_v46, %s18360_s29 }
 0x316   : > { %10657 = vrot.lane.b32.xlu0 %v19332_v27, %s18362_s13 }
 0x319   : > { %9726 = vrot.lane.b32.xlu1 %v19332_v27, %s18361_s12 }
 0x31a   : > { %10655 = vrot.lane.b32.xlu0 %v19083_v55, %s18362_s13 }
 0x31d   : > { %9724 = vrot.lane.b32.xlu1 %v19083_v55, %s18361_s12 }
 0x31e   : > { %12509 = vrot.lane.b32.xlu0 %v19335_v46, %s18363_s16 }
 0x321   : > { %10659 = vrot.lane.b32.xlu1 %v19335_v46, %s18362_s13 }
 0x322   : > { %8801 = vrot.lane.b32.xlu0 %v19351_v22, %s18360_s29 }
 0x325   : > { %12507 = vrot.lane.b32.xlu1 %v19332_v27, %s18363_s16 }
 0x326   : > { %13438 = vrot.lane.b32.xlu0 %v19335_v46, %s18351_s15 }
 0x329   : > { %12505 = vrot.lane.b32.xlu1 %v19083_v55, %s18363_s16 }
 0x32a   : > { %13436 = vrot.lane.b32.xlu0 %v19332_v27, %s18351_s15 }
 0x32d   : > { %9730 = vrot.lane.b32.xlu1 %v19351_v22, %s18361_s12 }
 0x32e   : > { %14370 = vrot.lane.b32.xlu0 %v19335_v46, %s18354_s18 }
 0x331   : > { %13440 = vrot.lane.b32.xlu1 %v19351_v22, %s18351_s15 }
 0x332   : > { %14368 = vrot.lane.b32.xlu0 %v19332_v27, %s18354_s18 }
 0x335   : > { %10661 = vrot.lane.b32.xlu1 %v19351_v22, %s18362_s13 }
 0x336   : > { %15295 = vrot.lane.b32.xlu0 %v19335_v46, %s18364_s19 }
 0x339   : > { %14372 = vrot.lane.b32.xlu1 %v19351_v22, %s18354_s18 }
 0x33a   : > { %15293 = vrot.lane.b32.xlu0 %v19332_v27, %s18364_s19 }
 0x33d   : > { %12511 = vrot.lane.b32.xlu1 %v19351_v22, %s18363_s16 }
 0x33e   : > { %16225 = vrot.lane.b32.xlu0 %v19351_v22, %s18353_s17 }
 0x341   : > { %15297 = vrot.lane.b32.xlu1 %v19351_v22, %s18364_s19  ;;  %s332_s19 = scalar_lea.vmem %s20261_s9, %s18302_s11 }
 0x342   : > { %17158 = vperm.xlu0 %18333, %v17155_v39   ;;  %v19488_v39 = vsub.f32 %v9740_v14, %v19468_v10 }
 0x345   : > { %16223 = vrot.lane.b32.xlu1 %v19335_v46, %s18353_s17 }
 0x349   : > { %16221 = vrot.lane.b32.xlu1 %v19332_v27, %s18353_s17 }
 0x383   : > { %v8798_v49 = vpop.permute.xlu1 %8797 }
 0x384   : > { %v8804_v16 = vsel %vm8803_vm4, %v8796_v37, %v8798_v49  ;;  %v19398_v52 = vpop.permute.xlu0 %9728 }
 0x385   : > { %v19400_v56 = vand.u32 4294901760, %v8804_v16 }
 0x387   : > { %v19405_v59 = vsub.f32 %v8804_v16, %v19400_v56  ;;  %v8800_v62 = vpop.permute.xlu1 %8799  ;;  %v19509_v16 = vand.u32 4294901760, %v19488_v39 }
 0x388   : > { %v8805_v4 = vsel %vm8803_vm4, %v8798_v49, %v8800_v62  ;;  %v19408_v18 = vpop.permute.xlu0 %10657 }
 0x389   : > { %v19410_v33 = vand.u32 4294901760, %v8805_v4  ;;  %v8899_v8 = vand.u32 4294901760, %v19405_v59 }
 0x38b   : > { %v8892_v11 = vsub.f32 %v8805_v4, %v19410_v33  ;;  %8814 = vmatprep.subr.mxu0 %v19410_v33  ;;  %v19415_v41 = vpop.permute.xlu1 %9726  ;;  %v8900_v15 = vsub.f32 %v19405_v59, %v8899_v8 }
 0x38c   : > { %v10656_v12 = vpop.permute.xlu0 %10655  ;;  %8816 = vmatpush1.msra.mxu0 %v19400_v56  ;;  %v9734_v60 = vsel %vm9732_vm8, %v19415_v41, %v19398_v52 }
 0x38d   : > { %v19420_v13 = vsel %vm10663_vm5, %v10656_v12, %v19408_v18  ;;  %8885 = vmatmul.mubr.f32.vlgmr.msra.gmra.mrb[2].mxu0 %v8884_v7  ;;  %v8893_v61 = vand.u32 4294901760, %v8892_v11  ;;  %v8901_v45 = vand.u32 4294901760, %v8900_v15  ;;  %v19480_v3 = vand.u32 4294901760, %v9734_v60  ;;  %v17324_v15 = vld [vmem:[%s20255_s3 + $0x10] sm:$0xff] }
 0x38e   : > { %8965 = vmatprep.mubr.f32.mxu0 %v19083_v55  ;;  %v19437_v55 = vld [vmem:[#allocation2] sm:$0xff] }
 0x38f   : > { %v19426_v1 = vpop.permute.xlu1 %9724  ;;  %v8894_v63 = vsub.f32 %v8892_v11, %v8893_v61 }
 0x390   : > { %v19428_v26 = vpop.permute.xlu0 %12509  ;;  %v9733_v49 = vsel %vm9732_vm8, %v19426_v1, %v19415_v41 }
 0x391   : > { %v8895_v17 = vand.u32 4294901760, %v8894_v63  ;;  %v19516_v23 = vand.u32 4294901760, %v9733_v49 }
 0x393   : > { %8896 = vmatprep.subr.mxu0 %v8895_v17  ;;  %v19430_v29 = vpop.permute.xlu1 %10659 }
 0x394   : > { %v8802_v57 = vpop.permute.xlu0 %8801  ;;  %8902 = vmatpush1.msra.mxu0 %v8901_v45 }
 0x395   : > { %v8806_v2 = vsel %vm8803_vm4, %v8800_v62, %v8802_v57  ;;  %8967 = vmatmul.mubr.f32.vlgmr.msra.gmra.mrb[2].mxu0 %v19389_v53  ;;  %8975 = vmatprep.subr.mxu0 %v8892_v11  ;;  %v19539_v11 = vsub.f32 %v9733_v49, %v19516_v23  ;;  %v10671_v57 = vsel %vm415_vm1, %v17324_v15, 0 }
 0x396   : > { %v19434_v19 = vand.u32 4294901760, %v8806_v2  ;;  %8978 = vmatpush1.msra.mxu0 %v19405_v59  ;;  %9041 = vmatprep.mubr.f32.mxu0 %v19437_v55 }
 0x397   : > { %9051 = vmatprep.subr.mxu0 %v19410_v33  ;;  %v12508_v24 = vpop.permute.xlu1 %12507  ;;  %v9828_v1 = vand.u32 4294901760, %v19539_v11 }
 0x398   : > { %v9356_v0 = vsub.f32 %v8806_v2, %v19434_v19  ;;  %v19444_v25 = vsel %vm12513_vm7, %v12508_v24, %v19428_v26  ;;  %v19446_v58 = vpop.permute.xlu0 %13438  ;;  %17821 = vmatpush3.msra.mxu1 %v19434_v19 }
 0x399   : > { %17823 = vmatmul.mubr.f32.vlgmr.msra.gmra.mrb[108].mxu1 %v8884_v7  ;;  %17825 = vmatprep.subr.mxu1 %v19437_v55  ;;  %v9829_v2 = vsub.f32 %v19539_v11, %v9828_v1 }
 0x39a   : > { %v9357_v30 = vand.u32 4294901760, %v9356_v0  ;;  %17827 = vmatprep.mubr.msk.f32.mxu1 %vm18350_vm0, %v19437_v55 }
 0x39b   : > { %v12506_v31 = vpop.permute.xlu1 %12505 }
 0x39c   : > { %v9358_v35 = vsub.f32 %v9356_v0, %v9357_v30  ;;  %v19456_v36 = vsel %vm12513_vm7, %v12506_v31, %v12508_v24  ;;  %v19458_v34 = vpop.permute.xlu0 %13436 }
 0x39d   : > { %9044 = vmatmul.mubr.f32.vlgmr.msra.gmra.mrb[2].mxu0 %v19392_v21 }
 0x39e   : > { %9053 = vmatpush1.msra.mxu0 %v19400_v56  ;;  %v9359_v32 = vand.u32 4294901760, %v9358_v35  ;;  %9116 = vmatprep.mubr.f32.mxu0 %v19437_v55 }
 0x39f   : > { %9129 = vmatprep.subr.mxu0 %v8893_v61  ;;  %v9731_v6 = vpop.permute.xlu1 %9730 }
 0x3a0   : > { %v14371_v40 = vpop.permute.xlu0 %14370  ;;  %17826 = vmatpush3.msra.mxu1 %v9359_v32  ;;  %v9735_v42 = vsel %vm9732_vm8, %v19398_v52, %v9731_v6 }
 0x3a1   : > { %17828 = vmatmul.mubr.f32.vlgmr.msra.gmra.mrb[110].mxu1 %v19389_v53  ;;  %17830 = vmatprep.subr.mxu1 %v19437_v55  ;;  %v19478_v38 = vand.u32 4294901760, %v9735_v42 }
 0x3a2   : > { %17831 = vmatpush3.msra.mxu1 %v9356_v0  ;;  %17832 = vmatprep.mubr.msk.f32.mxu1 %vm18350_vm0, %v19437_v55  ;;  %v9830_v0 = vand.u32 4294901760, %v9829_v2 }
 0x3a3   : > { %v19475_v20 = vpop.permute.xlu1 %13440  ;;  %17835 = vmatprep.subr.mxu1 %v19437_v55  ;;  %v19497_v47 = vsub.f32 %v9735_v42, %v19478_v38 }
 0x3a4   : > { %v14369_v43 = vpop.permute.xlu0 %14368 }
 0x3a5   : > { %v19483_v54 = vsel %vm4111_vm3, %v14369_v43, %v14371_v40  ;;  %9120 = vmatmul.mubr.f32.vlgmr.msra.gmra.mrb[2].mxu0 %v19395_v48  ;;  %17833 = vmatmul.mubr.f32.vlgmr.msra.gmra.mrb[112].mxu1 %v19392_v21  ;;  %v19502_v21 = vsub.f32 %v9734_v60, %v19480_v3  ;;  %v10286_v59 = vand.u32 4294901760, %v19497_v47  ;;  %v10665_v43 = vsel %vm10663_vm5, %v19408_v18, %v19430_v29 }
 0x3a6   : > { %9133 = vmatpush1.msra.mxu0 %v8899_v8  ;;  %17836 = vmatpush3.msra.mxu1 %v19434_v19 }
 0x3a7   : > { %9205 = vmatprep.subr.mxu0 %v19410_v33  ;;  %v10662_v9 = vpop.permute.xlu1 %10661  ;;  %17837 = vmatprep.mubr.msk.f32.mxu1 %vm18350_vm0, %v19437_v55  ;;  %v9812_v33 = vsub.f32 %v19488_v39, %v19509_v16  ;;  %v9822_v7 = vand.u32 4294901760, %v19502_v21  ;;  %v10287_v41 = vsub.f32 %v19497_v47, %v10286_v59 }
 0x3a8   : > { %v15296_v37 = vpop.permute.xlu0 %15295  ;;  %17840 = vmatprep.subr.mxu1 %v19437_v55  ;;  %9196 = vmatprep.mubr.f32.mxu0 %v19437_v55 }
 0x3a9   : > { %17838 = vmatmul.mubr.f32.vlgmr.msra.gmra.mrb[114].mxu1 %v19395_v48  ;;  %v9823_v12 = vsub.f32 %v19502_v21, %v9822_v7  ;;  %v10288_v17 = vand.u32 4294901760, %v10287_v41 }
 0x3aa   : > { %17841 = vmatpush3.msra.mxu1 %v9357_v30  ;;  %17842 = vmatprep.mubr.msk.f32.mxu1 %vm18350_vm0, %v19437_v55 }
 0x3ab   : > { %v19513_v52 = vpop.permute.xlu1 %14372  ;;  %17845 = vmatprep.subr.mxu1 %v19437_v55  ;;  %v9824_v45 = vand.u32 4294901760, %v9823_v12 }
 0x3ac   : > { %v19521_v62 = vsel %vm4111_vm3, %v14371_v40, %v19513_v52  ;;  %v15294_v48 = vpop.permute.xlu0 %15293  ;;  %v17326_v40 = vld [vmem:[%s20255_s3 + $0x20] sm:$0xff] }
 0x3ad   : > { %v19524_v4 = vsel %vm15299_vm9, %v15294_v48, %v15296_v37  ;;  %9198 = vmatmul.mubr.f32.vlgmr.msra.gmra.mrb[2].mxu0 %v19389_v53  ;;  %17843 = vmatmul.mubr.f32.vlgmr.msra.gmra.mrb[116].mxu1 %v19389_v53  ;;  %v11592_v60 = vsel %vm415_vm1, %v17326_v40, 0 }
 0x3ae   : > { %9207 = vmatpush1.msra.mxu0 %v19400_v56  ;;  %17846 = vmatpush3.msra.mxu1 %v19434_v19  ;;  %v9813_v56 = vand.u32 4294901760, %v9812_v33  ;;  %v19575_v19 = vand.u32 4294901760, %v10671_v57 }
 0x3af   : > { %9743 = vmatprep.subr.mxu0 %v19480_v3  ;;  %v19534_v8 = vpop.permute.xlu1 %12511  ;;  %17847 = vmatprep.mubr.msk.f32.mxu1 %vm18350_vm0, %v19437_v55 }
 0x3b0   : > { %17850 = vmatprep.subr.mxu1 %v19437_v55  ;;  %9270 = vmatprep.mubr.f32.mxu0 %v19437_v55  ;;  %v19585_v30 = vsub.f32 %v10671_v57, %v19575_v19 }
 0x3b1   : > { %17848 = vmatmul.mubr.f32.vlgmr.msra.gmra.mrb[118].mxu1 %v19389_v53 }
 0x3b2   : > { %17851 = vmatpush3.msra.mxu1 %v19478_v38  ;;  %17852 = vmatprep.mubr.msk.f32.mxu1 %vm18350_vm0, %v19437_v55  ;;  %v19596_v51 = vand.u32 4294901760, %v19585_v30 }
 0x3b3   : > { %v19551_v61 = vpop.permute.xlu1 %15297  ;;  %17855 = vmatprep.subr.mxu1 %v19437_v55 }
 0x3b4   : > { %v19560_v63 = vsel %vm15299_vm9, %v15296_v37, %v19551_v61  ;;  %v10743_v32 = vsub.f32 %v19585_v30, %v19596_v51 }
 0x3b5   : > { %9272 = vmatmul.mubr.f32.vlgmr.msra.gmra.mrb[2].mxu0 %v19389_v53  ;;  %17853 = vmatmul.mubr.f32.vlgmr.msra.gmra.mrb[120].mxu1 %v9813_v56  ;;  %v10666_v53 = vsel %vm10663_vm5, %v19430_v29, %v10662_v9  ;;  %v19644_v9 = vand.u32 4294901760, %v10665_v43 }
 0x3b6   : > { %9745 = vmatpush1.msra.mxu0 %v19516_v23  ;;  %17856 = vmatpush3.msra.mxu1 %v10288_v17  ;;  %v19581_v24 = vand.u32 4294901760, %v10666_v53  ;;  %v19613_v6 = vand.u32 4294901760, %v10743_v32  ;;  %v19788_v32 = vand.u32 4294901760, %v19335_v46 }
 0x3b7   : > { %9825 = vmatprep.subr.mxu0 %v9824_v45  ;;  %17857 = vmatprep.mubr.msk.f32.mxu1 %vm18350_vm0, %v19437_v55  ;;  %v19662_v29 = vsub.f32 %v10665_v43, %v19644_v9 }
 0x3b8   : > { %17860 = vmatprep.subr.mxu1 %v19437_v55  ;;  %9808 = vmatprep.mubr.f32.mxu0 %v19437_v55  ;;  %v11216_v31 = vsub.f32 %v10666_v53, %v19581_v24  ;;  %v19809_v40 = vsub.f32 %v19335_v46, %v19788_v32 }
 0x3b9   : > { %17858 = vmatmul.mubr.f32.vlgmr.msra.gmra.mrb[122].mxu1 %v19468_v10  ;;  %v10753_v49 = vand.u32 4294901760, %v19662_v29 }
 0x3ba   : > { %17861 = vmatpush3.msra.mxu1 %v19497_v47  ;;  %17862 = vmatprep.mubr.msk.f32.mxu1 %vm18350_vm0, %v19437_v55  ;;  %v11217_v35 = vand.u32 4294901760, %v11216_v31  ;;  %v11674_v46 = vand.u32 4294901760, %v19809_v40 }
 0x3bb   : > { %17865 = vmatprep.subr.mxu1 %v19437_v55 }
 0x3bc   : > { %v11218_v14 = vsub.f32 %v11216_v31, %v11217_v35 }
 0x3bd   : > { %9814 = vmatmul.mubr.f32.vlgmr.msra.gmra.mrb[2].mxu0 %v9813_v56  ;;  %17863 = vmatmul.mubr.f32.vlgmr.msra.gmra.mrb[124].mxu1 %v19488_v39 }
 0x3be   : > { %9831 = vmatpush1.msra.mxu0 %v9830_v0  ;;  %17866 = vmatpush3.msra.mxu1 %v19478_v38  ;;  %v11219_v42 = vand.u32 4294901760, %v11218_v14 }
 0x3bf   : > { %9904 = vmatprep.subr.mxu0 %v19502_v21  ;;  %17867 = vmatprep.mubr.msk.f32.mxu1 %vm18350_vm0, %v19437_v55 }
 0x3c0   : > { %17870 = vmatprep.subr.mxu1 %v19437_v55  ;;  %9894 = vmatprep.mubr.f32.mxu0 %v19437_v55 }
 0x3c1   : > { %17868 = vmatmul.mubr.f32.vlgmr.msra.gmra.mrb[126].mxu1 %v19509_v16 }
 0x3c2   : > { %17871 = vmatpush3.msra.mxu1 %v10286_v59  ;;  %17872 = vmatprep.mubr.msk.f32.mxu1 %vm18350_vm0, %v19437_v55 }
 0x3c3   : > { %17875 = vmatprep.subr.mxu1 %v19437_v55 }
 0x3c5   : > { %9896 = vmatmul.mubr.f32.vlgmr.msra.gmra.mrb[2].mxu0 %v19468_v10  ;;  %17873 = vmatmul.mubr.f32.vlgmr.msra.gmra.mrb[128].mxu1 %v19468_v10 }
 0x3c6   : > { %9907 = vmatpush1.msra.mxu0 %v19539_v11  ;;  %17876 = vmatpush3.msra.mxu1 %v19478_v38  ;;  %v19633_v38 = vand.u32 4294901760, %v11592_v60 }
 0x3c7   : > { %9980 = vmatprep.subr.mxu0 %v19480_v3  ;;  %17877 = vmatprep.mubr.msk.f32.mxu1 %vm18350_vm0, %v19437_v55 }
 0x3c8   : > { %17880 = vmatprep.subr.mxu1 %v19437_v55  ;;  %9970 = vmatprep.mubr.f32.mxu0 %v19437_v55  ;;  %v19649_v47 = vsub.f32 %v11592_v60, %v19633_v38  ;;  %v19815_v60 = vand.u32 4294901760, %v19332_v27 }
 0x3c9   : > { %17878 = vmatmul.mubr.f32.vlgmr.msra.gmra.mrb[130].mxu1 %v19468_v10 }
 0x3ca   : > { %17881 = vmatpush3.msra.mxu1 %v19581_v24  ;;  %17882 = vmatprep.mubr.msk.f32.mxu1 %vm18350_vm0, %v19437_v55  ;;  %v19666_v37 = vand.u32 4294901760, %v19649_v47 }
 0x3cb   : > { %17885 = vmatprep.subr.mxu1 %v19437_v55 }
 0x3cd   : > { %9973 = vmatmul.mubr.f32.vlgmr.msra.gmra.mrb[2].mxu0 %v19488_v39  ;;  %17883 = vmatmul.mubr.f32.vlgmr.msra.gmra.mrb[132].mxu1 %v19613_v6  ;;  %v19642_v39 = vand.u32 4294901760, %v19351_v22 }
 0x3ce   : > { %9982 = vmatpush1.msra.mxu0 %v19516_v23  ;;  %17886 = vmatpush3.msra.mxu1 %v11219_v42 }
 0x3cf   : > { %10058 = vmatprep.subr.mxu0 %v9822_v7  ;;  %17887 = vmatprep.mubr.msk.f32.mxu1 %vm18350_vm0, %v19437_v55  ;;  %v12137_v18 = vsub.f32 %v19351_v22, %v19642_v39  ;;  %v11664_v22 = vsub.f32 %v19649_v47, %v19666_v37 }
 0x3d0   : > { %17890 = vmatprep.subr.mxu1 %v19437_v55  ;;  %10045 = vmatprep.mubr.f32.mxu0 %v19437_v55 }
 0x3d1   : > { %17888 = vmatmul.mubr.f32.vlgmr.msra.gmra.mrb[134].mxu1 %v19575_v19  ;;  %v12138_v21 = vand.u32 4294901760, %v12137_v18  ;;  %v19691_v48 = vand.u32 4294901760, %v11664_v22 }
 0x3d2   : > { %17891 = vmatpush3.msra.mxu1 %v11216_v31  ;;  %17892 = vmatprep.mubr.msk.f32.mxu1 %vm18350_vm0, %v19437_v55 }
 0x3d3   : > { %17895 = vmatprep.subr.mxu1 %v19437_v55  ;;  %v12139_v59 = vsub.f32 %v12137_v18, %v12138_v21 }
 0x3d5   : > { %10049 = vmatmul.mubr.f32.vlgmr.msra.gmra.mrb[2].mxu0 %v19509_v16  ;;  %17893 = vmatmul.mubr.f32.vlgmr.msra.gmra.mrb[136].mxu1 %v19585_v30  ;;  %v12140_v7 = vand.u32 4294901760, %v12139_v59  ;;  %v19865_v59 = vand.u32 4294901760, %v19513_v52 }
 0x3d6   : > { %10062 = vmatpush1.msra.mxu0 %v9828_v1  ;;  %17896 = vmatpush3.msra.mxu1 %v19581_v24 }
 0x3d7   : > { %10134 = vmatprep.subr.mxu0 %v19480_v3  ;;  %17897 = vmatprep.mubr.msk.f32.mxu1 %vm18350_vm0, %v19437_v55  ;;  %v19672_v3 = vand.u32 4294901760, %v19420_v13 }
 0x3d8   : > { %17900 = vmatprep.subr.mxu1 %v19437_v55  ;;  %10125 = vmatprep.mubr.f32.mxu0 %v19437_v55 }
 0x3d9   : > { %17898 = vmatmul.mubr.f32.vlgmr.msra.gmra.mrb[138].mxu1 %v19596_v51  ;;  %v19686_v16 = vsub.f32 %v19420_v13, %v19672_v3  ;;  %v17325_v13 = vld [vmem:[%s20255_s3 + $0x18] sm:$0xff] }
 0x3da   : > { %17901 = vmatpush3.msra.mxu1 %v11217_v35  ;;  %17902 = vmatprep.mubr.msk.f32.mxu1 %vm18350_vm0, %v19437_v55  ;;  %v12521_v41 = vsel %vm415_vm1, %v17325_v13, 0  ;;  %v19783_v35 = vand.u32 4294901760, %v19475_v20 }
 0x3db   : > { %17905 = vmatprep.subr.mxu1 %v19437_v55  ;;  %v10759_v33 = vand.u32 4294901760, %v19686_v16  ;;  %v19719_v12 = vand.u32 4294901760, %v12521_v41 }
 0x3dd   : > { %10127 = vmatmul.mubr.f32.vlgmr.msra.gmra.mrb[2].mxu0 %v19468_v10  ;;  %17903 = vmatmul.mubr.f32.vlgmr.msra.gmra.mrb[140].mxu1 %v19575_v19  ;;  %v10760_v56 = vsub.f32 %v19686_v16, %v10759_v33  ;;  %v19729_v17 = vsub.f32 %v12521_v41, %v19719_v12 }
 0x3de   : > { %10136 = vmatpush1.msra.mxu0 %v19516_v23  ;;  %17906 = vmatpush3.msra.mxu1 %v19581_v24  ;;  %v10754_v23 = vsub.f32 %v19662_v29, %v10753_v49  ;;  %v17327_v24 = vld [vmem:[%s20255_s3 + $0x28] sm:$0xff] }
 0x3df   : > { %10674 = vmatprep.subr.mxu0 %v19644_v9  ;;  %17907 = vmatprep.mubr.msk.f32.mxu1 %vm18350_vm0, %v19437_v55  ;;  %v10761_v1 = vand.u32 4294901760, %v10760_v56  ;;  %v13448_v31 = vsel %vm415_vm1, %v17327_v24, 0  ;;  %v17328_v56 = vld [vmem:[%s20255_s3 + $0x30] sm:$0xff] }
 0x3e0   : > { %17910 = vmatprep.subr.mxu1 %v19437_v55  ;;  %10199 = vmatprep.mubr.f32.mxu0 %v19437_v55  ;;  %v10755_v11 = vand.u32 4294901760, %v10754_v23 }
 0x3e1   : > { %17908 = vmatmul.mubr.f32.vlgmr.msra.gmra.mrb[142].mxu1 %v19575_v19 }
 0x3e2   : > { %17911 = vmatpush3.msra.mxu1 %v19642_v39  ;;  %17912 = vmatprep.mubr.msk.f32.mxu1 %vm18350_vm0, %v19437_v55 }
 0x3e3   : > { %17915 = vmatprep.subr.mxu1 %v19437_v55 }
 0x3e5   : > { %10201 = vmatmul.mubr.f32.vlgmr.msra.gmra.mrb[2].mxu0 %v19468_v10  ;;  %17913 = vmatmul.mubr.f32.vlgmr.msra.gmra.mrb[144].mxu1 %v19691_v48  ;;  %v12516_v10 = vsel %vm12513_vm7, %v19428_v26, %v19534_v8  ;;  %v19740_v8 = vand.u32 4294901760, %v19729_v17 }
 0x3e6   : > { %10676 = vmatpush1.msra.mxu0 %v19672_v3  ;;  %17916 = vmatpush3.msra.mxu1 %v12140_v7  ;;  %v19724_v15 = vand.u32 4294901760, %v12516_v10 }
 0x3e7   : > { %10756 = vmatprep.subr.mxu0 %v10755_v11  ;;  %17917 = vmatprep.mubr.msk.f32.mxu1 %vm18350_vm0, %v19437_v55  ;;  %v12593_v57 = vsub.f32 %v19729_v17, %v19740_v8 }
 0x3e8   : > { %17920 = vmatprep.subr.mxu1 %v19437_v55  ;;  %10739 = vmatprep.mubr.f32.mxu0 %v19437_v55  ;;  %v13066_v26 = vsub.f32 %v12516_v10, %v19724_v15 }
 0x3e9   : > { %17918 = vmatmul.mubr.f32.vlgmr.msra.gmra.mrb[146].mxu1 %v19633_v38  ;;  %v19757_v53 = vand.u32 4294901760, %v12593_v57 }
 0x3ea   : > { %17921 = vmatpush3.msra.mxu1 %v12137_v18  ;;  %17922 = vmatprep.mubr.msk.f32.mxu1 %vm18350_vm0, %v19437_v55  ;;  %v13067_v45 = vand.u32 4294901760, %v13066_v26 }
 0x3eb   : > { %17925 = vmatprep.subr.mxu1 %v19437_v55 }
 0x3ec   : > { %v13068_v2 = vsub.f32 %v13066_v26, %v13067_v45 }
 0x3ed   : > { %10745 = vmatmul.mubr.f32.vlgmr.msra.gmra.mrb[2].mxu0 %v19613_v6  ;;  %17923 = vmatmul.mubr.f32.vlgmr.msra.gmra.mrb[148].mxu1 %v19649_v47 }
 0x3ee   : > { %10762 = vmatpush1.msra.mxu0 %v10761_v1  ;;  %17926 = vmatpush3.msra.mxu1 %v19642_v39  ;;  %v13069_v0 = vand.u32 4294901760, %v13068_v2  ;;  %v19925_v1 = vand.u32 4294901760, %v19551_v61 }
 0x3ef   : > { %10835 = vmatprep.subr.mxu0 %v19662_v29  ;;  %17927 = vmatprep.mubr.msk.f32.mxu1 %vm18350_vm0, %v19437_v55  ;;  %v11675_v29 = vsub.f32 %v19809_v40, %v11674_v46 }
 0x3f0   : > { %17930 = vmatprep.subr.mxu1 %v19437_v55  ;;  %10825 = vmatprep.mubr.f32.mxu0 %v19437_v55  ;;  %v19943_v57 = vsub.f32 %v19551_v61, %v19925_v1  ;;  %v19959_v61 = vand.u32 4294901760, %v19456_v36 }
 0x3f1   : > { %17928 = vmatmul.mubr.f32.vlgmr.msra.gmra.mrb[150].mxu1 %v19666_v37  ;;  %v11676_v22 = vand.u32 4294901760, %v11675_v29 }
 0x3f2   : > { %17931 = vmatpush3.msra.mxu1 %v12138_v21  ;;  %17932 = vmatprep.mubr.msk.f32.mxu1 %vm18350_vm0, %v19437_v55  ;;  %v15852_v24 = vand.u32 4294901760, %v19943_v57 }
 0x3f3   : > { %17935 = vmatprep.subr.mxu1 %v19437_v55 }
 0x3f5   : > { %10827 = vmatmul.mubr.f32.vlgmr.msra.gmra.mrb[2].mxu0 %v19575_v19  ;;  %17933 = vmatmul.mubr.f32.vlgmr.msra.gmra.mrb[152].mxu1 %v19633_v38 }
 0x3f6   : > { %10838 = vmatpush1.msra.mxu0 %v19686_v16  ;;  %17936 = vmatpush3.msra.mxu1 %v19642_v39 }
 0x3f7   : > { %10911 = vmatprep.subr.mxu0 %v19644_v9  ;;  %17937 = vmatprep.mubr.msk.f32.mxu1 %vm18350_vm0, %v19437_v55 }
 0x3f8   : > { %17940 = vmatprep.subr.mxu1 %v19437_v55  ;;  %10901 = vmatprep.mubr.f32.mxu0 %v19437_v55 }
 0x3f9   : > { %17938 = vmatmul.mubr.f32.vlgmr.msra.gmra.mrb[154].mxu1 %v19633_v38 }
 0x3fa   : > { %17941 = vmatpush3.msra.mxu1 %v19724_v15  ;;  %17942 = vmatprep.mubr.msk.f32.mxu1 %vm18350_vm0, %v19437_v55 }
 0x3fb   : > { %17945 = vmatprep.subr.mxu1 %v19437_v55 }
 0x3fd   : > { %10904 = vmatmul.mubr.f32.vlgmr.msra.gmra.mrb[2].mxu0 %v19585_v30  ;;  %17943 = vmatmul.mubr.f32.vlgmr.msra.gmra.mrb[156].mxu1 %v19757_v53  ;;  %v19777_v30 = vand.u32 4294901760, %v13448_v31 }
 0x3fe   : > { %10913 = vmatpush1.msra.mxu0 %v19672_v3  ;;  %17946 = vmatpush3.msra.mxu1 %v13069_v0 }
 0x3ff   : > { %10989 = vmatprep.subr.mxu0 %v10753_v49  ;;  %17947 = vmatprep.mubr.msk.f32.mxu1 %vm18350_vm0, %v19437_v55  ;;  %v19791_v14 = vsub.f32 %v13448_v31, %v19777_v30  ;;  %v19974_v31 = vsub.f32 %v19456_v36, %v19959_v61  ;;  %v17330_v36 = vld [vmem:[%s20255_s3 + $0x40] sm:$0xff] }
 0x400   : > { %17950 = vmatprep.subr.mxu1 %v19437_v55  ;;  %10976 = vmatprep.mubr.f32.mxu0 %v19437_v55 }
 0x401   : > { %17948 = vmatmul.mubr.f32.vlgmr.msra.gmra.mrb[158].mxu1 %v19719_v12  ;;  %v19805_v6 = vand.u32 4294901760, %v19791_v14 }
 0x402   : > { %17951 = vmatpush3.msra.mxu1 %v13066_v26  ;;  %17952 = vmatprep.mubr.msk.f32.mxu1 %vm18350_vm0, %v19437_v55  ;;  %v19928_v26 = vand.u32 4294901760, %v19444_v25 }
 0x403   : > { %17955 = vmatprep.subr.mxu1 %v19437_v55  ;;  %v13520_v43 = vsub.f32 %v19791_v14, %v19805_v6 }
 0x405   : > { %10980 = vmatmul.mubr.f32.vlgmr.msra.gmra.mrb[2].mxu0 %v19596_v51  ;;  %17953 = vmatmul.mubr.f32.vlgmr.msra.gmra.mrb[160].mxu1 %v19729_v17  ;;  %v13993_v51 = vsub.f32 %v19475_v20, %v19783_v35  ;;  %v19834_v18 = vand.u32 4294901760, %v13520_v43  ;;  %v16233_v43 = vsel %vm415_vm1, %v17330_v36, 0 }
 0x406   : > { %10993 = vmatpush1.msra.mxu0 %v10759_v33  ;;  %17956 = vmatpush3.msra.mxu1 %v19724_v15  ;;  %v14925_v33 = vsub.f32 %v19513_v52, %v19865_v59 }
 0x407   : > { %11065 = vmatprep.subr.mxu0 %v19644_v9  ;;  %17957 = vmatprep.mubr.msk.f32.mxu1 %vm18350_vm0, %v19437_v55  ;;  %v13994_v42 = vand.u32 4294901760, %v13993_v51  ;;  %v19831_v9 = vsub.f32 %v19332_v27, %v19815_v60  ;;  %v17329_v27 = vld [vmem:[%s20255_s3 + $0x38] sm:$0xff] }
 0x408   : > { %17960 = vmatprep.subr.mxu1 %v19437_v55  ;;  %11056 = vmatprep.mubr.f32.mxu0 %v19437_v55  ;;  %v14380_v49 = vsel %vm415_vm1, %v17329_v27, 0  ;;  %v14926_v7 = vand.u32 4294901760, %v14925_v33 }
 0x409   : > { %17958 = vmatmul.mubr.f32.vlgmr.msra.gmra.mrb[162].mxu1 %v19740_v8  ;;  %v13995_v39 = vsub.f32 %v13993_v51, %v13994_v42  ;;  %v11680_v21 = vand.u32 4294901760, %v19831_v9  ;;  %v19859_v16 = vand.u32 4294901760, %v14380_v49 }
 0x40a   : > { %17961 = vmatpush3.msra.mxu1 %v13067_v45  ;;  %17962 = vmatprep.mubr.msk.f32.mxu1 %vm18350_vm0, %v19437_v55  ;;  %v14927_v11 = vsub.f32 %v14925_v33, %v14926_v7 }
 0x40b   : > { %17965 = vmatprep.subr.mxu1 %v19437_v55  ;;  %v19870_v13 = vsub.f32 %v14380_v49, %v19859_v16 }
 0x40c   : > { %v14928_v10 = vand.u32 4294901760, %v14927_v11 }
 0x40d   : > { %11058 = vmatmul.mubr.f32.vlgmr.msra.gmra.mrb[2].mxu0 %v19575_v19  ;;  %17963 = vmatmul.mubr.f32.vlgmr.msra.gmra.mrb[164].mxu1 %v19719_v12 }
 0x40e   : > { %11067 = vmatpush1.msra.mxu0 %v19672_v3  ;;  %17966 = vmatpush3.msra.mxu1 %v19724_v15  ;;  %v13996_v3 = vand.u32 4294901760, %v13995_v39  ;;  %v15306_v15 = vsel %vm415_vm1, %v17328_v56, 0  ;;  %v20007_v39 = vand.u32 4294901760, %v16233_v43 }
 0x40f   : > { %11595 = vmatprep.subr.mxu0 %v19788_v32  ;;  %17967 = vmatprep.mubr.msk.f32.mxu1 %vm18350_vm0, %v19437_v55 }
 0x410   : > { %17970 = vmatprep.subr.mxu1 %v19437_v55  ;;  %11130 = vmatprep.mubr.f32.mxu0 %v19437_v55  ;;  %v20019_v27 = vsub.f32 %v16233_v43, %v20007_v39 }
 0x411   : > { %17968 = vmatmul.mubr.f32.vlgmr.msra.gmra.mrb[166].mxu1 %v19719_v12 }
 0x412   : > { %17971 = vmatpush3.msra.mxu1 %v19783_v35  ;;  %17972 = vmatprep.mubr.msk.f32.mxu1 %vm18350_vm0, %v19437_v55 }
 0x413   : > { %17975 = vmatprep.subr.mxu1 %v19437_v55 }
 0x415   : > { %11132 = vmatmul.mubr.f32.vlgmr.msra.gmra.mrb[2].mxu0 %v19575_v19  ;;  %17973 = vmatmul.mubr.f32.vlgmr.msra.gmra.mrb[168].mxu1 %v19834_v18  ;;  %v11681_v19 = vsub.f32 %v19831_v9, %v11680_v21 }
 0x416   : > { %11597 = vmatpush1.msra.mxu0 %v19815_v60  ;;  %17976 = vmatpush3.msra.mxu1 %v13996_v3 }
 0x417   : > { %11677 = vmatprep.subr.mxu0 %v11676_v22  ;;  %17977 = vmatprep.mubr.msk.f32.mxu1 %vm18350_vm0, %v19437_v55  ;;  %v11682_v23 = vand.u32 4294901760, %v11681_v19 }
 0x418   : > { %17980 = vmatprep.subr.mxu1 %v19437_v55  ;;  %11660 = vmatprep.mubr.f32.mxu0 %v19437_v55 }
 0x419   : > { %17978 = vmatmul.mubr.f32.vlgmr.msra.gmra.mrb[170].mxu1 %v19777_v30 }
 0x41a   : > { %17981 = vmatpush3.msra.mxu1 %v13993_v51  ;;  %17982 = vmatprep.mubr.msk.f32.mxu1 %vm18350_vm0, %v19437_v55 }
 0x41b   : > { %17985 = vmatprep.subr.mxu1 %v19437_v55 }
 0x41d   : > { %11666 = vmatmul.mubr.f32.vlgmr.msra.gmra.mrb[2].mxu0 %v19691_v48  ;;  %17983 = vmatmul.mubr.f32.vlgmr.msra.gmra.mrb[172].mxu1 %v19791_v14  ;;  %v19882_v48 = vand.u32 4294901760, %v19870_v13 }
 0x41e   : > { %11683 = vmatpush1.msra.mxu0 %v11682_v23  ;;  %17986 = vmatpush3.msra.mxu1 %v19783_v35 }
 0x41f   : > { %11756 = vmatprep.subr.mxu0 %v19809_v40  ;;  %17987 = vmatprep.mubr.msk.f32.mxu1 %vm18350_vm0, %v19437_v55  ;;  %v14452_v52 = vsub.f32 %v19870_v13, %v19882_v48  ;;  %v12609_v40 = vand.u32 4294901760, %v19974_v31 }
 0x420   : > { %17990 = vmatprep.subr.mxu1 %v19437_v55  ;;  %11746 = vmatprep.mubr.f32.mxu0 %v19437_v55 }
 0x421   : > { %17988 = vmatmul.mubr.f32.vlgmr.msra.gmra.mrb[174].mxu1 %v19805_v6  ;;  %v19899_v41 = vand.u32 4294901760, %v14452_v52 }
 0x422   : > { %17991 = vmatpush3.msra.mxu1 %v13994_v42  ;;  %17992 = vmatprep.mubr.msk.f32.mxu1 %vm18350_vm0, %v19437_v55 }
 0x423   : > { %17995 = vmatprep.subr.mxu1 %v19437_v55 }
 0x425   : > { %11748 = vmatmul.mubr.f32.vlgmr.msra.gmra.mrb[2].mxu0 %v19633_v38  ;;  %17993 = vmatmul.mubr.f32.vlgmr.msra.gmra.mrb[176].mxu1 %v19777_v30 }
 0x426   : > { %11759 = vmatpush1.msra.mxu0 %v19831_v9  ;;  %17996 = vmatpush3.msra.mxu1 %v19783_v35  ;;  %v15853_v35 = vsub.f32 %v19943_v57, %v15852_v24 }
 0x427   : > { %11832 = vmatprep.subr.mxu0 %v19788_v32  ;;  %17997 = vmatprep.mubr.msk.f32.mxu1 %vm18350_vm0, %v19437_v55 }
 0x428   : > { %18000 = vmatprep.subr.mxu1 %v19437_v55  ;;  %11822 = vmatprep.mubr.f32.mxu0 %v19437_v55  ;;  %v15854_v42 = vand.u32 4294901760, %v15853_v35 }
 0x429   : > { %17998 = vmatmul.mubr.f32.vlgmr.msra.gmra.mrb[178].mxu1 %v19777_v30 }
 0x42a   : > { %18001 = vmatpush3.msra.mxu1 %v19865_v59  ;;  %18002 = vmatprep.mubr.msk.f32.mxu1 %vm18350_vm0, %v19437_v55 }
 0x42b   : > { %18005 = vmatprep.subr.mxu1 %v19437_v55 }
 0x42d   : > { %11825 = vmatmul.mubr.f32.vlgmr.msra.gmra.mrb[2].mxu0 %v19649_v47  ;;  %18003 = vmatmul.mubr.f32.vlgmr.msra.gmra.mrb[180].mxu1 %v19899_v41  ;;  %v19919_v47 = vand.u32 4294901760, %v15306_v15 }
 0x42e   : > { %11834 = vmatpush1.msra.mxu0 %v19815_v60  ;;  %18006 = vmatpush3.msra.mxu1 %v14928_v10 }
 0x42f   : > { %11910 = vmatprep.subr.mxu0 %v11674_v46  ;;  %18007 = vmatprep.mubr.msk.f32.mxu1 %vm18350_vm0, %v19437_v55  ;;  %v19933_v45 = vsub.f32 %v15306_v15, %v19919_v47  ;;  %v12610_v46 = vsub.f32 %v19974_v31, %v12609_v40 }
 0x430   : > { %18010 = vmatprep.subr.mxu1 %v19437_v55  ;;  %11897 = vmatprep.mubr.f32.mxu0 %v19437_v55 }
 0x431   : > { %18008 = vmatmul.mubr.f32.vlgmr.msra.gmra.mrb[182].mxu1 %v19859_v16  ;;  %v19953_v2 = vand.u32 4294901760, %v19933_v45  ;;  %v12611_v29 = vand.u32 4294901760, %v12610_v46 }
 0x432   : > { %18011 = vmatpush3.msra.mxu1 %v14925_v33  ;;  %18012 = vmatprep.mubr.msk.f32.mxu1 %vm18350_vm0, %v19437_v55 }
 0x433   : > { %18015 = vmatprep.subr.mxu1 %v19437_v55 }
 0x435   : > { %11901 = vmatmul.mubr.f32.vlgmr.msra.gmra.mrb[2].mxu0 %v19666_v37  ;;  %18013 = vmatmul.mubr.f32.vlgmr.msra.gmra.mrb[184].mxu1 %v19870_v13  ;;  %v19949_v37 = vsub.f32 %v19444_v25, %v19928_v26  ;;  %v15378_v25 = vsub.f32 %v19933_v45, %v19953_v2 }
 0x436   : > { %11914 = vmatpush1.msra.mxu0 %v11680_v21  ;;  %18016 = vmatpush3.msra.mxu1 %v19865_v59 }
 0x437   : > { %11986 = vmatprep.subr.mxu0 %v19788_v32  ;;  %18017 = vmatprep.mubr.msk.f32.mxu1 %vm18350_vm0, %v19437_v55  ;;  %v12603_v0 = vand.u32 4294901760, %v19949_v37  ;;  %v19980_v32 = vand.u32 4294901760, %v15378_v25 }
 0x438   : > { %18020 = vmatprep.subr.mxu1 %v19437_v55  ;;  %11977 = vmatprep.mubr.f32.mxu0 %v19437_v55 }
 0x439   : > { %18018 = vmatmul.mubr.f32.vlgmr.msra.gmra.mrb[186].mxu1 %v19882_v48  ;;  %v12604_v51 = vsub.f32 %v19949_v37, %v12603_v0 }
 0x43a   : > { %18021 = vmatpush3.msra.mxu1 %v14926_v7  ;;  %18022 = vmatprep.mubr.msk.f32.mxu1 %vm18350_vm0, %v19437_v55 }
 0x43b   : > { %18025 = vmatprep.subr.mxu1 %v19437_v55 }
 0x43d   : > { %11979 = vmatmul.mubr.f32.vlgmr.msra.gmra.mrb[2].mxu0 %v19633_v38  ;;  %18023 = vmatmul.mubr.f32.vlgmr.msra.gmra.mrb[188].mxu1 %v19859_v16 }
 0x43e   : > { %11988 = vmatpush1.msra.mxu0 %v19815_v60  ;;  %18026 = vmatpush3.msra.mxu1 %v19865_v59  ;;  %v12605_v60 = vand.u32 4294901760, %v12604_v51 }
 0x43f   : > { %12524 = vmatprep.subr.mxu0 %v19928_v26  ;;  %18027 = vmatprep.mubr.msk.f32.mxu1 %vm18350_vm0, %v19437_v55 }
 0x440   : > { %18030 = vmatprep.subr.mxu1 %v19437_v55  ;;  %12051 = vmatprep.mubr.f32.mxu0 %v19437_v55 }
 0x441   : > { %18028 = vmatmul.mubr.f32.vlgmr.msra.gmra.mrb[190].mxu1 %v19859_v16 }
 0x442   : > { %18031 = vmatpush3.msra.mxu1 %v19925_v1  ;;  %18032 = vmatprep.mubr.msk.f32.mxu1 %vm18350_vm0, %v19437_v55 }
 0x443   : > { %18035 = vmatprep.subr.mxu1 %v19437_v55 }
 0x445   : > { %12053 = vmatmul.mubr.f32.vlgmr.msra.gmra.mrb[2].mxu0 %v19633_v38  ;;  %18033 = vmatmul.mubr.f32.vlgmr.msra.gmra.mrb[192].mxu1 %v19980_v32  ;;  %v20004_v38 = vpop.permute.xlu0 %16225 }
 0x446   : > { %12526 = vmatpush1.msra.mxu0 %v19959_v61  ;;  %18036 = vmatpush3.msra.mxu1 %v15854_v42  ;;  %v20014_v9 = vand.u32 4294901760, %v20004_v38 }
 0x447   : > { %12606 = vmatprep.subr.mxu0 %v12605_v60  ;;  %18037 = vmatprep.mubr.msk.f32.mxu1 %vm18350_vm0, %v19437_v55 }
 0x448   : > { %18040 = vmatprep.subr.mxu1 %v19437_v55  ;;  %12589 = vmatprep.mubr.f32.mxu0 %v19437_v55  ;;  %v16778_v3 = vsub.f32 %v20004_v38, %v20014_v9 }
 0x449   : > { %18038 = vmatmul.mubr.f32.vlgmr.msra.gmra.mrb[194].mxu1 %v19919_v47 }
 0x44a   : > { %18041 = vmatpush3.msra.mxu1 %v19943_v57  ;;  %18042 = vmatprep.mubr.msk.f32.mxu1 %vm18350_vm0, %v19437_v55  ;;  %v16779_v21 = vand.u32 4294901760, %v16778_v3 }
 0x44b   : > { %18045 = vmatprep.subr.mxu1 %v19437_v55 }
 0x44c   : > { %v16780_v49 = vsub.f32 %v16778_v3, %v16779_v21 }
 0x44d   : > { %12595 = vmatmul.mubr.f32.vlgmr.msra.gmra.mrb[2].mxu0 %v19757_v53  ;;  %18043 = vmatmul.mubr.f32.vlgmr.msra.gmra.mrb[196].mxu1 %v19933_v45  ;;  %v20031_v53 = vand.u32 4294901760, %v20019_v27 }
 0x44e   : > { %12612 = vmatpush1.msra.mxu0 %v12611_v29  ;;  %18046 = vmatpush3.msra.mxu1 %v19925_v1  ;;  %v16781_v59 = vand.u32 4294901760, %v16780_v49 }
 0x44f   : > { %12685 = vmatprep.subr.mxu0 %v19949_v37  ;;  %18047 = vmatprep.mubr.msk.f32.mxu1 %vm18350_vm0, %v19437_v55  ;;  %v16305_v22 = vsub.f32 %v20019_v27, %v20031_v53 }
 0x450   : > { %18050 = vmatprep.subr.mxu1 %v19437_v55  ;;  %12675 = vmatprep.mubr.f32.mxu0 %v19437_v55 }
 0x451   : > { %18048 = vmatmul.mubr.f32.vlgmr.msra.gmra.mrb[198].mxu1 %v19953_v2  ;;  %v20048_v19 = vand.u32 4294901760, %v16305_v22 }
 0x452   : > { %18051 = vmatpush3.msra.mxu1 %v15852_v24  ;;  %18052 = vmatprep.mubr.msk.f32.mxu1 %vm18350_vm0, %v19437_v55 }
 0x453   : > { %18055 = vmatprep.subr.mxu1 %v19437_v55 }
 0x455   : > { %12677 = vmatmul.mubr.f32.vlgmr.msra.gmra.mrb[2].mxu0 %v19719_v12  ;;  %18053 = vmatmul.mubr.f32.vlgmr.msra.gmra.mrb[200].mxu1 %v19919_v47 }
 0x456   : > { %12688 = vmatpush1.msra.mxu0 %v19974_v31  ;;  %18056 = vmatpush3.msra.mxu1 %v19925_v1 }
 0x457   : > { %12761 = vmatprep.subr.mxu0 %v19928_v26  ;;  %18057 = vmatprep.mubr.msk.f32.mxu1 %vm18350_vm0, %v19437_v55 }
 0x458   : > { %18060 = vmatprep.subr.mxu1 %v19437_v55  ;;  %12751 = vmatprep.mubr.f32.mxu0 %v19437_v55 }
 0x459   : > { %18058 = vmatmul.mubr.f32.vlgmr.msra.gmra.mrb[202].mxu1 %v19919_v47 }
 0x45a   : > { %18061 = vmatpush3.msra.mxu1 %v20014_v9  ;;  %18062 = vmatprep.mubr.msk.f32.mxu1 %vm18350_vm0, %v19437_v55 }
 0x45b   : > { %18065 = vmatprep.subr.mxu1 %v19437_v55 }
 0x45d   : > { %12754 = vmatmul.mubr.f32.vlgmr.msra.gmra.mrb[2].mxu0 %v19729_v17  ;;  %18063 = vmatmul.mubr.f32.vlgmr.msra.gmra.mrb[204].mxu1 %v20048_v19  ;;  %v13443_v17 = vsel %vm409_vm2, %v19446_v58, %v19475_v20  ;;  %v13442_v20 = vsel %vm409_vm2, %v19458_v34, %v19446_v58 }
 0x45e   : > { %12763 = vmatpush1.msra.mxu0 %v19959_v61  ;;  %18066 = vmatpush3.msra.mxu1 %v16781_v59  ;;  %v20070_v23 = vand.u32 4294901760, %v13443_v17  ;;  %v20090_v33 = vand.u32 4294901760, %v13442_v20 }
 0x45f   : > { %12839 = vmatprep.subr.mxu0 %v12603_v0  ;;  %18067 = vmatprep.mubr.msk.f32.mxu1 %vm18350_vm0, %v19437_v55 }
 0x460   : > { %18070 = vmatprep.subr.mxu1 %v19437_v55  ;;  %12826 = vmatprep.mubr.f32.mxu0 %v19437_v55  ;;  %v13535_v58 = vsub.f32 %v13442_v20, %v20090_v33 }
 0x461   : > { %18068 = vmatmul.mubr.f32.vlgmr.msra.gmra.mrb[206].mxu1 %v20007_v39 }
 0x462   : > { %18071 = vmatpush3.msra.mxu1 %v16778_v3  ;;  %18072 = vmatprep.mubr.msk.f32.mxu1 %vm18350_vm0, %v19437_v55  ;;  %v13536_v56 = vand.u32 4294901760, %v13535_v58 }
 0x463   : > { %18075 = vmatprep.subr.mxu1 %v19437_v55 }
 0x464   : > { %v13537_v57 = vsub.f32 %v13535_v58, %v13536_v56 }
 0x465   : > { %12830 = vmatmul.mubr.f32.vlgmr.msra.gmra.mrb[2].mxu0 %v19740_v8  ;;  %18073 = vmatmul.mubr.f32.vlgmr.msra.gmra.mrb[208].mxu1 %v20019_v27  ;;  %v13529_v8 = vsub.f32 %v13443_v17, %v20070_v23  ;;  %v20116_v17 = vand.u32 4294901760, %v19521_v62 }
 0x466   : > { %12843 = vmatpush1.msra.mxu0 %v12609_v40  ;;  %18076 = vmatpush3.msra.mxu1 %v20014_v9  ;;  %v13538_v25 = vand.u32 4294901760, %v13537_v57 }
 0x467   : > { %12915 = vmatprep.subr.mxu0 %v19928_v26  ;;  %18077 = vmatprep.mubr.msk.f32.mxu1 %vm18350_vm0, %v19437_v55  ;;  %v13530_v52 = vand.u32 4294901760, %v13529_v8 }
 0x468   : > { %18080 = vmatprep.subr.mxu1 %v19437_v55  ;;  %12906 = vmatprep.mubr.f32.mxu0 %v19437_v55 }
 0x469   : > { %18078 = vmatmul.mubr.f32.vlgmr.msra.gmra.mrb[210].mxu1 %v20031_v53  ;;  %v13531_v34 = vsub.f32 %v13529_v8, %v13530_v52 }
 0x46a   : > { %18081 = vmatpush3.msra.mxu1 %v16779_v21  ;;  %18082 = vmatprep.mubr.msk.f32.mxu1 %vm18350_vm0, %v19437_v55 }
 0x46b   : > { %18085 = vmatprep.subr.mxu1 %v19437_v55  ;;  %v13532_v15 = vand.u32 4294901760, %v13531_v34 }
 0x46c   : > { %v9350_v7 = vpop.f32.mrb[108].mxu1 }
 0x46d   : > { %12908 = vmatmul.mubr.f32.vlgmr.msra.gmra.mrb[2].mxu0 %v19719_v12  ;;  %18083 = vmatmul.mubr.f32.vlgmr.msra.gmra.mrb[212].mxu1 %v20007_v39  ;;  %v17824_v11 = vpop.f32.mrb[109].mxu1 }
 0x46e   : > { %12917 = vmatpush1.msra.mxu0 %v19959_v61  ;;  %18086 = vmatpush3.msra.mxu1 %v20014_v9 }
 0x46f   : > { %13451 = vmatprep.subr.mxu0 %v20070_v23  ;;  %18087 = vmatprep.mubr.msk.f32.mxu1 %vm18350_vm0, %v19437_v55  ;;  %vm17175_vm0 = vcmask 31744  }
 0x470   : > { %12980 = vmatprep.mubr.f32.mxu0 %v19437_v55 }
 0x471   : > { %18088 = vmatmul.mubr.f32.vlgmr.msra.gmra.mrb[214].mxu1 %v20007_v39 }
 0x474   : > { %v9426_v10 = vpop.f32.mrb[110].mxu1 }
 0x475   : > { %12982 = vmatmul.mubr.f32.vlgmr.msra.gmra.mrb[2].mxu0 %v19719_v12  ;;  %v9427_v1 = vadd.f32 %v9426_v10, %v9350_v7  ;;  %v17829_v26 = vpop.f32.mrb[111].mxu1  ;;  %v20106_v12 = vld [vmem:[#allocation2] sm:$0xff]  ;;  %v14461_v7 = vsub.f32 %v19521_v62, %v20116_v17 }
 0x476   : > { %13453 = vmatpush1.msra.mxu0 %v20090_v33  ;;  %13516 = vmatprep.mubr.f32.mxu0 %v19437_v55 }
 0x477   : > { %13533 = vmatprep.subr.mxu0 %v13532_v15 }
 0x478   : > { %v9500_v37 = vpop.f32.mrb[112].mxu1 }
 0x479   : > { %v9501_v61 = vadd.f32 %v9500_v37, %v9427_v1  ;;  %v17834_v24 = vpop.f32.mrb[113].mxu1 }
 0x47c   : > { %v9574_v0 = vpop.f32.mrb[114].mxu1 }
 0x47d   : > { %13522 = vmatmul.mubr.f32.vlgmr.msra.gmra.mrb[2].mxu0 %v19834_v18  ;;  %v9575_v31 = vadd.f32 %v9574_v0, %v9501_v61  ;;  %v17839_v35 = vpop.f32.mrb[115].mxu1 }
 0x47e   : > { %13539 = vmatpush1.msra.mxu0 %v13538_v25  ;;  %13602 = vmatprep.mubr.f32.mxu0 %v20106_v12 }
 0x47f   : > { %13612 = vmatprep.subr.mxu0 %v13529_v8 }
 0x480   : > { %v9648_v51 = vpop.f32.mrb[116].mxu1 }
 0x481   : > { %v9649_v36 = vadd.f32 %v9648_v51, %v9575_v31  ;;  %v17844_v55 = vpop.f32.mrb[117].mxu1 }
 0x484   : > { %v9720_v40 = vpop.f32.mrb[118].mxu1 }
 0x485   : > { %13604 = vmatmul.mubr.f32.vlgmr.msra.gmra.mrb[2].mxu0 %v19777_v30  ;;  %v9721_v42 = vadd.f32 %v9720_v40, %v9649_v36  ;;  %v17849_v60 = vpop.f32.mrb[119].mxu1 }
 0x486   : > { %13615 = vmatpush1.msra.mxu0 %v13535_v58  ;;  %13678 = vmatprep.mubr.f32.mxu0 %v20106_v12  ;;  %v20124_v58 = vand.u32 4294901760, %v19483_v54 }
 0x487   : > { %13688 = vmatprep.subr.mxu0 %v20070_v23 }
 0x488   : > { %v10279_v18 = vpop.f32.mrb[120].mxu1  ;;  %v14467_v62 = vsub.f32 %v19483_v54, %v20124_v58 }
 0x489   : > { %v10280_v43 = vadd.f32 %v10279_v18, %v9721_v42  ;;  %v17854_v46 = vpop.f32.mrb[121].mxu1 }
 0x48a   : > { %v14468_v26 = vand.u32 4294901760, %v14467_v62 }
 0x48c   : > { %v10355_v9 = vpop.f32.mrb[122].mxu1 }
 0x48d   : > { %13681 = vmatmul.mubr.f32.vlgmr.msra.gmra.mrb[2].mxu0 %v19791_v14  ;;  %v10356_v29 = vadd.f32 %v10355_v9, %v10280_v43  ;;  %v17859_v3 = vpop.f32.mrb[123].mxu1 }
 0x48e   : > { %13690 = vmatpush1.msra.mxu0 %v20090_v33  ;;  %13753 = vmatprep.mubr.f32.mxu0 %v20106_v12 }
 0x48f   : > { %13766 = vmatprep.subr.mxu0 %v13530_v52 }
 0x490   : > { %v10429_v21 = vpop.f32.mrb[124].mxu1 }
 0x491   : > { %v10430_v22 = vadd.f32 %v10429_v21, %v10356_v29  ;;  %v17864_v49 = vpop.f32.mrb[125].mxu1 }
 0x494   : > { %v10503_v59 = vpop.f32.mrb[126].mxu1 }
 0x495   : > { %13757 = vmatmul.mubr.f32.vlgmr.msra.gmra.mrb[2].mxu0 %v19805_v6  ;;  %v10504_v20 = vadd.f32 %v10503_v59, %v10430_v22  ;;  %v17869_v8 = vpop.f32.mrb[127].mxu1  ;;  %v14462_v6 = vand.u32 4294901760, %v14461_v7 }
 0x496   : > { %13770 = vmatpush1.msra.mxu0 %v13536_v56  ;;  %13833 = vmatprep.mubr.f32.mxu0 %v20106_v12 }
 0x497   : > { %13842 = vmatprep.subr.mxu0 %v20070_v23  ;;  %v14463_v56 = vsub.f32 %v14461_v7, %v14462_v6 }
 0x498   : > { %v10577_v14 = vpop.f32.mrb[128].mxu1 }
 0x499   : > { %v10578_v52 = vadd.f32 %v10577_v14, %v10504_v20  ;;  %v17874_v11 = vpop.f32.mrb[129].mxu1  ;;  %v14464_v37 = vand.u32 4294901760, %v14463_v56  ;;  %v20146_v20 = vand.u32 4294901760, %v19560_v63 }
 0x49c   : > { %v10649_v34 = vpop.f32.mrb[130].mxu1 }
 0x49d   : > { %13835 = vmatmul.mubr.f32.vlgmr.msra.gmra.mrb[2].mxu0 %v19777_v30  ;;  %v10650_v10 = vadd.f32 %v10649_v34, %v10578_v52  ;;  %v17879_v15 = vpop.f32.mrb[131].mxu1  ;;  %v20154_v34 = vand.u32 4294901760, %v19524_v4 }
 0x49e   : > { %13844 = vmatpush1.msra.mxu0 %v20090_v33  ;;  %13907 = vmatprep.mubr.f32.mxu0 %v20106_v12  ;;  %v14469_v33 = vsub.f32 %v14467_v62, %v14468_v26 }
 0x49f   : > { %14383 = vmatprep.subr.mxu0 %v20116_v17 }
 0x4a0   : > { %v11210_v23 = vpop.f32.mrb[132].mxu1  ;;  %v14470_v54 = vand.u32 4294901760, %v14469_v33 }
 0x4a1   : > { %v17884_v1 = vpop.f32.mrb[133].mxu1 }
 0x4a4   : > { %v11286_v57 = vpop.f32.mrb[134].mxu1 }
 0x4a5   : > { %13909 = vmatmul.mubr.f32.vlgmr.msra.gmra.mrb[2].mxu0 %v19777_v30  ;;  %v11287_v61 = vadd.f32 %v11286_v57, %v11210_v23  ;;  %v17889_v24 = vpop.f32.mrb[135].mxu1 }
 0x4a6   : > { %14385 = vmatpush1.msra.mxu0 %v20124_v58  ;;  %14448 = vmatprep.mubr.f32.mxu0 %v20106_v12 }
 0x4a7   : > { %14465 = vmatprep.subr.mxu0 %v14464_v37 }
 0x4a8   : > { %v11360_v25 = vpop.f32.mrb[136].mxu1 }
 0x4a9   : > { %v11361_v0 = vadd.f32 %v11360_v25, %v11287_v61  ;;  %v17894_v31 = vpop.f32.mrb[137].mxu1 }
 0x4ac   : > { %v11434_v35 = vpop.f32.mrb[138].mxu1 }
 0x4ad   : > { %14454 = vmatmul.mubr.f32.vlgmr.msra.gmra.mrb[2].mxu0 %v19899_v41  ;;  %v11435_v51 = vadd.f32 %v11434_v35, %v11361_v0  ;;  %v17899_v36 = vpop.f32.mrb[139].mxu1 }
 0x4ae   : > { %14471 = vmatpush1.msra.mxu0 %v14470_v54  ;;  %14534 = vmatprep.mubr.f32.mxu0 %v20106_v12 }
 0x4af   : > { %14544 = vmatprep.subr.mxu0 %v14461_v7  ;;  %v15387_v7 = vsub.f32 %v19560_v63, %v20146_v20  ;;  %v15393_v63 = vsub.f32 %v19524_v4, %v20154_v34 }
 0x4b0   : > { %v11508_v30 = vpop.f32.mrb[140].mxu1 }
 0x4b1   : > { %v11509_v55 = vadd.f32 %v11508_v30, %v11435_v51  ;;  %v17904_v40 = vpop.f32.mrb[141].mxu1  ;;  %v15394_v1 = vand.u32 4294901760, %v15393_v63 }
 0x4b4   : > { %v11580_v42 = vpop.f32.mrb[142].mxu1 }
 0x4b5   : > { %14536 = vmatmul.mubr.f32.vlgmr.msra.gmra.mrb[2].mxu0 %v19859_v16  ;;  %v11581_v60 = vadd.f32 %v11580_v42, %v11509_v55  ;;  %v17909_v18 = vpop.f32.mrb[143].mxu1 }
 0x4b6   : > { %14547 = vmatpush1.msra.mxu0 %v14467_v62  ;;  %14610 = vmatprep.mubr.f32.mxu0 %v20106_v12 }
 0x4b7   : > { %14620 = vmatprep.subr.mxu0 %v20116_v17  ;;  %v20140_v41 = vadd.f32 %v11581_v60, %v10650_v10 }
 0x4b8   : > { %v12131_v43 = vpop.f32.mrb[144].mxu1 }
 0x4b9   : > { %v17914_v46 = vpop.f32.mrb[145].mxu1 }
 0x4bc   : > { %v12207_v9 = vpop.f32.mrb[146].mxu1 }
 0x4bd   : > { %14613 = vmatmul.mubr.f32.vlgmr.msra.gmra.mrb[2].mxu0 %v19870_v13  ;;  %v12208_v29 = vadd.f32 %v12207_v9, %v12131_v43  ;;  %v17919_v3 = vpop.f32.mrb[147].mxu1  ;;  %v16224_v43 = vpop.permute.xlu1 %16223 }
 0x4be   : > { %14622 = vmatpush1.msra.mxu0 %v20124_v58  ;;  %14685 = vmatprep.mubr.f32.mxu0 %v20106_v12  ;;  %v16228_v3 = vsel %vm3185_vm6, %v16224_v43, %v20004_v38 }
 0x4bf   : > { %14698 = vmatprep.subr.mxu0 %v14462_v6 }
 0x4c0   : > { %v12281_v21 = vpop.f32.mrb[148].mxu1 }
 0x4c1   : > { %v12282_v22 = vadd.f32 %v12281_v21, %v12208_v29  ;;  %v17924_v49 = vpop.f32.mrb[149].mxu1 }
 0x4c4   : > { %v12355_v59 = vpop.f32.mrb[150].mxu1 }
 0x4c5   : > { %14689 = vmatmul.mubr.f32.vlgmr.msra.gmra.mrb[2].mxu0 %v19882_v48  ;;  %v12356_v8 = vadd.f32 %v12355_v59, %v12282_v22  ;;  %v17929_v14 = vpop.f32.mrb[151].mxu1  ;;  %v15388_v48 = vand.u32 4294901760, %v15387_v7  ;;  %v20175_v22 = vand.u32 4294901760, %v16228_v3  ;;  %v16222_v59 = vpop.permute.xlu1 %16221 }
 0x4c6   : > { %14702 = vmatpush1.msra.mxu0 %v14468_v26  ;;  %14765 = vmatprep.mubr.f32.mxu0 %v20106_v12 }
 0x4c7   : > { %14774 = vmatprep.subr.mxu0 %v20116_v17  ;;  %v15389_v62 = vsub.f32 %v15387_v7, %v15388_v48  ;;  %v16314_v14 = vsub.f32 %v16228_v3, %v20175_v22 }
 0x4c8   : > { %v12429_v13 = vpop.f32.mrb[152].mxu1 }
 0x4c9   : > { %v12430_v52 = vadd.f32 %v12429_v13, %v12356_v8  ;;  %v17934_v11 = vpop.f32.mrb[153].mxu1  ;;  %v15390_v57 = vand.u32 4294901760, %v15389_v62  ;;  %v16227_v13 = vsel %vm3185_vm6, %v16222_v59, %v16224_v43 }
 0x4cc   : > { %v12501_v6 = vpop.f32.mrb[154].mxu1 }
 0x4cd   : > { %14767 = vmatmul.mubr.f32.vlgmr.msra.gmra.mrb[2].mxu0 %v19859_v16  ;;  %v12502_v10 = vadd.f32 %v12501_v6, %v12430_v52  ;;  %v17939_v15 = vpop.f32.mrb[155].mxu1  ;;  %v20182_v52 = vand.u32 4294901760, %v16227_v13 }
 0x4ce   : > { %14776 = vmatpush1.msra.mxu0 %v20124_v58  ;;  %14839 = vmatprep.mubr.f32.mxu0 %v20106_v12  ;;  %v15395_v58 = vsub.f32 %v15393_v63, %v15394_v1 }
 0x4cf   : > { %15309 = vmatprep.subr.mxu0 %v20146_v20 }
 0x4d0   : > { %v13060_v17 = vpop.f32.mrb[156].mxu1  ;;  %v15396_v25 = vand.u32 4294901760, %v15395_v58 }
 0x4d1   : > { %v13061_v23 = vadd.f32 %v13060_v17, %v12502_v10  ;;  %v17944_v56 = vpop.f32.mrb[157].mxu1  ;;  %v16320_v10 = vsub.f32 %v16227_v13, %v20182_v52 }
 0x4d4   : > { %v13136_v26 = vpop.f32.mrb[158].mxu1 }
 0x4d5   : > { %14841 = vmatmul.mubr.f32.vlgmr.msra.gmra.mrb[2].mxu0 %v19859_v16  ;;  %v13137_v37 = vadd.f32 %v13136_v26, %v13061_v23  ;;  %v17949_v61 = vpop.f32.mrb[159].mxu1  ;;  %v16321_v23 = vand.u32 4294901760, %v16320_v10 }
 0x4d6   : > { %15311 = vmatpush1.msra.mxu0 %v20154_v34  ;;  %15374 = vmatprep.mubr.f32.mxu0 %v20106_v12 }
 0x4d7   : > { %15391 = vmatprep.subr.mxu0 %v15390_v57  ;;  %v16322_v57 = vsub.f32 %v16320_v10, %v16321_v23 }
 0x4d8   : > { %v13210_v24 = vpop.f32.mrb[160].mxu1 }
 0x4d9   : > { %v13211_v33 = vadd.f32 %v13210_v24, %v13137_v37  ;;  %v17954_v4 = vpop.f32.mrb[161].mxu1  ;;  %v16323_v24 = vand.u32 4294901760, %v16322_v57 }
 0x4dc   : > { %v13284_v0 = vpop.f32.mrb[162].mxu1 }
 0x4dd   : > { %15380 = vmatmul.mubr.f32.vlgmr.msra.gmra.mrb[2].mxu0 %v19980_v32  ;;  %v13285_v31 = vadd.f32 %v13284_v0, %v13211_v33  ;;  %v17959_v54 = vpop.f32.mrb[163].mxu1 }
 0x4de   : > { %15397 = vmatpush1.msra.mxu0 %v15396_v25  ;;  %15460 = vmatprep.mubr.f32.mxu0 %v20106_v12 }
 0x4df   : > { %15470 = vmatprep.subr.mxu0 %v15387_v7 }
 0x4e0   : > { %v13358_v16 = vpop.f32.mrb[164].mxu1 }
 0x4e1   : > { %v13359_v35 = vadd.f32 %v13358_v16, %v13285_v31  ;;  %v17964_v51 = vpop.f32.mrb[165].mxu1 }
 0x4e4   : > { %v13430_v36 = vpop.f32.mrb[166].mxu1 }
 0x4e5   : > { %15462 = vmatmul.mubr.f32.vlgmr.msra.gmra.mrb[2].mxu0 %v19919_v47  ;;  %v13431_v30 = vadd.f32 %v13430_v36, %v13359_v35  ;;  %v17969_v55 = vpop.f32.mrb[167].mxu1 }
 0x4e6   : > { %15473 = vmatpush1.msra.mxu0 %v15393_v63  ;;  %15536 = vmatprep.mubr.f32.mxu0 %v20106_v12 }
 0x4e7   : > { %15546 = vmatprep.subr.mxu0 %v20146_v20 }
 0x4e8   : > { %v13987_v32 = vpop.f32.mrb[168].mxu1 }
 0x4e9   : > { %v17974_v40 = vpop.f32.mrb[169].mxu1 }
 0x4ec   : > { %v14063_v42 = vpop.f32.mrb[170].mxu1 }
 0x4ed   : > { %15539 = vmatmul.mubr.f32.vlgmr.msra.gmra.mrb[2].mxu0 %v19933_v45  ;;  %v14064_v60 = vadd.f32 %v14063_v42, %v13987_v32  ;;  %v17979_v18 = vpop.f32.mrb[171].mxu1 }
 0x4ee   : > { %15548 = vmatpush1.msra.mxu0 %v20154_v34  ;;  %15611 = vmatprep.mubr.f32.mxu0 %v20106_v12 }
 0x4ef   : > { %15624 = vmatprep.subr.mxu0 %v15388_v48 }
 0x4f0   : > { %v14137_v46 = vpop.f32.mrb[172].mxu1 }
 0x4f1   : > { %v14138_v9 = vadd.f32 %v14137_v46, %v14064_v60  ;;  %v17984_v29 = vpop.f32.mrb[173].mxu1 }
 0x4f4   : > { %v14211_v21 = vpop.f32.mrb[174].mxu1 }
 0x4f5   : > { %15615 = vmatmul.mubr.f32.vlgmr.msra.gmra.mrb[2].mxu0 %v19953_v2  ;;  %v14212_v45 = vadd.f32 %v14211_v21, %v14138_v9  ;;  %v17989_v49 = vpop.f32.mrb[175].mxu1  ;;  %v16315_v2 = vand.u32 4294901760, %v16314_v14 }
 0x4f6   : > { %15628 = vmatpush1.msra.mxu0 %v15394_v1  ;;  %15691 = vmatprep.mubr.f32.mxu0 %v20106_v12 }
 0x4f7   : > { %15700 = vmatprep.subr.mxu0 %v20146_v20  ;;  %v16316_v63 = vsub.f32 %v16314_v14, %v16315_v2 }
 0x4f8   : > { %v14285_v8 = vpop.f32.mrb[176].mxu1 }
 0x4f9   : > { %v14286_v7 = vadd.f32 %v14285_v8, %v14212_v45  ;;  %v17994_v38 = vpop.f32.mrb[177].mxu1  ;;  %v16317_v1 = vand.u32 4294901760, %v16316_v63  ;;  %v17159_v63 = vpop.permute.xlu0 %17158 }
 0x4fc   : > { %v14357_v11 = vpop.f32.mrb[178].mxu1 }
 0x4fd   : > { %15693 = vmatmul.mubr.f32.vlgmr.msra.gmra.mrb[2].mxu0 %v19919_v47  ;;  %v14358_v6 = vadd.f32 %v14357_v11, %v14286_v7  ;;  %v17999_v48 = vpop.f32.mrb[179].mxu1 }
 0x4fe   : > { %15702 = vmatpush1.msra.mxu0 %v20154_v34  ;;  %15765 = vmatprep.mubr.f32.mxu0 %v20106_v12 }
 0x4ff   : > { %16236 = vmatprep.subr.mxu0 %v20175_v22  ;;  %v14363_v20 = vadd.f32 %v14358_v6, %v13431_v30 }
 0x500   : > { %v14919_v15 = vpop.f32.mrb[180].mxu1 }
 0x501   : > { %v20190_v17 = vadd.f32 %v14363_v20, %v20140_v41  ;;  %v18004_v62 = vpop.f32.mrb[181].mxu1 }
 0x504   : > { %v14995_v56 = vpop.f32.mrb[182].mxu1 }
 0x505   : > { %15767 = vmatmul.mubr.f32.vlgmr.msra.gmra.mrb[2].mxu0 %v19919_v47  ;;  %v14996_v26 = vadd.f32 %v14995_v56, %v14919_v15  ;;  %v18009_v34 = vpop.f32.mrb[183].mxu1 }
 0x506   : > { %16238 = vmatpush1.msra.mxu0 %v20182_v52  ;;  %16301 = vmatprep.mubr.f32.mxu0 %v20106_v12 }
 0x507   : > { %16318 = vmatprep.subr.mxu0 %v16317_v1 }
 0x508   : > { %v15069_v37 = vpop.f32.mrb[184].mxu1 }
 0x509   : > { %v15070_v61 = vadd.f32 %v15069_v37, %v14996_v26  ;;  %v18014_v58 = vpop.f32.mrb[185].mxu1 }
 0x50c   : > { %v15143_v41 = vpop.f32.mrb[186].mxu1 }
 0x50d   : > { %16307 = vmatmul.mubr.f32.vlgmr.msra.gmra.mrb[2].mxu0 %v20048_v19  ;;  %v15144_v33 = vadd.f32 %v15143_v41, %v15070_v61  ;;  %v18019_v4 = vpop.f32.mrb[187].mxu1 }
 0x50e   : > { %16324 = vmatpush1.msra.mxu0 %v16323_v24  ;;  %16387 = vmatprep.mubr.f32.mxu0 %v20106_v12 }
 0x50f   : > { %16397 = vmatprep.subr.mxu0 %v16314_v14 }
 0x510   : > { %v15217_v47 = vpop.f32.mrb[188].mxu1 }
 0x511   : > { %v15218_v25 = vadd.f32 %v15217_v47, %v15144_v33  ;;  %v18024_v0 = vpop.f32.mrb[189].mxu1 }
 0x512   : > { %v17183_v0 = vld [vmem:[%s20258_s6] sm:$0x1] }
 0x514   : > { %v15289_v31 = vpop.f32.mrb[190].mxu1 }
 0x515   : > { %16389 = vmatmul.mubr.f32.vlgmr.msra.gmra.mrb[2].mxu0 %v20007_v39  ;;  %v15290_v54 = vadd.f32 %v15289_v31, %v15218_v25  ;;  %v18029_v16 = vpop.f32.mrb[191].mxu1  ;;  %v17190_v31 = vshrl.u32 %v333_v5, 7 }
 0x516   : > { %16400 = vmatpush1.msra.mxu0 %v16320_v10  ;;  %16463 = vmatprep.mubr.f32.mxu0 %v20106_v12 }
 0x517   : > { %16473 = vmatprep.subr.mxu0 %v20175_v22 }
 0x518   : > { %v15845_v19 = vpop.f32.mrb[192].mxu1 }
 0x519   : > { %v15846_v35 = vadd.f32 %v15845_v19, %v15290_v54  ;;  %v18034_v51 = vpop.f32.mrb[193].mxu1  ;;  %v17191_v19 = vsub.s32 0, %v17190_v31 }
 0x51c   : > { %v15921_v36 = vpop.f32.mrb[194].mxu1 }
 0x51d   : > { %16466 = vmatmul.mubr.f32.vlgmr.msra.gmra.mrb[2].mxu0 %v20019_v27  ;;  %v15922_v30 = vadd.f32 %v15921_v36, %v15846_v35  ;;  %v18039_v55 = vpop.f32.mrb[195].mxu1  ;;  %v17188_v36 = vld [vmem:[%s20259_s7] sm:$0xff] }
 0x51e   : > { %16475 = vmatpush1.msra.mxu0 %v20182_v52  ;;  %16538 = vmatprep.mubr.f32.mxu0 %v20106_v12 }
 0x51f   : > { %16551 = vmatprep.subr.mxu0 %v16315_v2 }
 0x520   : > { %v15995_v32 = vpop.f32.mrb[196].mxu1 }
 0x521   : > { %v15996_v40 = vadd.f32 %v15995_v32, %v15922_v30  ;;  %v18044_v42 = vpop.f32.mrb[197].mxu1 }
 0x524   : > { %v16069_v60 = vpop.f32.mrb[198].mxu1 }
 0x525   : > { %16542 = vmatmul.mubr.f32.vlgmr.msra.gmra.mrb[2].mxu0 %v20031_v53  ;;  %v16070_v18 = vadd.f32 %v16069_v60, %v15996_v40  ;;  %v18049_v43 = vpop.f32.mrb[199].mxu1  ;;  %v17197_v40 = vld [vmem:[%s20260_s8] sm:$0xff] }
 0x526   : > { %16555 = vmatpush1.msra.mxu0 %v16321_v23  ;;  %16618 = vmatprep.mubr.f32.mxu0 %v20106_v12 }
 0x527   : > { %16627 = vmatprep.subr.mxu0 %v20175_v22 }
 0x528   : > { %v16143_v27 = vpop.f32.mrb[200].mxu1 }
 0x529   : > { %v16144_v46 = vadd.f32 %v16143_v27, %v16070_v18  ;;  %v18054_v9 = vpop.f32.mrb[201].mxu1 }
 0x52c   : > { %v16215_v29 = vpop.f32.mrb[202].mxu1 }
 0x52d   : > { %16620 = vmatmul.mubr.f32.vlgmr.msra.gmra.mrb[2].mxu0 %v20007_v39  ;;  %v16216_v3 = vadd.f32 %v16215_v29, %v16144_v46  ;;  %v18059_v21 = vpop.f32.mrb[203].mxu1 }
 0x52e   : > { %16629 = vmatpush1.msra.mxu0 %v20182_v52  ;;  %16692 = vmatprep.mubr.f32.mxu0 %v20106_v12  ;;  %v17205_v21 = vld [vmem:[%s18437_s14] sm:$0xff] }
 0x530   : > { %v16772_v53 = vpop.f32.mrb[204].mxu1 }
 0x531   : > { %v18064_v45 = vpop.f32.mrb[205].mxu1 }
 0x534   : > { %v16848_v49 = vpop.f32.mrb[206].mxu1 }
 0x535   : > { %16694 = vmatmul.mubr.f32.vlgmr.msra.gmra.mrb[2].mxu0 %v20007_v39  ;;  %v16849_v59 = vadd.f32 %v16848_v49, %v16772_v53  ;;  %v18069_v8 = vpop.f32.mrb[207].mxu1  ;;  %v17206_v49 = vld [vmem:[%s18437_s14 + $0x8] sm:$0xff] }
 0x538   : > { %v16922_v22 = vpop.f32.mrb[208].mxu1 }
 0x539   : > { %v16923_v14 = vadd.f32 %v16922_v22, %v16849_v59  ;;  %v18074_v13 = vpop.f32.mrb[209].mxu1  ;;  %v17207_v59 = vld [vmem:[%s18437_s14 + $0x10] sm:$0xff] }
 0x53c   : > { %v16996_v7 = vpop.f32.mrb[210].mxu1 }
 0x53d   : > { %v16997_v38 = vadd.f32 %v16996_v7, %v16923_v14  ;;  %v18079_v11 = vpop.f32.mrb[211].mxu1 }
 0x540   : > { %v17070_v2 = vpop.f32.mrb[212].mxu1 }
 0x541   : > { %v17071_v6 = vadd.f32 %v17070_v2, %v16997_v38  ;;  %v18084_v48 = vpop.f32.mrb[213].mxu1 }
 0x544   : > { %v17142_v20 = vpop.f32.mrb[214].mxu1 }
 0x545   : > { %v17143_v52 = vadd.f32 %v17142_v20, %v17071_v6  ;;  %v18089_v10 = vpop.f32.mrb[215].mxu1 }
 0x547   : > { %v17148_v12 = vadd.f32 %v17143_v52, %v16216_v3 }
 0x549   : > { %v17154_v15 = vadd.f32 %v20190_v17, %v17148_v12  ;;  %v17173_v17 = vld [vmem:[%s20257_s5] sm:$0xff] }
 0x54b   : > { %v17163_v62 = vadd.f32 %v17159_v63, %v17154_v15 }
 0x54d   : > { %v17166_v34 = vmul.f32 %v19311_v50, %v17163_v62 }
 0x54f   : > { %v17168_v61 = vsel %vm8782_vm15, %v17166_v34, 0.0 }
 0x608   : > { %v16695_v39 = vpop.f32.mrb[2].mxu0 }
 0x609   : > { %v17161_v23 = vadd.f32 %v17159_v63, %v16695_v39  ;;  %v16697_v56 = vpop.f32.mrb[3].mxu0 }
 0x60a   : > { %v17162_v1 = vadd.f32 %v17159_v63, %v16697_v56 }
 0x60b   : > { %v17164_v26 = vmul.f32 %v19326_v28, %v17161_v23 }
 0x60c   : > { %v17165_v57 = vmul.f32 %v19329_v44, %v17162_v1 }
 0x60e   : > { %v17167_v37 = vadd.f32 %v17165_v57, %v17164_v26 }
 0x610   : > { %v17169_v58 = vadd.f32 %v17168_v61, %v17167_v37 }
 0x612   : > { %17170 = vadd.xlane.f32.xlu1 %v17169_v58 }
 0x69f   : > { %v17171_v24 = vpop.xlane.xlu1 %17170 }
 0x6a0   : > { %v17172_v41 = vmul.f32 0.00390625, %v17171_v24 }
 0x6a2   : > { %v17174_v33 = vmul.f32 %v17173_v17, %v17172_v41 }
 0x6a4   : > { %v17176_v4 = vsel %vm17175_vm0, %v17174_v33, 0.0 }
 0x6a5   : > { %v17177_v28 = vrot.slane %v17176_v4, 4 }
 0x6a7   : > { %v17178_v47 = vadd.f32 %v17177_v28, %v17176_v4 }
 0x6a9   : > { %v17179_v50 = vrot.slane %v17178_v47, 2 }
 0x6ab   : > { %v17180_v25 = vadd.f32 %v17179_v50, %v17178_v47 }
 0x6ad   : > { %v17181_v44 = vrot.slane %v17180_v25, 1 }
 0x6af   : > { %v17182_v54 = vadd.f32 %v17181_v44, %v17180_v25 }
 0x6b1   : > { %v17184_v16 = vadd.f32 %v17183_v0, %v17182_v54 }
 0x6b3   : > { %vm17185_vm1 = vcmp.gt.f32.partialorder %v17184_v16, 0.0  ;;  %v17186_v35 = vmul.f32 0.1, %v17184_v16 }
 0x6b5   : > { %v17187_v51 = vsel %vm17185_vm1, %v17184_v16, %v17186_v35 }
 0x6b6   : > { %v17192_v30 = vrot.slane %v17187_v51, %v17191_v19 }
 0x6b8   : > { %v17193_v55 = vmul.f32 %v17192_v30, %v17188_v36 }
 0x6ba   : > { %v17194_v32 = vsel %vm17175_vm0, %v17193_v55, 0.0 }
 0x6bb   : > { %17195 = vadd.xlane.f32.xlu0 %v17194_v32 }
 0x748   : > { %v17196_v5 = vpop.xlane.xlu0 %17195 }
 0x749   : > { %v17198_v42 = vadd.f32 %v17197_v40, %v17196_v5 }
 0x74b   : > { %v17331_v60 = vmul.f32 -1.442695, %v17198_v42 }
 0x74d   : > { %18334 = vpow2.f32 %v17331_v60 }
 0x757   : > { %v18335_v18 = vpop.eup %18334 }
 0x758   : > { %v17202_v43 = vadd.f32 1.0, %v18335_v18 }
 0x75a   : > { %18336 = vrcp.f32 %v17202_v43 }
 0x764   : > { %v18337_v27 = vpop.eup %18336 }
 0x765   : > { %17210 = vperm.xlu0 %18333, %v18337_v27  }
 0x7e4   : > { %v17211_v46 = vpop.permute.xlu0 %17210 }
 0x7e5   : > { %v17213_v9 = vmul.f32 %v17211_v46, %v17161_v23  ;;  %v17215_v29 = vmul.f32 %v17211_v46, %v17163_v62  ;;  %v17214_v3 = vmul.f32 %v17211_v46, %v17162_v1 }
 0x7e7   : > { %17223 = vrot.lane.b32.xlu0 %v17215_v29, %s18361_s12  ;;  %17219 = vrot.lane.b32.xlu1 %v17213_v9, %s18361_s12 }
 0x7eb   : > { %17221 = vrot.lane.b32.xlu1 %v17214_v3, %s18361_s12 }
 0x859   : > { %v17220_v53 = vpop.permute.xlu1 %17219  ;;  %v17224_v8 = vpop.permute.xlu0 %17223 }
 0x85a   : > { %v17230_v45 = vadd.f32 %v17220_v53, %v17205_v21 }
 0x85c   : > { %17236 = vrot.lane.b32.xlu1 %v17230_v45, %s18353_s17 }
 0x85d   : > { %v17222_v22 = vpop.permute.xlu1 %17221 }
 0x85e   : > { %v17225_v14 = vsel %vm9732_vm8, %v17220_v53, %v17222_v22  ;;  %v17226_v13 = vsel %vm9732_vm8, %v17222_v22, %v17224_v8 }
 0x85f   : > { %v17231_v7 = vadd.f32 %v17225_v14, %v17206_v49  ;;  %v17232_v38 = vadd.f32 %v17226_v13, %v17207_v59 }
 0x861   : > { %17240 = vrot.lane.b32.xlu1 %v17232_v38, %s18353_s17  ;;  %17238 = vrot.lane.b32.xlu0 %v17231_v7, %s18353_s17 }
 0x8ce   : > { %v17237_v11 = vpop.permute.xlu1 %17236 }
 0x8d3   : > { %v17239_v2 = vpop.permute.xlu0 %17238  ;;  %v17241_v6 = vpop.permute.xlu1 %17240 }
 0x8d4   : > { %v17242_v48 = vsel %vm3185_vm6, %v17237_v11, %v17239_v2  ;;  %v17243_v20 = vsel %vm3185_vm6, %v17239_v2, %v17241_v6  ;;  %17249 = vst.msk [vmem:[%s332_s19 + $0x10] sm:$0xff] %vm8782_vm15, %v17241_v6 }
 0x8d5   : > { %17247 = vst [vmem:[%s332_s19] sm:$0xff] %v17242_v48  ;;  %17248 = vst [vmem:[%s332_s19 + $0x8] sm:$0xff] %v17243_v20 }
 0x8d6 PF: > { %s19_s30 = sadd.s32 1, %s18347_s30  }
 0x8d7   : > { %p16_p4 = scmp.ge.s32.totalorder %s19_s30, 4  }
 0x8d9   :  { %18 = sbr.rel (!%p16_p4) target bundleno = 1 (0x1), region = 102 }

</bundles_post_ra>
